<compile_context>
chip_gen: v7x
topology: tpu7x:2x2x1
jax: 0.10.0
libtpu: 0.0.40
codegen_flags: <defaults>
</compile_context>

<pallas_src>
import functools

import jax
import jax.numpy as jnp
from jax.experimental import pallas as pl
from jax.experimental.pallas import tpu as pltpu

BLOCK_CHANNELS = (64, 128, 256, 512)

# Per-generation tile cap (points per grid step) and scoped-VMEM request.
_CHIP_CONFIG = {
    "v5e": dict(tile_cap=1024, vmem_limit=64 * 1024 * 1024),
    "v6e": dict(tile_cap=2048, vmem_limit=64 * 1024 * 1024),
    "v7x": dict(tile_cap=2048, vmem_limit=48 * 1024 * 1024),
    "other": dict(tile_cap=1024, vmem_limit=None),
}


def _chip_generation():
    try:
        kind = jax.devices()[0].device_kind.lower()
    except Exception:
        return "other"
    if "v5e" in kind or "v5 lite" in kind or "v5lite" in kind:
        return "v5e"
    if "v6" in kind:
        return "v6e"
    if "v7" in kind or "tpu7" in kind:
        return "v7x"
    return "other"


def _pick_tile_n(points, cap):
    """Largest multiple of 8 that divides `points` and is <= cap."""
    for cand in range(min(points, cap), 7, -1):
        if points % cand == 0 and cand % 8 == 0:
            return cand
    return None


def _encoder_kernel(x_ref,
                    w1_ref, b1_ref, w2_ref, b2_ref,
                    w3_ref, b3_ref, w4_ref, b4_ref,
                    o_ref, max_sc, *, single_step):
    x = x_ref[...]  # (tile_n, Cin) f32 (leading batch dim squeezed away)

    # Layer 1 fully in f32 (K=6, <1% of FLOPs): preserves XYZ precision.
    h = jnp.maximum(
        jnp.dot(x, w1_ref[...], preferred_element_type=jnp.float32)
        + b1_ref[...], 0.0)
    # Layers 2-4: bf16 MXU inputs, f32 accumulation; bias/ReLU in f32 on VPU.
    h = jnp.maximum(
        jnp.dot(h.astype(jnp.bfloat16), w2_ref[...],
                preferred_element_type=jnp.float32) + b2_ref[...], 0.0)
    h = jnp.maximum(
        jnp.dot(h.astype(jnp.bfloat16), w3_ref[...],
                preferred_element_type=jnp.float32) + b3_ref[...], 0.0)
    h = jnp.dot(h.astype(jnp.bfloat16), w4_ref[...],
                preferred_element_type=jnp.float32) + b4_ref[...]
    # (tile_n, 512); no ReLU after the last MLP linear (matches nn.Sequential).

    # Fold tile_n rows down to 8 sublanes with a pure-VPU cross-vreg max
    # (the reshape is a layout-preserving sublane split); the 8->1 sublane
    # (XLU) reduce happens once per output block.
    tn, c = h.shape
    h8 = jnp.max(h.reshape(tn // 8, 8, c), axis=0)            # (8, 512)

    if single_step:
        # Whole point cloud in one tile: no running-max scratch needed.
        o_ref[...] = jnp.max(h8, axis=0, keepdims=True).astype(o_ref.dtype)
    else:
        n = pl.program_id(2)

        @pl.when(n == 0)
        def _():
            max_sc[...] = jnp.full_like(max_sc, -jnp.inf)

        max_sc[...] = jnp.maximum(max_sc[...], h8)

        @pl.when(n == pl.num_programs(2) - 1)
        def _():
            o_ref[...] = jnp.max(max_sc[...], axis=0,
                                 keepdims=True).astype(o_ref.dtype)


def pointnet_encoder_xyzrgb(x, params, *, tile_n=None, n_split=None):
    """x: (B, N, Cin) float32.  params: dict of f32 weights/biases.  Returns (B, out)."""
    B, N, Cin = x.shape
    chip = _chip_generation()
    cfg = _CHIP_CONFIG[chip]

    # Only v7x has 2 TensorCores per chip: split the point axis when B == 1 so
    # both cores get work; on v5e/v6e the extra axis is pure overhead.
    if n_split is None:
        n_split = 2 if (chip == "v7x" and B == 1 and N % 16 == 0) else 1
    assert N % n_split == 0
    points_per_split = N // n_split

    if tile_n is None:
        tile_n = _pick_tile_n(points_per_split, cfg["tile_cap"])
        if tile_n is None:
            raise ValueError(f"N={N}: no tile size that is a multiple of 8 divides it")
    tile_n = min(tile_n, points_per_split)
    assert tile_n % 8 == 0, "tile_n must be a multiple of 8 (sublane constraint)"
    assert N % (tile_n * n_split) == 0, "N must be divisible by tile_n * n_split"
    tiles_per_split = points_per_split // tile_n
    single_step = tiles_per_split == 1

    # bf16 MXU weights for layers 2-4 (halves weight DMA/VMEM); layer 1 and
    # all biases stay f32.
    w1, b1 = params["w1"], params["b1"]
    w2, b2 = params["w2"].astype(jnp.bfloat16), params["b2"]
    w3, b3 = params["w3"].astype(jnp.bfloat16), params["b3"]
    w4, b4 = params["w4"].astype(jnp.bfloat16), params["b4"]
    w5, b5 = params["w5"], params["b5"]
    feat = w4.shape[1]  # 512

    # Constant-index weight/bias specs (see NOTE above about pl.Buffered(1)).
    full = lambda shape: pl.BlockSpec(shape, lambda b, s, n: (0,) * len(shape))

    flops = 2 * B * N * sum(i * o for i, o in
                            zip((Cin,) + BLOCK_CHANNELS[:-1], BLOCK_CHANNELS))
    weight_bytes = sum(int(a.size) * a.dtype.itemsize
                       for a in (w1, b1, w2, b2, w3, b3, w4, b4))
    bytes_accessed = int(x.size) * 4 + weight_bytes + B * n_split * feat * 4

    cp_kwargs = dict(dimension_semantics=("parallel", "parallel", "arbitrary"))
    if cfg["vmem_limit"] is not None:
        cp_kwargs["vmem_limit_bytes"] = cfg["vmem_limit"]

    pooled = pl.pallas_call(
        functools.partial(_encoder_kernel, single_step=single_step),
        out_shape=jax.ShapeDtypeStruct((B, n_split, feat), jnp.float32),
        grid_spec=pltpu.PrefetchScalarGridSpec(
            num_scalar_prefetch=0,
            grid=(B, n_split, tiles_per_split),
            in_specs=[
                pl.BlockSpec((pl.Squeezed(), tile_n, Cin),
                             lambda b, s, n: (b, s * tiles_per_split + n, 0)),
                full(w1.shape), full(b1.shape),
                full(w2.shape), full(b2.shape),
                full(w3.shape), full(b3.shape),
                full(w4.shape), full(b4.shape),
            ],
            out_specs=pl.BlockSpec((pl.Squeezed(), 1, feat),
                                   lambda b, s, n: (b, s, 0)),
            scratch_shapes=[pltpu.VMEM((8, feat), jnp.float32)],
        ),
        compiler_params=pltpu.CompilerParams(**cp_kwargs),
        cost_estimate=pl.CostEstimate(flops=flops, transcendentals=0,
                                      bytes_accessed=bytes_accessed),
    )(x, w1, b1, w2, b2, w3, b3, w4, b4)

    g = jnp.max(pooled, axis=1)          # combine split partial maxes -> (B, 512)
    return g @ w5 + b5                   # final projection: tiny, runs in XLA


def init_params(key, in_channels, out_channels):
    """Deterministic init mimicking nn.Linear default (uniform +-1/sqrt(fan_in))."""
    dims = [in_channels, *BLOCK_CHANNELS, out_channels]
    params = {}
    for i in range(5):
        fan_in, fan_out = dims[i], dims[i + 1]
        key, kw, kb = jax.random.split(key, 3)
        bound = 1.0 / jnp.sqrt(fan_in)
        # Biases stored as (1, fan_out) so they broadcast against (tile_n, fan_out).
        params[f"w{i+1}"] = jax.random.uniform(
            kw, (fan_in, fan_out), jnp.float32, -bound, bound)
        params[f"b{i+1}"] = jax.random.uniform(
            kb, (1, fan_out), jnp.float32, -bound, bound)
    return params


def reference_forward(x, params):
    """Pure-JAX reference with the same precision choices as the kernel."""
    h = jnp.maximum(
        jnp.dot(x, params["w1"], precision=jax.lax.Precision.HIGHEST)
        + params["b1"], 0.0)

    def lin_bf16(h, w, b):
        return jnp.dot(h.astype(jnp.bfloat16), w.astype(jnp.bfloat16),
                       preferred_element_type=jnp.float32) + b

    h = jnp.maximum(lin_bf16(h, params["w2"], params["b2"]), 0.0)
    h = jnp.maximum(lin_bf16(h, params["w3"], params["b3"]), 0.0)
    h = lin_bf16(h, params["w4"], params["b4"])
    g = jnp.max(h, axis=1)                      # torch.max(x, 1)[0]
    return g @ params["w5"] + params["b5"]


if __name__ == "__main__":
    key = jax.random.PRNGKey(0)
    k_x, k_p = jax.random.split(key)

    B, N, Cin = 2, 512, 6          # 2 point clouds x 512 points x XYZRGB
    out_channels = 128             # small out_channels (module default is 1024)

    x = jax.random.normal(k_x, (B, N, Cin), jnp.float32)
    params = init_params(k_p, Cin, out_channels)

    fwd = jax.jit(pointnet_encoder_xyzrgb)
    y = fwd(x, params)
    jax.block_until_ready(y)

    y_ref = reference_forward(x, params)
    assert y.shape == (B, out_channels)
    max_err = float(jnp.max(jnp.abs(y - y_ref)))
    assert jnp.allclose(y, y_ref, atol=1e-2, rtol=1e-2), max_err

    print("KERNEL_OK")
</pallas_src>

<mosaic_0001>
module attributes {stable_mosaic.version = 11 : i64} {
  func.func @_encoder_kernel(%arg0: i32, %arg1: i32, %arg2: i32, %arg3: memref<1x512x6xf32, #tpu.memory_space<vmem>>, %arg4: memref<6x64xf32, #tpu.memory_space<vmem>>, %arg5: memref<1x64xf32, #tpu.memory_space<vmem>>, %arg6: memref<64x128xbf16, #tpu.memory_space<vmem>>, %arg7: memref<1x128xf32, #tpu.memory_space<vmem>>, %arg8: memref<128x256xbf16, #tpu.memory_space<vmem>>, %arg9: memref<1x256xf32, #tpu.memory_space<vmem>>, %arg10: memref<256x512xbf16, #tpu.memory_space<vmem>>, %arg11: memref<1x512xf32, #tpu.memory_space<vmem>>, %arg12: memref<1x1x512xf32, #tpu.memory_space<vmem>>, %arg13: memref<8x512xf32, #tpu.memory_space<vmem>>) attributes {dimension_semantics = [#tpu.dimension_semantics<parallel>, #tpu.dimension_semantics<parallel>, #tpu.dimension_semantics<arbitrary>], iteration_bounds = array<i64: 2, 1, 1>, scalar_prefetch = 0 : i64, scratch_operands = 1 : i64, tpu.core_type = #tpu.core_type<tc>, window_params = [{transform_indices = @transform_0, window_bounds = array<i64: 1, 512, 6>}, {pipeline_mode = #tpu.pipeline_mode<synchronous>, transform_indices = @transform_1, window_bounds = array<i64: 6, 64>}, {pipeline_mode = #tpu.pipeline_mode<synchronous>, transform_indices = @transform_2, window_bounds = array<i64: 1, 64>}, {pipeline_mode = #tpu.pipeline_mode<synchronous>, transform_indices = @transform_3, window_bounds = array<i64: 64, 128>}, {pipeline_mode = #tpu.pipeline_mode<synchronous>, transform_indices = @transform_4, window_bounds = array<i64: 1, 128>}, {pipeline_mode = #tpu.pipeline_mode<synchronous>, transform_indices = @transform_5, window_bounds = array<i64: 128, 256>}, {pipeline_mode = #tpu.pipeline_mode<synchronous>, transform_indices = @transform_6, window_bounds = array<i64: 1, 256>}, {pipeline_mode = #tpu.pipeline_mode<synchronous>, transform_indices = @transform_7, window_bounds = array<i64: 256, 512>}, {pipeline_mode = #tpu.pipeline_mode<synchronous>, transform_indices = @transform_8, window_bounds = array<i64: 1, 512>}, {transform_indices = @transform_9, window_bounds = array<i64: 1, 1, 512>}]} {
    %c0 = arith.constant 0 : index
    %c0_0 = arith.constant 0 : index
    %c0_1 = arith.constant 0 : index
    %0 = vector.load %arg3[%c0, %c0_0, %c0_1] : memref<1x512x6xf32, #tpu.memory_space<vmem>>, vector<1x512x6xf32>
    %1 = vector.shape_cast %0 : vector<1x512x6xf32> to vector<512x6xf32>
    %c0_2 = arith.constant 0 : index
    %c0_3 = arith.constant 0 : index
    %2 = vector.load %arg4[%c0_2, %c0_3] : memref<6x64xf32, #tpu.memory_space<vmem>>, vector<6x64xf32>
    %cst = arith.constant dense<0.000000e+00> : vector<512x64xf32>
    %3 = tpu.matmul %1, %2, %cst {dimension_numbers = #tpu.dot_dimension_numbers<[1], [0], [0], [1], [0, 0, 1, 1], [], []>} : vector<512x6xf32>, vector<6x64xf32>, vector<512x64xf32> -> vector<512x64xf32>
    %c0_4 = arith.constant 0 : index
    %c0_5 = arith.constant 0 : index
    %4 = vector.load %arg5[%c0_4, %c0_5] : memref<1x64xf32, #tpu.memory_space<vmem>>, vector<1x64xf32>
    %5 = vector.broadcast %4 : vector<1x64xf32> to vector<512x64xf32>
    %6 = arith.addf %3, %5 : vector<512x64xf32>
    %cst_6 = arith.constant 0.000000e+00 : f32
    %7 = vector.broadcast %cst_6 : f32 to vector<512x64xf32>
    %8 = arith.maximumf %6, %7 : vector<512x64xf32>
    %9 = arith.truncf %8 : vector<512x64xf32> to vector<512x64xbf16>
    %c0_7 = arith.constant 0 : index
    %c0_8 = arith.constant 0 : index
    %10 = vector.load %arg6[%c0_7, %c0_8] : memref<64x128xbf16, #tpu.memory_space<vmem>>, vector<64x128xbf16>
    %cst_9 = arith.constant dense<0.000000e+00> : vector<512x128xf32>
    %11 = tpu.matmul %9, %10, %cst_9 {dimension_numbers = #tpu.dot_dimension_numbers<[1], [0], [0], [1], [0, 0, 1, 1], [], []>} : vector<512x64xbf16>, vector<64x128xbf16>, vector<512x128xf32> -> vector<512x128xf32>
    %c0_10 = arith.constant 0 : index
    %c0_11 = arith.constant 0 : index
    %12 = vector.load %arg7[%c0_10, %c0_11] : memref<1x128xf32, #tpu.memory_space<vmem>>, vector<1x128xf32>
    %13 = vector.broadcast %12 : vector<1x128xf32> to vector<512x128xf32>
    %14 = arith.addf %11, %13 : vector<512x128xf32>
    %cst_12 = arith.constant 0.000000e+00 : f32
    %15 = vector.broadcast %cst_12 : f32 to vector<512x128xf32>
    %16 = arith.maximumf %14, %15 : vector<512x128xf32>
    %17 = arith.truncf %16 : vector<512x128xf32> to vector<512x128xbf16>
    %c0_13 = arith.constant 0 : index
    %c0_14 = arith.constant 0 : index
    %18 = vector.load %arg8[%c0_13, %c0_14] : memref<128x256xbf16, #tpu.memory_space<vmem>>, vector<128x256xbf16>
    %cst_15 = arith.constant dense<0.000000e+00> : vector<512x256xf32>
    %19 = tpu.matmul %17, %18, %cst_15 {dimension_numbers = #tpu.dot_dimension_numbers<[1], [0], [0], [1], [0, 0, 1, 1], [], []>} : vector<512x128xbf16>, vector<128x256xbf16>, vector<512x256xf32> -> vector<512x256xf32>
    %c0_16 = arith.constant 0 : index
    %c0_17 = arith.constant 0 : index
    %20 = vector.load %arg9[%c0_16, %c0_17] : memref<1x256xf32, #tpu.memory_space<vmem>>, vector<1x256xf32>
    %21 = vector.broadcast %20 : vector<1x256xf32> to vector<512x256xf32>
    %22 = arith.addf %19, %21 : vector<512x256xf32>
    %cst_18 = arith.constant 0.000000e+00 : f32
    %23 = vector.broadcast %cst_18 : f32 to vector<512x256xf32>
    %24 = arith.maximumf %22, %23 : vector<512x256xf32>
    %25 = arith.truncf %24 : vector<512x256xf32> to vector<512x256xbf16>
    %c0_19 = arith.constant 0 : index
    %c0_20 = arith.constant 0 : index
    %26 = vector.load %arg10[%c0_19, %c0_20] : memref<256x512xbf16, #tpu.memory_space<vmem>>, vector<256x512xbf16>
    %cst_21 = arith.constant dense<0.000000e+00> : vector<512x512xf32>
    %27 = tpu.matmul %25, %26, %cst_21 {dimension_numbers = #tpu.dot_dimension_numbers<[1], [0], [0], [1], [0, 0, 1, 1], [], []>} : vector<512x256xbf16>, vector<256x512xbf16>, vector<512x512xf32> -> vector<512x512xf32>
    %c0_22 = arith.constant 0 : index
    %c0_23 = arith.constant 0 : index
    %28 = vector.load %arg11[%c0_22, %c0_23] : memref<1x512xf32, #tpu.memory_space<vmem>>, vector<1x512xf32>
    %29 = vector.broadcast %28 : vector<1x512xf32> to vector<512x512xf32>
    %30 = arith.addf %27, %29 : vector<512x512xf32>
    %31 = vector.shape_cast %30 : vector<512x512xf32> to vector<64x8x512xf32>
    %cst_24 = arith.constant dense<0xFF800000> : vector<8x512xf32>
    %32 = vector.multi_reduction <maximumf>, %31, %cst_24 [0] : vector<64x8x512xf32> to vector<8x512xf32>
    %cst_25 = arith.constant dense<0xFF800000> : vector<512xf32>
    %33 = vector.multi_reduction <maximumf>, %32, %cst_25 [0] : vector<8x512xf32> to vector<512xf32>
    %34 = vector.shape_cast %33 : vector<512xf32> to vector<1x512xf32>
    %c0_26 = arith.constant 0 : index
    %c0_27 = arith.constant 0 : index
    %c0_28 = arith.constant 0 : index
    %35 = vector.load %arg12[%c0_26, %c0_27, %c0_28] : memref<1x1x512xf32, #tpu.memory_space<vmem>>, vector<1x1x512xf32>
    %36 = vector.shape_cast %35 : vector<1x1x512xf32> to vector<1x512xf32>
    %37 = vector.shape_cast %34 : vector<1x512xf32> to vector<1x1x512xf32>
    tpu.vector_store %arg12[%c0_26, %c0_27, %c0_28], %37 {strides = array<i32>} : memref<1x1x512xf32, #tpu.memory_space<vmem>>, vector<1x1x512xf32>,
    return
  }
  func.func @transform_0(%arg0: i32, %arg1: i32, %arg2: i32) -> (i32, i32, i32) {
    %c1_i32 = arith.constant 1 : i32
    %0 = arith.muli %arg1, %c1_i32 : i32
    %1 = arith.addi %0, %arg2 : i32
    %c0_i32 = arith.constant 0 : i32
    %c0_i32_0 = arith.constant 0 : i32
    return %arg0, %1, %c0_i32 : i32, i32, i32
  }
  func.func @transform_1(%arg0: i32, %arg1: i32, %arg2: i32) -> (i32, i32) {
    %c0_i32 = arith.constant 0 : i32
    %c0_i32_0 = arith.constant 0 : i32
    %c0_i32_1 = arith.constant 0 : i32
    return %c0_i32, %c0_i32_0 : i32, i32
  }
  func.func @transform_2(%arg0: i32, %arg1: i32, %arg2: i32) -> (i32, i32) {
    %c0_i32 = arith.constant 0 : i32
    %c0_i32_0 = arith.constant 0 : i32
    %c0_i32_1 = arith.constant 0 : i32
    return %c0_i32, %c0_i32_0 : i32, i32
  }
  func.func @transform_3(%arg0: i32, %arg1: i32, %arg2: i32) -> (i32, i32) {
    %c0_i32 = arith.constant 0 : i32
    %c0_i32_0 = arith.constant 0 : i32
    %c0_i32_1 = arith.constant 0 : i32
    return %c0_i32, %c0_i32_0 : i32, i32
  }
  func.func @transform_4(%arg0: i32, %arg1: i32, %arg2: i32) -> (i32, i32) {
    %c0_i32 = arith.constant 0 : i32
    %c0_i32_0 = arith.constant 0 : i32
    %c0_i32_1 = arith.constant 0 : i32
    return %c0_i32, %c0_i32_0 : i32, i32
  }
  func.func @transform_5(%arg0: i32, %arg1: i32, %arg2: i32) -> (i32, i32) {
    %c0_i32 = arith.constant 0 : i32
    %c0_i32_0 = arith.constant 0 : i32
    %c0_i32_1 = arith.constant 0 : i32
    return %c0_i32, %c0_i32_0 : i32, i32
  }
  func.func @transform_6(%arg0: i32, %arg1: i32, %arg2: i32) -> (i32, i32) {
    %c0_i32 = arith.constant 0 : i32
    %c0_i32_0 = arith.constant 0 : i32
    %c0_i32_1 = arith.constant 0 : i32
    return %c0_i32, %c0_i32_0 : i32, i32
  }
  func.func @transform_7(%arg0: i32, %arg1: i32, %arg2: i32) -> (i32, i32) {
    %c0_i32 = arith.constant 0 : i32
    %c0_i32_0 = arith.constant 0 : i32
    %c0_i32_1 = arith.constant 0 : i32
    return %c0_i32, %c0_i32_0 : i32, i32
  }
  func.func @transform_8(%arg0: i32, %arg1: i32, %arg2: i32) -> (i32, i32) {
    %c0_i32 = arith.constant 0 : i32
    %c0_i32_0 = arith.constant 0 : i32
    %c0_i32_1 = arith.constant 0 : i32
    return %c0_i32, %c0_i32_0 : i32, i32
  }
  func.func @transform_9(%arg0: i32, %arg1: i32, %arg2: i32) -> (i32, i32, i32) {
    %c0_i32 = arith.constant 0 : i32
    %c0_i32_0 = arith.constant 0 : i32
    return %arg0, %arg1, %c0_i32 : i32, i32, i32
  }
}

</mosaic_0001>

<bundles_post_ra>
// kernel: pointnet_encoder_xyzrgb.1
= control target key start
LH: loop header
LB: loop body
LE: loop exit
PB: predicated region body
PF: predicated region fallthrough
CT: control target
= control target key end

     0   :  { %s4523_s30 = smov 0   ;;  %s4525_s10 = smov 0   ;;  %s5795_s0 = inlined_call_operand.vmem [shape: f32[2,512,6], index: 0, kind: input, shape index: {}]   ;;  %s5796_s1 = inlined_call_operand.vmem [shape: f32[6,64], index: 1, kind: input, shape index: {}]   ;;  %s5797_s2 = inlined_call_operand.vmem [shape: f32[1,64], index: 2, kind: input, shape index: {}]   ;;  %s5798_s3 = inlined_call_operand.vmem [shape: bf16[64,128], index: 3, kind: input, shape index: {}]   ;;  %s5799_s4 = inlined_call_operand.vmem [shape: f32[1,128], index: 4, kind: input, shape index: {}]   ;;  %s5800_s5 = inlined_call_operand.vmem [shape: bf16[128,256], index: 5, kind: input, shape index: {}]   ;;  %s5801_s6 = inlined_call_operand.vmem [shape: f32[1,256], index: 6, kind: input, shape index: {}]   ;;  %s5802_s7 = inlined_call_operand.vmem [shape: bf16[256,512], index: 7, kind: input, shape index: {}]   ;;  %s5803_s8 = inlined_call_operand.vmem [shape: f32[1,512], index: 8, kind: input, shape index: {}]   ;;  %s5804_s9 = inlined_call_operand.vmem [shape: f32[2,1,512], index: 9, kind: output, shape index: {}]  }
   0x1   :  { %s4527_s11 = smov 0  }
   0x2 LB: > { %s38_s12 = sadd.s32 1, %s4465_s10  ;;  %p3820_p0 = scmp.ge.s32.totalorder %s4469_s11, 1  ;;  %s4469_s11 = sphi %s4527_s11, %s19_s11   ;;  %s4465_s10 = sphi %s4525_s10, %s5806_s10   ;;  %s4461_s30 = sphi %s4523_s30, %s5805_s30  }
   0x3   : > { %p40_p1 = scmp.ge.s32.totalorder %s38_s12, 2  ;;  %p319_p2 = scmp.lt.s32.totalorder %s4469_s11, 3 }
   0x5   : > { %s5808_s12 = smov (%p40_p1, %s38_s12), 0  ;;  %p320_p3 = pnand %p3820_p0, %p319_p2 }
   0x6   : > { %v448_v0 = vld [vmem:[%s5796_s1] sm:$0x3f] (!%p320_p3)  ;;  %vm649_vm0 = vcmask (!%p320_p3), 1045504   ;;  %p365_p4 = scmp.lt.s32.totalorder (!%p320_p3), %s4461_s30, 1  ;;  %vm456_vm1 = vcmask (!%p320_p3), 48128   ;;  %v4324_v46 = vld [vmem:[%s5798_s3 + $0x8] sm:$0xff] (!%p320_p3)  }
   0x7   : > { %323 = sbr.rel (%p320_p3) target bundleno = 1173 (0x495), region = 56  ;;  %4111 = vmatprep.subr.msk.mxu0 (!%p320_p3), %vm649_vm0, %v448_v0  ;;  %v4323_v1 = vld [vmem:[%s5798_s3] sm:$0xff] (!%p320_p3)   ;;  %v4325_v49 = vld [vmem:[%s5798_s3 + $0x10] sm:$0xff] (!%p320_p3)   ;;  %v4326_v52 = vld [vmem:[%s5798_s3 + $0x18] sm:$0xff] (!%p320_p3)   ;;  %vm1173_vm2 = vcmask (!%p320_p3), 523264  }
   0x8   : > { %4112 = vmatpush3.msk.msra.mxu0 (!%p320_p3), %vm649_vm0, %v448_v0  ;;  %4209 = vmatprep.subr.bf16.mxu1 (!%p320_p3), %v4323_v1 }
   0x9   : > { %4210 = vmatpush3.bf16.msra.mxu1 (!%p320_p3), %v4323_v1 }
   0xa   : > { %4211 = vmatprep.subr.bf16.mxu1 (!%p320_p3), %v4324_v46 }
   0xd   : > { %4212 = vmatpush3.bf16.msra.mxu1 (!%p320_p3), %v4324_v46 }
   0xe   : > { %s5810_s30 = smov (!%p365_p4, %s4461_s30), 1  ;;  %4213 = vmatprep.subr.bf16.mxu1 %v4325_v49 }
   0xf   : > { %s4009_s15 = sshll.u32 %s5810_s30, 9  ;;  %s3823_s25 = sshll.u32 %s5810_s30, 2 }
  0x10   : > { %s4553_s20 = scalar_lea.vmem %s5795_s0, %s4009_s15  ;;  %s382_s28 = scalar_lea.vmem %s5804_s9, %s3823_s25 }
  0x11   : > { %v384_v2 = vld [vmem:[%s4553_s20] sm:$0xff]  ;;  %v385_v3 = vld [vmem:[%s4553_s20 + $0x8] sm:$0xff]  ;;  %v386_v4 = vld [vmem:[%s4553_s20 + $0x10] sm:$0xff]  ;;  %4214 = vmatpush3.bf16.msra.mxu1 %v4325_v49 }
  0x12   : > { %4113 = vmatprep.mubr.msk.f32.mxu0 %vm456_vm1, %v384_v2  ;;  %v387_v5 = vld [vmem:[%s4553_s20 + $0x18] sm:$0xff]  ;;  %v388_v6 = vld [vmem:[%s4553_s20 + $0x20] sm:$0xff]  ;;  %v389_v7 = vld [vmem:[%s4553_s20 + $0x28] sm:$0xff]  ;;  %4215 = vmatprep.subr.bf16.mxu1 %v4326_v52 }
  0x13   : > { %4114 = vmatmul.mubr.msk.f32.vlgmr.msra.gmra.mrb[0].mxu0 %vm456_vm1, %v385_v3  ;;  %v390_v8 = vld [vmem:[%s4553_s20 + $0x30] sm:$0xff]  ;;  %v391_v9 = vld [vmem:[%s4553_s20 + $0x38] sm:$0xff]  ;;  %v392_v10 = vld [vmem:[%s4553_s20 + $0x40] sm:$0xff] }
  0x14   : > { %4116 = vmatprep.mubr.msk.f32.mxu0 %vm456_vm1, %v386_v4  ;;  %v393_v11 = vld [vmem:[%s4553_s20 + $0x48] sm:$0xff]  ;;  %v394_v12 = vld [vmem:[%s4553_s20 + $0x50] sm:$0xff]  ;;  %v395_v13 = vld [vmem:[%s4553_s20 + $0x58] sm:$0xff] }
  0x15   : > { %v396_v14 = vld [vmem:[%s4553_s20 + $0x60] sm:$0xff]  ;;  %v397_v15 = vld [vmem:[%s4553_s20 + $0x68] sm:$0xff]  ;;  %v398_v16 = vld [vmem:[%s4553_s20 + $0x70] sm:$0xff]  ;;  %4216 = vmatpush3.bf16.msra.mxu1 %v4326_v52 }
  0x16   : > { %v399_v17 = vld [vmem:[%s4553_s20 + $0x78] sm:$0xff]  ;;  %v400_v18 = vld [vmem:[%s4553_s20 + $0x80] sm:$0xff]  ;;  %v401_v19 = vld [vmem:[%s4553_s20 + $0x88] sm:$0xff] }
  0x17   : > { %4117 = vmatmul.mubr.msk.f32.gmra.mrb[2].mxu0 %vm456_vm1, %v387_v5  ;;  %v402_v20 = vld [vmem:[%s4553_s20 + $0x90] sm:$0xff]  ;;  %v403_v21 = vld [vmem:[%s4553_s20 + $0x98] sm:$0xff]  ;;  %v404_v22 = vld [vmem:[%s4553_s20 + $0xa0] sm:$0xff] }
  0x18   : > { %4119 = vmatprep.mubr.msk.f32.mxu0 %vm456_vm1, %v388_v6  ;;  %v405_v23 = vld [vmem:[%s4553_s20 + $0xa8] sm:$0xff]  ;;  %v406_v24 = vld [vmem:[%s4553_s20 + $0xb0] sm:$0xff]  ;;  %v407_v25 = vld [vmem:[%s4553_s20 + $0xb8] sm:$0xff] }
  0x19   : > { %v408_v26 = vld [vmem:[%s4553_s20 + $0xc0] sm:$0xff]  ;;  %v409_v27 = vld [vmem:[%s4553_s20 + $0xc8] sm:$0xff]  ;;  %v410_v28 = vld [vmem:[%s4553_s20 + $0xd0] sm:$0xff] }
  0x1a   : > { %v411_v29 = vld [vmem:[%s4553_s20 + $0xd8] sm:$0xff]  ;;  %v412_v30 = vld [vmem:[%s4553_s20 + $0xe0] sm:$0xff]  ;;  %v413_v31 = vld [vmem:[%s4553_s20 + $0xe8] sm:$0xff] }
  0x1b   : > { %4120 = vmatmul.mubr.msk.f32.gmra.mrb[4].mxu0 %vm456_vm1, %v389_v7  ;;  %v414_v32 = vld [vmem:[%s4553_s20 + $0xf0] sm:$0xff]  ;;  %v415_v33 = vld [vmem:[%s4553_s20 + $0xf8] sm:$0xff]  ;;  %v416_v34 = vld [vmem:[%s4553_s20 + $0x100] sm:$0xff] }
  0x1c   : > { %4122 = vmatprep.mubr.msk.f32.mxu0 %vm456_vm1, %v390_v8  ;;  %v417_v35 = vld [vmem:[%s4553_s20 + $0x108] sm:$0xff]  ;;  %v418_v36 = vld [vmem:[%s4553_s20 + $0x110] sm:$0xff]  ;;  %v419_v37 = vld [vmem:[%s4553_s20 + $0x118] sm:$0xff] }
  0x1d   : > { %v420_v38 = vld [vmem:[%s4553_s20 + $0x120] sm:$0xff]  ;;  %v421_v39 = vld [vmem:[%s4553_s20 + $0x128] sm:$0xff]  ;;  %v422_v40 = vld [vmem:[%s4553_s20 + $0x130] sm:$0xff] }
  0x1e   : > { %v423_v41 = vld [vmem:[%s4553_s20 + $0x138] sm:$0xff]  ;;  %v424_v42 = vld [vmem:[%s4553_s20 + $0x140] sm:$0xff]  ;;  %v425_v43 = vld [vmem:[%s4553_s20 + $0x148] sm:$0xff] }
  0x1f   : > { %4123 = vmatmul.mubr.msk.f32.gmra.mrb[6].mxu0 %vm456_vm1, %v391_v9  ;;  %v426_v44 = vld [vmem:[%s4553_s20 + $0x150] sm:$0xff]  ;;  %v427_v45 = vld [vmem:[%s4553_s20 + $0x158] sm:$0xff]  ;;  %v428_v47 = vld [vmem:[%s4553_s20 + $0x160] sm:$0xff] }
  0x20   : > { %4125 = vmatprep.mubr.msk.f32.mxu0 %vm456_vm1, %v392_v10  ;;  %v429_v48 = vld [vmem:[%s4553_s20 + $0x168] sm:$0xff]  ;;  %v430_v50 = vld [vmem:[%s4553_s20 + $0x170] sm:$0xff]  ;;  %v431_v51 = vld [vmem:[%s4553_s20 + $0x178] sm:$0xff] }
  0x21   : > { %v432_v53 = vld [vmem:[%s4553_s20 + $0x180] sm:$0xff]  ;;  %v433_v54 = vld [vmem:[%s4553_s20 + $0x188] sm:$0xff]  ;;  %v434_v55 = vld [vmem:[%s4553_s20 + $0x190] sm:$0xff] }
  0x22   : > { %v435_v56 = vld [vmem:[%s4553_s20 + $0x198] sm:$0xff]  ;;  %v436_v57 = vld [vmem:[%s4553_s20 + $0x1a0] sm:$0xff]  ;;  %v437_v58 = vld [vmem:[%s4553_s20 + $0x1a8] sm:$0xff] }
  0x23   : > { %4126 = vmatmul.mubr.msk.f32.gmra.mrb[8].mxu0 %vm456_vm1, %v393_v11  ;;  %v438_v59 = vld [vmem:[%s4553_s20 + $0x1b0] sm:$0xff]  ;;  %v439_v60 = vld [vmem:[%s4553_s20 + $0x1b8] sm:$0xff]  ;;  %v440_v61 = vld [vmem:[%s4553_s20 + $0x1c0] sm:$0xff] }
  0x24   : > { %4128 = vmatprep.mubr.msk.f32.mxu0 %vm456_vm1, %v394_v12  ;;  %v441_v62 = vld [vmem:[%s4553_s20 + $0x1c8] sm:$0xff]  ;;  %v442_v63 = vld [vmem:[%s4553_s20 + $0x1d0] sm:$0xff]  ;;  %v443_v0 = vld [vmem:[%s4553_s20 + $0x1d8] sm:$0xff] }
  0x25   : > { %v444_v1 = vld [vmem:[%s4553_s20 + $0x1e0] sm:$0xff]  ;;  %v445_v2 = vld [vmem:[%s4553_s20 + $0x1e8] sm:$0xff]  ;;  %v446_v3 = vld [vmem:[%s4553_s20 + $0x1f0] sm:$0xff] }
  0x26   : > { %v447_v4 = vld [vmem:[%s4553_s20 + $0x1f8] sm:$0xff]  ;;  %v4327_v5 = vld [vmem:[%s5800_s5] ss:$8 sps:$4 sm:$0xff]   ;;  %v4329_v6 = vld [vmem:[%s5800_s5 + $0x4] ss:$8 sps:$4 sm:$0xff]  }
  0x27   : > { %4129 = vmatmul.mubr.msk.f32.gmra.mrb[10].mxu0 %vm456_vm1, %v395_v13  ;;  %1763 = vmatprep.subr.bf16.mxu0 %v4329_v6  ;;  %v4701_v7 = vld [vmem:[%s5800_s5 + $0x10] ss:$8 sps:$4 sm:$0xff]   ;;  %v4332_v8 = vld [vmem:[%s5800_s5 + $0x14] ss:$8 sps:$4 sm:$0xff]   ;;  %v4710_v9 = vld [vmem:[%s5800_s5 + $0x20] ss:$8 sps:$4 sm:$0xff]  }
  0x28   : > { %4131 = vmatprep.mubr.msk.f32.mxu0 %vm456_vm1, %v396_v14  ;;  %4281 = vmatprep.subr.bf16.mxu1 %v4329_v6  ;;  %v4715_v10 = vld [vmem:[%s5800_s5 + $0x24] ss:$8 sps:$4 sm:$0xff]   ;;  %v4722_v11 = vld [vmem:[%s5800_s5 + $0x30] ss:$8 sps:$4 sm:$0xff]   ;;  %v4727_v12 = vld [vmem:[%s5800_s5 + $0x34] ss:$8 sps:$4 sm:$0xff]  }
  0x29   : > { %1764 = vmatpush1.bf16.msra.mxu0 %v4327_v5  ;;  %v4734_v13 = vld [vmem:[%s5800_s5 + $0x40] ss:$8 sps:$4 sm:$0xff]   ;;  %v4739_v14 = vld [vmem:[%s5800_s5 + $0x44] ss:$8 sps:$4 sm:$0xff]  }
  0x2a   : > { %1765 = vmatprep.subr.bf16.mxu0 %v4332_v8 }
  0x2b   : > { %4132 = vmatmul.mubr.msk.f32.gmra.mrb[12].mxu0 %vm456_vm1, %v397_v15  ;;  %v4746_v15 = vld [vmem:[%s5800_s5 + $0x50] ss:$8 sps:$4 sm:$0xff]  }
  0x2c   : > { %4134 = vmatprep.mubr.msk.f32.mxu0 %vm456_vm1, %v398_v16  ;;  %v4751_v16 = vld [vmem:[%s5800_s5 + $0x54] ss:$8 sps:$4 sm:$0xff]  }
  0x2d   : > { %1766 = vmatpush1.bf16.msra.mxu0 %v4701_v7 }
  0x2e   : > { %1767 = vmatprep.subr.bf16.mxu0 %v4715_v10 }
  0x2f   : > { %4135 = vmatmul.mubr.msk.f32.gmra.mrb[14].mxu0 %vm456_vm1, %v399_v17  ;;  %v4758_v17 = vld [vmem:[%s5797_s2] ss:$0 sm:$0xff] }
  0x30   : > { %4137 = vmatprep.mubr.msk.f32.mxu0 %vm456_vm1, %v400_v18 }
  0x31   : > { %1768 = vmatpush1.bf16.msra.mxu0 %v4710_v9 }
  0x32   : > { %1769 = vmatprep.subr.bf16.mxu0 %v4727_v12 }
  0x33   : > { %4138 = vmatmul.mubr.msk.f32.gmra.mrb[16].mxu0 %vm456_vm1, %v401_v19 }
  0x34   : > { %4140 = vmatprep.mubr.msk.f32.mxu0 %vm456_vm1, %v402_v20 }
  0x35   : > { %1770 = vmatpush1.bf16.msra.mxu0 %v4722_v11 }
  0x36   : > { %1771 = vmatprep.subr.bf16.mxu0 %v4739_v14 }
  0x37   : > { %4141 = vmatmul.mubr.msk.f32.gmra.mrb[18].mxu0 %vm456_vm1, %v403_v21 }
  0x38   : > { %4143 = vmatprep.mubr.msk.f32.mxu0 %vm456_vm1, %v404_v22  ;;  %v4765_v22 = vld [vmem:[%s5800_s5 + $0x60] ss:$8 sps:$4 sm:$0xff]  }
  0x39   : > { %1772 = vmatpush1.bf16.msra.mxu0 %v4734_v13 }
  0x3a   : > { %1773 = vmatprep.subr.bf16.mxu0 %v4751_v16 }
  0x3b   : > { %4144 = vmatmul.mubr.msk.f32.gmra.mrb[20].mxu0 %vm456_vm1, %v405_v23  ;;  %v4770_v23 = vld [vmem:[%s5800_s5 + $0x64] ss:$8 sps:$4 sm:$0xff]  }
  0x3c   : > { %4146 = vmatprep.mubr.msk.f32.mxu0 %vm456_vm1, %v406_v24 }
  0x3d   : > { %1774 = vmatpush1.bf16.msra.mxu0 %v4746_v15 }
  0x3e   : > { %1775 = vmatprep.subr.bf16.mxu0 %v4770_v23 }
  0x3f   : > { %4147 = vmatmul.mubr.msk.f32.gmra.mrb[22].mxu0 %vm456_vm1, %v407_v25 }
  0x40   : > { %4149 = vmatprep.mubr.msk.f32.mxu0 %vm456_vm1, %v408_v26 }
  0x41   : > { %1776 = vmatpush1.bf16.msra.mxu0 %v4765_v22 }
  0x43   : > { %4150 = vmatmul.mubr.msk.f32.gmra.mrb[24].mxu0 %vm456_vm1, %v409_v27  ;;  %v4776_v27 = vld [vmem:[%s5800_s5 + $0x74] ss:$8 sps:$4 sm:$0xff]  }
  0x44   : > { %4152 = vmatprep.mubr.msk.f32.mxu0 %vm456_vm1, %v410_v28  ;;  %1777 = vmatprep.subr.bf16.mxu0 %v4776_v27 }
  0x47   : > { %4153 = vmatmul.mubr.msk.f32.gmra.mrb[26].mxu0 %vm456_vm1, %v411_v29 }
  0x48   : > { %4155 = vmatprep.mubr.msk.f32.mxu0 %vm456_vm1, %v412_v30  ;;  %v4783_v30 = vld [vmem:[%s5800_s5 + $0x70] ss:$8 sps:$4 sm:$0xff]  }
  0x49   : > { %1778 = vmatpush1.bf16.msra.mxu0 %v4783_v30 }
  0x4b   : > { %4156 = vmatmul.mubr.msk.f32.gmra.mrb[28].mxu0 %vm456_vm1, %v413_v31 }
  0x4c   : > { %4158 = vmatprep.mubr.msk.f32.mxu0 %vm456_vm1, %v414_v32 }
  0x4f   : > { %4159 = vmatmul.mubr.msk.f32.gmra.mrb[30].mxu0 %vm456_vm1, %v415_v33 }
  0x50   : > { %4161 = vmatprep.mubr.msk.f32.mxu0 %vm456_vm1, %v416_v34 }
  0x53   : > { %4162 = vmatmul.mubr.msk.f32.gmra.mrb[32].mxu0 %vm456_vm1, %v417_v35 }
  0x54   : > { %4164 = vmatprep.mubr.msk.f32.mxu0 %vm456_vm1, %v418_v36 }
  0x57   : > { %4165 = vmatmul.mubr.msk.f32.gmra.mrb[34].mxu0 %vm456_vm1, %v419_v37 }
  0x58   : > { %4167 = vmatprep.mubr.msk.f32.mxu0 %vm456_vm1, %v420_v38 }
  0x5b   : > { %4168 = vmatmul.mubr.msk.f32.gmra.mrb[36].mxu0 %vm456_vm1, %v421_v39 }
  0x5c   : > { %4170 = vmatprep.mubr.msk.f32.mxu0 %vm456_vm1, %v422_v40 }
  0x5f   : > { %4171 = vmatmul.mubr.msk.f32.gmra.mrb[38].mxu0 %vm456_vm1, %v423_v41 }
  0x60   : > { %4173 = vmatprep.mubr.msk.f32.mxu0 %vm456_vm1, %v424_v42 }
  0x63   : > { %4174 = vmatmul.mubr.msk.f32.gmra.mrb[40].mxu0 %vm456_vm1, %v425_v43 }
  0x64   : > { %4176 = vmatprep.mubr.msk.f32.mxu0 %vm456_vm1, %v426_v44 }
  0x67   : > { %4177 = vmatmul.mubr.msk.f32.gmra.mrb[42].mxu0 %vm456_vm1, %v427_v45 }
  0x68   : > { %4179 = vmatprep.mubr.msk.f32.mxu0 %vm456_vm1, %v428_v47 }
  0x6b   : > { %4180 = vmatmul.mubr.msk.f32.gmra.mrb[44].mxu0 %vm456_vm1, %v429_v48 }
  0x6c   : > { %4182 = vmatprep.mubr.msk.f32.mxu0 %vm456_vm1, %v430_v50 }
  0x6f   : > { %4183 = vmatmul.mubr.msk.f32.gmra.mrb[46].mxu0 %vm456_vm1, %v431_v51 }
  0x70   : > { %4185 = vmatprep.mubr.msk.f32.mxu0 %vm456_vm1, %v432_v53 }
  0x73   : > { %4186 = vmatmul.mubr.msk.f32.gmra.mrb[48].mxu0 %vm456_vm1, %v433_v54 }
  0x74   : > { %4188 = vmatprep.mubr.msk.f32.mxu0 %vm456_vm1, %v434_v55 }
  0x77   : > { %4189 = vmatmul.mubr.msk.f32.gmra.mrb[50].mxu0 %vm456_vm1, %v435_v56 }
  0x78   : > { %4191 = vmatprep.mubr.msk.f32.mxu0 %vm456_vm1, %v436_v57 }
  0x7b   : > { %4192 = vmatmul.mubr.msk.f32.gmra.mrb[52].mxu0 %vm456_vm1, %v437_v58 }
  0x7c   : > { %4194 = vmatprep.mubr.msk.f32.mxu0 %vm456_vm1, %v438_v59 }
  0x7f   : > { %4195 = vmatmul.mubr.msk.f32.gmra.mrb[54].mxu0 %vm456_vm1, %v439_v60 }
  0x80   : > { %4197 = vmatprep.mubr.msk.f32.mxu0 %vm456_vm1, %v440_v61 }
  0x83   : > { %4198 = vmatmul.mubr.msk.f32.gmra.mrb[56].mxu0 %vm456_vm1, %v441_v62 }
  0x84   : > { %4200 = vmatprep.mubr.msk.f32.mxu0 %vm456_vm1, %v442_v63 }
  0x87   : > { %4201 = vmatmul.mubr.msk.f32.gmra.mrb[58].mxu0 %vm456_vm1, %v443_v0 }
  0x88   : > { %4203 = vmatprep.mubr.msk.f32.mxu0 %vm456_vm1, %v444_v1 }
  0x8b   : > { %4204 = vmatmul.mubr.msk.f32.gmra.mrb[60].mxu0 %vm456_vm1, %v445_v2 }
  0x8c   : > { %4206 = vmatprep.mubr.msk.f32.mxu0 %vm456_vm1, %v446_v3 }
  0x8f   : > { %4207 = vmatmul.mubr.msk.f32.gmra.mrb[62].mxu0 %vm456_vm1, %v447_v4 }
  0xe6   : > { %v4115_v18 = vpop.f32.mrb[0].mxu0 }
  0xe7   : > { %v725_v19 = vadd.f32 %v4115_v18, %v4758_v17  ;;  %v719_v20 = vpop.f32.mrb[1].mxu0 }
  0xe8   : > { %v720_v21 = vadd.f32 %v4758_v17, %v719_v20 }
  0xe9   : > { %v1039_v24 = vmax.f32 %v725_v19, 0.0 }
  0xea   : > { %v4118_v25 = vpop.f32.mrb[2].mxu0  ;;  %v1038_v26 = vmax.f32 %v720_v21, 0.0 }
  0xeb   : > { %v735_v28 = vadd.f32 %v4118_v25, %v4758_v17  ;;  %v729_v29 = vpop.f32.mrb[3].mxu0 }
  0xec   : > { %v730_v31 = vadd.f32 %v4758_v17, %v729_v29  ;;  %v1102_v32 = vpack.c.bf16 %v1039_v24, %v1038_v26 }
  0xed   : > { %v1041_v33 = vmax.f32 %v735_v28, 0.0 }
  0xee   : > { %v1040_v34 = vmax.f32 %v730_v31, 0.0  ;;  %4217 = vmatprep.mubr.msk.bf16.mxu1 %vm1173_vm2, %v1102_v32  ;;  %v4121_v35 = vpop.f32.mrb[4].mxu0 }
  0xef   : > { %v745_v36 = vadd.f32 %v4121_v35, %v4758_v17  ;;  %v739_v37 = vpop.f32.mrb[5].mxu0 }
  0xf0   : > { %v1103_v38 = vpack.c.bf16 %v1041_v33, %v1040_v34  ;;  %v740_v39 = vadd.f32 %v4758_v17, %v739_v37 }
  0xf1   : > { %v1043_v40 = vmax.f32 %v745_v36, 0.0 }
  0xf2   : > { %4218 = vmatmul.mubr.msk.bf16.vlgmr.msra.gmra.mrb[0].mxu1 %vm1173_vm2, %v1103_v38  ;;  %v1042_v41 = vmax.f32 %v740_v39, 0.0  ;;  %v4124_v42 = vpop.f32.mrb[6].mxu0 }
  0xf3   : > { %v755_v43 = vadd.f32 %v4124_v42, %v4758_v17  ;;  %v749_v44 = vpop.f32.mrb[7].mxu0  ;;  %4289 = vmatpush1.bf16.msra.mxu1 %v4327_v5 }
  0xf4   : > { %v1104_v45 = vpack.c.bf16 %v1043_v40, %v1042_v41  ;;  %v750_v46 = vadd.f32 %v4758_v17, %v749_v44  ;;  %4282 = vmatprep.subr.bf16.mxu1 %v4332_v8 }
  0xf5   : > { %v1045_v47 = vmax.f32 %v755_v43, 0.0 }
  0xf6   : > { %v1044_v48 = vmax.f32 %v750_v46, 0.0  ;;  %4221 = vmatprep.mubr.msk.bf16.mxu1 %vm1173_vm2, %v1104_v45  ;;  %v4127_v49 = vpop.f32.mrb[8].mxu0 }
  0xf7   : > { %v765_v50 = vadd.f32 %v4127_v49, %v4758_v17  ;;  %v759_v51 = vpop.f32.mrb[9].mxu0  ;;  %4290 = vmatpush1.bf16.msra.mxu1 %v4701_v7 }
  0xf8   : > { %v1105_v52 = vpack.c.bf16 %v1045_v47, %v1044_v48  ;;  %v760_v53 = vadd.f32 %v4758_v17, %v759_v51  ;;  %4283 = vmatprep.subr.bf16.mxu1 %v4715_v10 }
  0xf9   : > { %v1047_v54 = vmax.f32 %v765_v50, 0.0 }
  0xfa   : > { %4222 = vmatmul.mubr.msk.bf16.gmra.mrb[4].mxu1 %vm1173_vm2, %v1105_v52  ;;  %v1046_v55 = vmax.f32 %v760_v53, 0.0  ;;  %v4130_v56 = vpop.f32.mrb[10].mxu0 }
  0xfb   : > { %v775_v57 = vadd.f32 %v4130_v56, %v4758_v17  ;;  %v769_v58 = vpop.f32.mrb[11].mxu0  ;;  %4291 = vmatpush1.bf16.msra.mxu1 %v4710_v9 }
  0xfc   : > { %v1106_v59 = vpack.c.bf16 %v1047_v54, %v1046_v55  ;;  %v770_v60 = vadd.f32 %v4758_v17, %v769_v58  ;;  %4284 = vmatprep.subr.bf16.mxu1 %v4727_v12 }
  0xfd   : > { %v1049_v61 = vmax.f32 %v775_v57, 0.0 }
  0xfe   : > { %v1048_v62 = vmax.f32 %v770_v60, 0.0  ;;  %4225 = vmatprep.mubr.msk.bf16.mxu1 %vm1173_vm2, %v1106_v59  ;;  %v4133_v63 = vpop.f32.mrb[12].mxu0 }
  0xff   : > { %v785_v0 = vadd.f32 %v4133_v63, %v4758_v17  ;;  %v779_v1 = vpop.f32.mrb[13].mxu0  ;;  %4292 = vmatpush1.bf16.msra.mxu1 %v4722_v11 }
 0x100   : > { %v1107_v2 = vpack.c.bf16 %v1049_v61, %v1048_v62  ;;  %v780_v3 = vadd.f32 %v4758_v17, %v779_v1  ;;  %4285 = vmatprep.subr.bf16.mxu1 %v4739_v14 }
 0x101   : > { %v1051_v4 = vmax.f32 %v785_v0, 0.0 }
 0x102   : > { %4226 = vmatmul.mubr.msk.bf16.gmra.mrb[8].mxu1 %vm1173_vm2, %v1107_v2  ;;  %v1050_v5 = vmax.f32 %v780_v3, 0.0  ;;  %v4136_v6 = vpop.f32.mrb[14].mxu0 }
 0x103   : > { %v795_v7 = vadd.f32 %v4136_v6, %v4758_v17  ;;  %v789_v8 = vpop.f32.mrb[15].mxu0  ;;  %4293 = vmatpush1.bf16.msra.mxu1 %v4734_v13 }
 0x104   : > { %v1108_v9 = vpack.c.bf16 %v1051_v4, %v1050_v5  ;;  %v790_v10 = vadd.f32 %v4758_v17, %v789_v8  ;;  %4286 = vmatprep.subr.bf16.mxu1 %v4751_v16 }
 0x105   : > { %v1053_v11 = vmax.f32 %v795_v7, 0.0 }
 0x106   : > { %v1052_v12 = vmax.f32 %v790_v10, 0.0  ;;  %4229 = vmatprep.mubr.msk.bf16.mxu1 %vm1173_vm2, %v1108_v9  ;;  %v4139_v14 = vpop.f32.mrb[16].mxu0 }
 0x107   : > { %v805_v18 = vadd.f32 %v4139_v14, %v4758_v17  ;;  %v799_v19 = vpop.f32.mrb[17].mxu0  ;;  %4294 = vmatpush1.bf16.msra.mxu1 %v4746_v15 }
 0x108   : > { %v1109_v20 = vpack.c.bf16 %v1053_v11, %v1052_v12  ;;  %v800_v21 = vadd.f32 %v4758_v17, %v799_v19  ;;  %4287 = vmatprep.subr.bf16.mxu1 %v4770_v23 }
 0x109   : > { %v1055_v13 = vmax.f32 %v805_v18, 0.0 }
 0x10a   : > { %4230 = vmatmul.mubr.msk.bf16.gmra.mrb[12].mxu1 %vm1173_vm2, %v1109_v20  ;;  %v1054_v24 = vmax.f32 %v800_v21, 0.0  ;;  %v4142_v16 = vpop.f32.mrb[18].mxu0 }
 0x10b   : > { %v815_v25 = vadd.f32 %v4142_v16, %v4758_v17  ;;  %v809_v26 = vpop.f32.mrb[19].mxu0  ;;  %4295 = vmatpush1.bf16.msra.mxu1 %v4765_v22 }
 0x10c   : > { %v1110_v28 = vpack.c.bf16 %v1055_v13, %v1054_v24  ;;  %v810_v29 = vadd.f32 %v4758_v17, %v809_v26  ;;  %4288 = vmatprep.subr.bf16.mxu1 %v4776_v27 }
 0x10d   : > { %v1057_v15 = vmax.f32 %v815_v25, 0.0 }
 0x10e   : > { %v1056_v31 = vmax.f32 %v810_v29, 0.0  ;;  %v4145_v32 = vpop.f32.mrb[20].mxu0  ;;  %4233 = vmatprep.mubr.msk.bf16.mxu1 %vm1173_vm2, %v1110_v28 }
 0x10f   : > { %v825_v23 = vadd.f32 %v4145_v32, %v4758_v17  ;;  %v819_v33 = vpop.f32.mrb[21].mxu0  ;;  %4296 = vmatpush1.bf16.msra.mxu1 %v4783_v30 }
 0x110   : > { %v1111_v34 = vpack.c.bf16 %v1057_v15, %v1056_v31  ;;  %v820_v35 = vadd.f32 %v4758_v17, %v819_v33 }
 0x111   : > { %v1059_v36 = vmax.f32 %v825_v23, 0.0 }
 0x112   : > { %v1058_v22 = vmax.f32 %v820_v35, 0.0  ;;  %v4148_v37 = vpop.f32.mrb[22].mxu0  ;;  %4234 = vmatmul.mubr.msk.bf16.gmra.mrb[16].mxu1 %vm1173_vm2, %v1111_v34 }
 0x113   : > { %v835_v27 = vadd.f32 %v4148_v37, %v4758_v17  ;;  %v829_v38 = vpop.f32.mrb[23].mxu0 }
 0x114   : > { %v1112_v39 = vpack.c.bf16 %v1059_v36, %v1058_v22  ;;  %v830_v40 = vadd.f32 %v4758_v17, %v829_v38 }
 0x115   : > { %v1061_v41 = vmax.f32 %v835_v27, 0.0 }
 0x116   : > { %v1060_v42 = vmax.f32 %v830_v40, 0.0  ;;  %v4151_v43 = vpop.f32.mrb[24].mxu0  ;;  %4237 = vmatprep.mubr.msk.bf16.mxu1 %vm1173_vm2, %v1112_v39 }
 0x117   : > { %v845_v30 = vadd.f32 %v4151_v43, %v4758_v17  ;;  %v839_v44 = vpop.f32.mrb[25].mxu0 }
 0x118   : > { %v1113_v45 = vpack.c.bf16 %v1061_v41, %v1060_v42  ;;  %v840_v46 = vadd.f32 %v4758_v17, %v839_v44 }
 0x119   : > { %v1063_v47 = vmax.f32 %v845_v30, 0.0 }
 0x11a   : > { %v1062_v48 = vmax.f32 %v840_v46, 0.0  ;;  %v4154_v49 = vpop.f32.mrb[26].mxu0  ;;  %4238 = vmatmul.mubr.msk.bf16.gmra.mrb[20].mxu1 %vm1173_vm2, %v1113_v45 }
 0x11b   : > { %v855_v50 = vadd.f32 %v4154_v49, %v4758_v17  ;;  %v849_v51 = vpop.f32.mrb[27].mxu0 }
 0x11c   : > { %v1114_v52 = vpack.c.bf16 %v1063_v47, %v1062_v48  ;;  %v850_v53 = vadd.f32 %v4758_v17, %v849_v51 }
 0x11d   : > { %v1065_v54 = vmax.f32 %v855_v50, 0.0 }
 0x11e   : > { %v1064_v55 = vmax.f32 %v850_v53, 0.0  ;;  %v4157_v56 = vpop.f32.mrb[28].mxu0  ;;  %4241 = vmatprep.mubr.msk.bf16.mxu1 %vm1173_vm2, %v1114_v52 }
 0x11f   : > { %v865_v57 = vadd.f32 %v4157_v56, %v4758_v17  ;;  %v859_v58 = vpop.f32.mrb[29].mxu0 }
 0x120   : > { %v1115_v59 = vpack.c.bf16 %v1065_v54, %v1064_v55  ;;  %v860_v60 = vadd.f32 %v4758_v17, %v859_v58 }
 0x121   : > { %v1067_v61 = vmax.f32 %v865_v57, 0.0 }
 0x122   : > { %v1066_v62 = vmax.f32 %v860_v60, 0.0  ;;  %v4160_v63 = vpop.f32.mrb[30].mxu0  ;;  %4242 = vmatmul.mubr.msk.bf16.gmra.mrb[24].mxu1 %vm1173_vm2, %v1115_v59 }
 0x123   : > { %v875_v0 = vadd.f32 %v4160_v63, %v4758_v17  ;;  %v869_v1 = vpop.f32.mrb[31].mxu0 }
 0x124   : > { %v1116_v2 = vpack.c.bf16 %v1067_v61, %v1066_v62  ;;  %v870_v3 = vadd.f32 %v4758_v17, %v869_v1 }
 0x125   : > { %v1069_v4 = vmax.f32 %v875_v0, 0.0 }
 0x126   : > { %v1068_v5 = vmax.f32 %v870_v3, 0.0  ;;  %v4163_v6 = vpop.f32.mrb[32].mxu0  ;;  %4245 = vmatprep.mubr.msk.bf16.mxu1 %vm1173_vm2, %v1116_v2 }
 0x127   : > { %v885_v7 = vadd.f32 %v4163_v6, %v4758_v17  ;;  %v879_v8 = vpop.f32.mrb[33].mxu0 }
 0x128   : > { %v1117_v9 = vpack.c.bf16 %v1069_v4, %v1068_v5  ;;  %v880_v10 = vadd.f32 %v4758_v17, %v879_v8 }
 0x129   : > { %v1071_v11 = vmax.f32 %v885_v7, 0.0 }
 0x12a   : > { %v1070_v12 = vmax.f32 %v880_v10, 0.0  ;;  %v4166_v14 = vpop.f32.mrb[34].mxu0  ;;  %4246 = vmatmul.mubr.msk.bf16.gmra.mrb[28].mxu1 %vm1173_vm2, %v1117_v9 }
 0x12b   : > { %v895_v18 = vadd.f32 %v4166_v14, %v4758_v17  ;;  %v889_v19 = vpop.f32.mrb[35].mxu0 }
 0x12c   : > { %v1118_v20 = vpack.c.bf16 %v1071_v11, %v1070_v12  ;;  %v890_v21 = vadd.f32 %v4758_v17, %v889_v19 }
 0x12d   : > { %v1073_v13 = vmax.f32 %v895_v18, 0.0  ;;  %v4471_v18 = vmov 0  }
 0x12e   : > { %v1072_v24 = vmax.f32 %v890_v21, 0.0  ;;  %v4169_v16 = vpop.f32.mrb[36].mxu0  ;;  %4249 = vmatprep.mubr.msk.bf16.mxu1 %vm1173_vm2, %v1118_v20  ;;  %1795 = vmatprep.mubr.bf16.mxu0 %v4471_v18 }
 0x12f   : > { %v905_v25 = vadd.f32 %v4169_v16, %v4758_v17  ;;  %v899_v26 = vpop.f32.mrb[37].mxu0 }
 0x130   : > { %v1119_v28 = vpack.c.bf16 %v1073_v13, %v1072_v24  ;;  %v900_v29 = vadd.f32 %v4758_v17, %v899_v26 }
 0x131   : > { %v1075_v15 = vmax.f32 %v905_v25, 0.0 }
 0x132   : > { %v1074_v31 = vmax.f32 %v900_v29, 0.0  ;;  %v4172_v32 = vpop.f32.mrb[38].mxu0  ;;  %4250 = vmatmul.mubr.msk.bf16.gmra.mrb[32].mxu1 %vm1173_vm2, %v1119_v28 }
 0x133   : > { %v915_v23 = vadd.f32 %v4172_v32, %v4758_v17  ;;  %v909_v33 = vpop.f32.mrb[39].mxu0 }
 0x134   : > { %v1120_v34 = vpack.c.bf16 %v1075_v15, %v1074_v31  ;;  %v910_v35 = vadd.f32 %v4758_v17, %v909_v33 }
 0x135   : > { %v1077_v36 = vmax.f32 %v915_v23, 0.0 }
 0x136   : > { %v1076_v22 = vmax.f32 %v910_v35, 0.0  ;;  %4253 = vmatprep.mubr.msk.bf16.mxu1 %vm1173_vm2, %v1120_v34  ;;  %v4175_v37 = vpop.f32.mrb[40].mxu0 }
 0x137   : > { %v925_v27 = vadd.f32 %v4175_v37, %v4758_v17  ;;  %v919_v38 = vpop.f32.mrb[41].mxu0 }
 0x138   : > { %v1121_v39 = vpack.c.bf16 %v1077_v36, %v1076_v22  ;;  %v920_v40 = vadd.f32 %v4758_v17, %v919_v38 }
 0x139   : > { %v1079_v41 = vmax.f32 %v925_v27, 0.0 }
 0x13a   : > { %4254 = vmatmul.mubr.msk.bf16.gmra.mrb[36].mxu1 %vm1173_vm2, %v1121_v39  ;;  %v1078_v42 = vmax.f32 %v920_v40, 0.0  ;;  %v4178_v43 = vpop.f32.mrb[42].mxu0 }
 0x13b   : > { %v935_v30 = vadd.f32 %v4178_v43, %v4758_v17  ;;  %v929_v44 = vpop.f32.mrb[43].mxu0 }
 0x13c   : > { %v1122_v45 = vpack.c.bf16 %v1079_v41, %v1078_v42  ;;  %v930_v46 = vadd.f32 %v4758_v17, %v929_v44 }
 0x13d   : > { %v1081_v47 = vmax.f32 %v935_v30, 0.0 }
 0x13e   : > { %v1080_v48 = vmax.f32 %v930_v46, 0.0  ;;  %4257 = vmatprep.mubr.msk.bf16.mxu1 %vm1173_vm2, %v1122_v45  ;;  %v4181_v49 = vpop.f32.mrb[44].mxu0 }
 0x13f   : > { %v945_v50 = vadd.f32 %v4181_v49, %v4758_v17  ;;  %v939_v51 = vpop.f32.mrb[45].mxu0 }
 0x140   : > { %v1123_v52 = vpack.c.bf16 %v1081_v47, %v1080_v48  ;;  %v940_v53 = vadd.f32 %v4758_v17, %v939_v51 }
 0x141   : > { %v1083_v54 = vmax.f32 %v945_v50, 0.0 }
 0x142   : > { %4258 = vmatmul.mubr.msk.bf16.gmra.mrb[40].mxu1 %vm1173_vm2, %v1123_v52  ;;  %v1082_v55 = vmax.f32 %v940_v53, 0.0  ;;  %v4184_v56 = vpop.f32.mrb[46].mxu0 }
 0x143   : > { %v955_v57 = vadd.f32 %v4184_v56, %v4758_v17  ;;  %v949_v58 = vpop.f32.mrb[47].mxu0 }
 0x144   : > { %v1124_v59 = vpack.c.bf16 %v1083_v54, %v1082_v55  ;;  %v950_v60 = vadd.f32 %v4758_v17, %v949_v58  ;;  %v4353_v58 = vld [vmem:[%s5802_s7 + $0xc] ss:$16 sps:$4 sm:$0xff]  }
 0x145   : > { %v1085_v61 = vmax.f32 %v955_v57, 0.0  ;;  %3067 = vmatprep.subr.bf16.mxu0 %v4353_v58  ;;  %v4378_v58 = vld [vmem:[%s5802_s7 + $0xa8] ss:$16 sps:$4 sm:$0xff]  }
 0x146   : > { %v1084_v62 = vmax.f32 %v950_v60, 0.0  ;;  %4261 = vmatprep.mubr.msk.bf16.mxu1 %vm1173_vm2, %v1124_v59  ;;  %v4187_v63 = vpop.f32.mrb[48].mxu0  ;;  %v4359_v59 = vld [vmem:[%s5802_s7 + $0x4] ss:$16 sps:$4 sm:$0xff]  }
 0x147   : > { %v965_v0 = vadd.f32 %v4187_v63, %v4758_v17  ;;  %v959_v1 = vpop.f32.mrb[49].mxu0  ;;  %2714 = vmatprep.subr.bf16.mxu1 %v4359_v59 }
 0x148   : > { %v1125_v2 = vpack.c.bf16 %v1085_v61, %v1084_v62  ;;  %v960_v3 = vadd.f32 %v4758_v17, %v959_v1 }
 0x149   : > { %v1087_v4 = vmax.f32 %v965_v0, 0.0 }
 0x14a   : > { %4262 = vmatmul.mubr.msk.bf16.gmra.mrb[44].mxu1 %vm1173_vm2, %v1125_v2  ;;  %v1086_v5 = vmax.f32 %v960_v3, 0.0  ;;  %v4190_v6 = vpop.f32.mrb[50].mxu0 }
 0x14b   : > { %v975_v7 = vadd.f32 %v4190_v6, %v4758_v17  ;;  %v969_v8 = vpop.f32.mrb[51].mxu0 }
 0x14c   : > { %v1126_v9 = vpack.c.bf16 %v1087_v4, %v1086_v5  ;;  %v970_v10 = vadd.f32 %v4758_v17, %v969_v8 }
 0x14d   : > { %v1089_v11 = vmax.f32 %v975_v7, 0.0 }
 0x14e   : > { %v1088_v12 = vmax.f32 %v970_v10, 0.0  ;;  %4265 = vmatprep.mubr.msk.bf16.mxu1 %vm1173_vm2, %v1126_v9  ;;  %v4193_v14 = vpop.f32.mrb[52].mxu0  ;;  %v4351_v9 = vld [vmem:[%s5802_s7 + $0x8] ss:$16 sps:$4 sm:$0xff]  }
 0x14f   : > { %v985_v19 = vadd.f32 %v4193_v14, %v4758_v17  ;;  %v979_v20 = vpop.f32.mrb[53].mxu0 }
 0x150   : > { %v1127_v21 = vpack.c.bf16 %v1089_v11, %v1088_v12  ;;  %v980_v13 = vadd.f32 %v4758_v17, %v979_v20  ;;  %v4356_v12 = vld [vmem:[%s5802_s7 + $0x2c] ss:$16 sps:$4 sm:$0xff]  }
 0x151   : > { %v1091_v24 = vmax.f32 %v985_v19, 0.0 }
 0x152   : > { %4266 = vmatmul.mubr.msk.bf16.gmra.mrb[48].mxu1 %vm1173_vm2, %v1127_v21  ;;  %v1090_v16 = vmax.f32 %v980_v13, 0.0  ;;  %v4196_v25 = vpop.f32.mrb[54].mxu0 }
 0x153   : > { %v995_v26 = vadd.f32 %v4196_v25, %v4758_v17  ;;  %v989_v28 = vpop.f32.mrb[55].mxu0  ;;  %v4354_v25 = vld [vmem:[%s5802_s7 + $0x28] ss:$16 sps:$4 sm:$0xff]  }
 0x154   : > { %v1128_v29 = vpack.c.bf16 %v1091_v24, %v1090_v16  ;;  %v990_v15 = vadd.f32 %v4758_v17, %v989_v28 }
 0x155   : > { %v1093_v31 = vmax.f32 %v995_v26, 0.0 }
 0x156   : > { %v1092_v32 = vmax.f32 %v990_v15, 0.0  ;;  %4269 = vmatprep.mubr.msk.bf16.mxu1 %vm1173_vm2, %v1128_v29  ;;  %v4199_v23 = vpop.f32.mrb[56].mxu0  ;;  %v4362_v29 = vld [vmem:[%s5802_s7 + $0x4c] ss:$16 sps:$4 sm:$0xff]  }
 0x157   : > { %v1005_v33 = vadd.f32 %v4199_v23, %v4758_v17  ;;  %v999_v34 = vpop.f32.mrb[57].mxu0  ;;  %v4360_v23 = vld [vmem:[%s5802_s7 + $0x48] ss:$16 sps:$4 sm:$0xff]  }
 0x158   : > { %v1129_v35 = vpack.c.bf16 %v1093_v31, %v1092_v32  ;;  %v1000_v36 = vadd.f32 %v4758_v17, %v999_v34 }
 0x159   : > { %v1095_v22 = vmax.f32 %v1005_v33, 0.0 }
 0x15a   : > { %4270 = vmatmul.mubr.msk.bf16.gmra.mrb[52].mxu1 %vm1173_vm2, %v1129_v35  ;;  %v1094_v37 = vmax.f32 %v1000_v36, 0.0  ;;  %v4202_v27 = vpop.f32.mrb[58].mxu0  ;;  %v4368_v35 = vld [vmem:[%s5802_s7 + $0x6c] ss:$16 sps:$4 sm:$0xff]  }
 0x15b   : > { %v1015_v38 = vadd.f32 %v4202_v27, %v4758_v17  ;;  %v1009_v39 = vpop.f32.mrb[59].mxu0 }
 0x15c   : > { %v1130_v40 = vpack.c.bf16 %v1095_v22, %v1094_v37  ;;  %v1010_v41 = vadd.f32 %v4758_v17, %v1009_v39 }
 0x15d   : > { %v1097_v42 = vmax.f32 %v1015_v38, 0.0 }
 0x15e   : > { %v1096_v43 = vmax.f32 %v1010_v41, 0.0  ;;  %4273 = vmatprep.mubr.msk.bf16.mxu1 %vm1173_vm2, %v1130_v40  ;;  %v4205_v30 = vpop.f32.mrb[60].mxu0  ;;  %v4366_v41 = vld [vmem:[%s5802_s7 + $0x68] ss:$16 sps:$4 sm:$0xff]  }
 0x15f   : > { %v1025_v44 = vadd.f32 %v4205_v30, %v4758_v17  ;;  %v1019_v45 = vpop.f32.mrb[61].mxu0  ;;  %v4374_v30 = vld [vmem:[%s5802_s7 + $0x8c] ss:$16 sps:$4 sm:$0xff]  }
 0x160   : > { %v1131_v46 = vpack.c.bf16 %v1097_v42, %v1096_v43  ;;  %v1020_v47 = vadd.f32 %v4758_v17, %v1019_v45 }
 0x161   : > { %v1099_v48 = vmax.f32 %v1025_v44, 0.0 }
 0x162   : > { %4274 = vmatmul.mubr.msk.bf16.gmra.mrb[56].mxu1 %vm1173_vm2, %v1131_v46  ;;  %v1098_v49 = vmax.f32 %v1020_v47, 0.0  ;;  %v4208_v50 = vpop.f32.mrb[62].mxu0  ;;  %v4372_v47 = vld [vmem:[%s5802_s7 + $0x88] ss:$16 sps:$4 sm:$0xff]  }
 0x163   : > { %v1035_v51 = vadd.f32 %v4208_v50, %v4758_v17  ;;  %v1029_v52 = vpop.f32.mrb[63].mxu0  ;;  %v4380_v50 = vld [vmem:[%s5802_s7 + $0xac] ss:$16 sps:$4 sm:$0xff]  }
 0x164   : > { %v1132_v53 = vpack.c.bf16 %v1099_v48, %v1098_v49  ;;  %v1030_v54 = vadd.f32 %v4758_v17, %v1029_v52  ;;  %v4904_v17 = vld [vmem:[%s5799_s4] ss:$0 sm:$0xff] }
 0x165   : > { %v1101_v55 = vmax.f32 %v1035_v51, 0.0 }
 0x166   : > { %v1100_v56 = vmax.f32 %v1030_v54, 0.0  ;;  %4277 = vmatprep.mubr.msk.bf16.mxu1 %vm1173_vm2, %v1132_v53 }
 0x168   : > { %v1133_v57 = vpack.c.bf16 %v1101_v55, %v1100_v56 }
 0x16a   : > { %4278 = vmatmul.mubr.msk.bf16.gmra.mrb[60].mxu1 %vm1173_vm2, %v1133_v57 }
 0x16b   : > { %1965 = vmatprep.mubr.bf16.mxu1 %v4471_v18 }
 0x1c5   : > { %v4219_v60 = vpop.f32.mrb[0].mxu1 }
 0x1c6   : > { %v1313_v61 = vadd.f32 %v4219_v60, %v4904_v17  ;;  %v1304_v62 = vpop.f32.mrb[1].mxu1 }
 0x1c7   : > { %v1305_v63 = vadd.f32 %v4904_v17, %v1304_v62  ;;  %v4220_v0 = vpop.f32.mrb[2].mxu1 }
 0x1c8   : > { %v1316_v1 = vadd.f32 %v4220_v0, %v4904_v17  ;;  %v1307_v2 = vpop.f32.mrb[3].mxu1  ;;  %v1561_v4 = vmax.f32 %v1313_v61, 0.0  ;;  %v4386_v61 = vld [vmem:[%s5802_s7 + $0xcc] ss:$16 sps:$4 sm:$0xff]  }
 0x1c9   : > { %v1308_v3 = vadd.f32 %v4904_v17, %v1307_v2  ;;  %v1559_v6 = vmax.f32 %v1305_v63, 0.0 }
 0x1ca   : > { %v1562_v5 = vmax.f32 %v1316_v1, 0.0  ;;  %v4384_v1 = vld [vmem:[%s5802_s7 + $0xc8] ss:$16 sps:$4 sm:$0xff]  }
 0x1cb   : > { %v1560_v7 = vmax.f32 %v1308_v3, 0.0 }
 0x1cc   : > { %v1624_v8 = vpack.c.bf16 %v1562_v5, %v1561_v4  ;;  %v4392_v4 = vld [vmem:[%s5802_s7 + $0xec] ss:$16 sps:$4 sm:$0xff]  }
 0x1cd   : > { %v1623_v10 = vpack.c.bf16 %v1560_v7, %v1559_v6  ;;  %v4223_v11 = vpop.f32.mrb[4].mxu1 }
 0x1ce   : > { %v1329_v14 = vadd.f32 %v4223_v11, %v4904_v17  ;;  %v1320_v19 = vpop.f32.mrb[5].mxu1 }
 0x1cf   : > { %1796 = vmatmul.mubr.bf16.vlgmr.msra.gmra.mrb[64].mxu0 %v1623_v10  ;;  %v1321_v20 = vadd.f32 %v4904_v17, %v1320_v19  ;;  %v4224_v21 = vpop.f32.mrb[6].mxu1 }
 0x1d0   : > { %v1565_v13 = vmax.f32 %v1329_v14, 0.0  ;;  %v1332_v24 = vadd.f32 %v4224_v21, %v4904_v17  ;;  %v1323_v16 = vpop.f32.mrb[7].mxu1  ;;  %1805 = vmatprep.mubr.bf16.mxu0 %v4471_v18  ;;  %3068 = vmatpush1.bf16.msra.mxu0 %v4351_v9 }
 0x1d1   : > { %v1563_v26 = vmax.f32 %v1321_v20, 0.0  ;;  %v1324_v28 = vadd.f32 %v4904_v17, %v1323_v16  ;;  %3069 = vmatprep.subr.bf16.mxu0 %v4356_v12  ;;  %v4390_v12 = vld [vmem:[%s5802_s7 + $0xe8] ss:$16 sps:$4 sm:$0xff]   ;;  %v4398_v20 = vld [vmem:[%s5802_s7 + $0x10c] ss:$16 sps:$4 sm:$0xff]  }
 0x1d2   : > { %v1566_v15 = vmax.f32 %v1332_v24, 0.0  ;;  %v4396_v16 = vld [vmem:[%s5802_s7 + $0x108] ss:$16 sps:$4 sm:$0xff]  }
 0x1d3   : > { %v1564_v31 = vmax.f32 %v1324_v28, 0.0  ;;  %v4407_v28 = vld [vmem:[%s5802_s7 + $0x12c] ss:$16 sps:$4 sm:$0xff]  }
 0x1d4   : > { %v1626_v32 = vpack.c.bf16 %v1566_v15, %v1565_v13  ;;  %3070 = vmatpush1.bf16.msra.mxu0 %v4354_v25 }
 0x1d5   : > { %v1625_v33 = vpack.c.bf16 %v1564_v31, %v1563_v26  ;;  %v4227_v34 = vpop.f32.mrb[8].mxu1  ;;  %3071 = vmatprep.subr.bf16.mxu0 %v4362_v29 }
 0x1d6   : > { %v1345_v36 = vadd.f32 %v4227_v34, %v4904_v17  ;;  %v1336_v22 = vpop.f32.mrb[9].mxu1 }
 0x1d7   : > { %1806 = vmatmul.mubr.bf16.gmra.mrb[68].mxu0 %v1624_v8  ;;  %v1337_v37 = vadd.f32 %v4904_v17, %v1336_v22  ;;  %v4228_v27 = vpop.f32.mrb[10].mxu1 }
 0x1d8   : > { %1815 = vmatprep.mubr.bf16.mxu0 %v4471_v18  ;;  %v1569_v38 = vmax.f32 %v1345_v36, 0.0  ;;  %v1348_v39 = vadd.f32 %v4228_v27, %v4904_v17  ;;  %v1339_v40 = vpop.f32.mrb[11].mxu1  ;;  %3072 = vmatpush1.bf16.msra.mxu0 %v4360_v23 }
 0x1d9   : > { %v1567_v42 = vmax.f32 %v1337_v37, 0.0  ;;  %v1340_v43 = vadd.f32 %v4904_v17, %v1339_v40  ;;  %3073 = vmatprep.subr.bf16.mxu0 %v4368_v35  ;;  %v4405_v35 = vld [vmem:[%s5802_s7 + $0x128] ss:$16 sps:$4 sm:$0xff]   ;;  %v4413_v37 = vld [vmem:[%s5802_s7 + $0x14c] ss:$16 sps:$4 sm:$0xff]  }
 0x1da   : > { %v1570_v44 = vmax.f32 %v1348_v39, 0.0  ;;  %v4411_v40 = vld [vmem:[%s5802_s7 + $0x148] ss:$16 sps:$4 sm:$0xff]  }
 0x1db   : > { %v1568_v45 = vmax.f32 %v1340_v43, 0.0  ;;  %v4419_v43 = vld [vmem:[%s5802_s7 + $0x16c] ss:$16 sps:$4 sm:$0xff]  }
 0x1dc   : > { %v4944_v46 = vpack.c.bf16 %v1570_v44, %v1569_v38  ;;  %3074 = vmatpush1.bf16.msra.mxu0 %v4366_v41 }
 0x1dd   : > { %v1627_v48 = vpack.c.bf16 %v1568_v45, %v1567_v42  ;;  %v4231_v49 = vpop.f32.mrb[12].mxu1  ;;  %3075 = vmatprep.subr.bf16.mxu0 %v4374_v30 }
 0x1de   : > { %v1361_v51 = vadd.f32 %v4231_v49, %v4904_v17  ;;  %v1352_v52 = vpop.f32.mrb[13].mxu1 }
 0x1df   : > { %1816 = vmatmul.mubr.bf16.gmra.mrb[72].mxu0 %v1625_v33  ;;  %v1353_v53 = vadd.f32 %v4904_v17, %v1352_v52  ;;  %v4232_v54 = vpop.f32.mrb[14].mxu1 }
 0x1e0   : > { %1825 = vmatprep.mubr.bf16.mxu0 %v4471_v18  ;;  %v1573_v55 = vmax.f32 %v1361_v51, 0.0  ;;  %v1364_v56 = vadd.f32 %v4232_v54, %v4904_v17  ;;  %v1355_v57 = vpop.f32.mrb[15].mxu1  ;;  %3076 = vmatpush1.bf16.msra.mxu0 %v4372_v47  ;;  %v4417_v51 = vld [vmem:[%s5802_s7 + $0x168] ss:$16 sps:$4 sm:$0xff]  }
 0x1e1   : > { %v1571_v59 = vmax.f32 %v1353_v53, 0.0  ;;  %v1356_v60 = vadd.f32 %v4904_v17, %v1355_v57  ;;  %3077 = vmatprep.subr.bf16.mxu0 %v4380_v50  ;;  %v4423_v57 = vld [vmem:[%s5802_s7 + $0x188] ss:$16 sps:$4 sm:$0xff]  }
 0x1e2   : > { %v1574_v62 = vmax.f32 %v1364_v56, 0.0 }
 0x1e3   : > { %v1572_v63 = vmax.f32 %v1356_v60, 0.0  ;;  %v4431_v60 = vld [vmem:[%s5802_s7 + $0x1ac] ss:$16 sps:$4 sm:$0xff]  }
 0x1e4   : > { %v4963_v0 = vpack.c.bf16 %v1574_v62, %v1573_v55  ;;  %3078 = vmatpush1.bf16.msra.mxu0 %v4378_v58 }
 0x1e5   : > { %v4968_v2 = vpack.c.bf16 %v1572_v63, %v1571_v59  ;;  %v4235_v3 = vpop.f32.mrb[16].mxu1  ;;  %3079 = vmatprep.subr.bf16.mxu0 %v4386_v61 }
 0x1e6   : > { %v1377_v5 = vadd.f32 %v4235_v3, %v4904_v17  ;;  %v1368_v6 = vpop.f32.mrb[17].mxu1 }
 0x1e7   : > { %1826 = vmatmul.mubr.bf16.gmra.mrb[76].mxu0 %v1626_v32  ;;  %v1369_v7 = vadd.f32 %v4904_v17, %v1368_v6  ;;  %v4236_v8 = vpop.f32.mrb[18].mxu1  ;;  %v4429_v6 = vld [vmem:[%s5802_s7 + $0x1a8] ss:$16 sps:$4 sm:$0xff]  }
 0x1e8   : > { %1835 = vmatprep.mubr.bf16.mxu0 %v4471_v18  ;;  %v1577_v9 = vmax.f32 %v1377_v5, 0.0  ;;  %v1380_v10 = vadd.f32 %v4236_v8, %v4904_v17  ;;  %v1371_v11 = vpop.f32.mrb[19].mxu1  ;;  %3080 = vmatpush1.bf16.msra.mxu0 %v4384_v1 }
 0x1e9   : > { %v1575_v14 = vmax.f32 %v1369_v7, 0.0  ;;  %v1372_v19 = vadd.f32 %v4904_v17, %v1371_v11  ;;  %3081 = vmatprep.subr.bf16.mxu0 %v4392_v4 }
 0x1ea   : > { %v1578_v21 = vmax.f32 %v1380_v10, 0.0 }
 0x1eb   : > { %v1576_v13 = vmax.f32 %v1372_v19, 0.0 }
 0x1ec   : > { %v4984_v24 = vpack.c.bf16 %v1578_v21, %v1577_v9  ;;  %3082 = vmatpush1.bf16.msra.mxu0 %v4390_v12  ;;  %v4435_v12 = vld [vmem:[%s5802_s7 + $0x1c8] ss:$16 sps:$4 sm:$0xff]  }
 0x1ed   : > { %v4989_v25 = vpack.c.bf16 %v1576_v13, %v1575_v14  ;;  %v4239_v26 = vpop.f32.mrb[20].mxu1  ;;  %3083 = vmatprep.subr.bf16.mxu0 %v4398_v20 }
 0x1ee   : > { %v1393_v29 = vadd.f32 %v4239_v26, %v4904_v17  ;;  %v1384_v15 = vpop.f32.mrb[21].mxu1 }
 0x1ef   : > { %1836 = vmatmul.mubr.bf16.gmra.mrb[80].mxu0 %v1627_v48  ;;  %v1385_v31 = vadd.f32 %v4904_v17, %v1384_v15  ;;  %v4240_v32 = vpop.f32.mrb[22].mxu1 }
 0x1f0   : > { %1845 = vmatprep.mubr.bf16.mxu0 %v4471_v18  ;;  %v1581_v23 = vmax.f32 %v1393_v29, 0.0  ;;  %v1396_v33 = vadd.f32 %v4240_v32, %v4904_v17  ;;  %v1387_v34 = vpop.f32.mrb[23].mxu1  ;;  %3084 = vmatpush1.bf16.msra.mxu0 %v4396_v16 }
 0x1f1   : > { %v1579_v36 = vmax.f32 %v1385_v31, 0.0  ;;  %v1388_v22 = vadd.f32 %v4904_v17, %v1387_v34  ;;  %3085 = vmatprep.subr.bf16.mxu0 %v4407_v28 }
 0x1f2   : > { %v1582_v27 = vmax.f32 %v1396_v33, 0.0 }
 0x1f3   : > { %v1580_v38 = vmax.f32 %v1388_v22, 0.0 }
 0x1f4   : > { %v5005_v39 = vpack.c.bf16 %v1582_v27, %v1581_v23  ;;  %3086 = vmatpush1.bf16.msra.mxu0 %v4405_v35 }
 0x1f5   : > { %v5010_v41 = vpack.c.bf16 %v1580_v38, %v1579_v36  ;;  %v4243_v42 = vpop.f32.mrb[24].mxu1  ;;  %3087 = vmatprep.subr.bf16.mxu0 %v4413_v37  ;;  %v4365_v36 = vld [vmem:[%s5802_s7 + $0x24] ss:$16 sps:$4 sm:$0xff]  }
 0x1f6   : > { %v1409_v30 = vadd.f32 %v4243_v42, %v4904_v17  ;;  %v1400_v44 = vpop.f32.mrb[25].mxu1 }
 0x1f7   : > { %1846 = vmatmul.mubr.bf16.gmra.mrb[84].mxu0 %v4944_v46  ;;  %v1401_v45 = vadd.f32 %v4904_v17, %v1400_v44  ;;  %v4244_v47 = vpop.f32.mrb[26].mxu1  ;;  %v4425_v46 = vld [vmem:[%s5802_s7 + $0x18c] ss:$16 sps:$4 sm:$0xff]  }
 0x1f8   : > { %1855 = vmatprep.mubr.bf16.mxu0 %v4471_v18  ;;  %v1585_v48 = vmax.f32 %v1409_v30, 0.0  ;;  %v1412_v49 = vadd.f32 %v4244_v47, %v4904_v17  ;;  %v1403_v50 = vpop.f32.mrb[27].mxu1  ;;  %3088 = vmatpush1.bf16.msra.mxu0 %v4411_v40  ;;  %v4363_v30 = vld [vmem:[%s5802_s7 + $0x20] ss:$16 sps:$4 sm:$0xff]  }
 0x1f9   : > { %v1583_v52 = vmax.f32 %v1401_v45, 0.0  ;;  %v1404_v53 = vadd.f32 %v4904_v17, %v1403_v50  ;;  %3089 = vmatprep.subr.bf16.mxu0 %v4419_v43 }
 0x1fa   : > { %v1586_v54 = vmax.f32 %v1412_v49, 0.0 }
 0x1fb   : > { %v1584_v55 = vmax.f32 %v1404_v53, 0.0 }
 0x1fc   : > { %v5027_v56 = vpack.c.bf16 %v1586_v54, %v1585_v48  ;;  %3090 = vmatpush1.bf16.msra.mxu0 %v4417_v51  ;;  %v4377_v54 = vld [vmem:[%s5802_s7 + $0x64] ss:$16 sps:$4 sm:$0xff]  }
 0x1fd   : > { %v5032_v58 = vpack.c.bf16 %v1584_v55, %v1583_v52  ;;  %v4247_v59 = vpop.f32.mrb[28].mxu1  ;;  %3091 = vmatprep.subr.bf16.mxu0 %v4425_v46  ;;  %v4369_v52 = vld [vmem:[%s5802_s7 + $0x40] ss:$16 sps:$4 sm:$0xff]  }
 0x1fe   : > { %v1425_v61 = vadd.f32 %v4247_v59, %v4904_v17  ;;  %v1416_v62 = vpop.f32.mrb[29].mxu1 }
 0x1ff   : > { %1856 = vmatmul.mubr.bf16.gmra.mrb[88].mxu0 %v4968_v2  ;;  %v1417_v63 = vadd.f32 %v4904_v17, %v1416_v62  ;;  %v4248_v1 = vpop.f32.mrb[30].mxu1  ;;  %v4437_v2 = vld [vmem:[%s5802_s7 + $0x1cc] ss:$16 sps:$4 sm:$0xff]  }
 0x200   : > { %1865 = vmatprep.mubr.bf16.mxu0 %v4471_v18  ;;  %v1589_v3 = vmax.f32 %v1425_v61, 0.0  ;;  %v1428_v4 = vadd.f32 %v4248_v1, %v4904_v17  ;;  %v1419_v5 = vpop.f32.mrb[31].mxu1  ;;  %3092 = vmatpush1.bf16.msra.mxu0 %v4423_v57 }
 0x201   : > { %v1587_v7 = vmax.f32 %v1417_v63, 0.0  ;;  %v1420_v8 = vadd.f32 %v4904_v17, %v1419_v5  ;;  %3093 = vmatprep.subr.bf16.mxu0 %v4431_v60 }
 0x202   : > { %v1590_v9 = vmax.f32 %v1428_v4, 0.0 }
 0x203   : > { %v1588_v10 = vmax.f32 %v1420_v8, 0.0  ;;  %v4381_v8 = vld [vmem:[%s5802_s7 + $0x80] ss:$16 sps:$4 sm:$0xff]  }
 0x204   : > { %v5049_v11 = vpack.c.bf16 %v1590_v9, %v1589_v3  ;;  %3094 = vmatpush1.bf16.msra.mxu0 %v4429_v6  ;;  %v4383_v3 = vld [vmem:[%s5802_s7 + $0x84] ss:$16 sps:$4 sm:$0xff]  }
 0x205   : > { %v5054_v14 = vpack.c.bf16 %v1588_v10, %v1587_v7  ;;  %v4251_v19 = vpop.f32.mrb[32].mxu1  ;;  %3095 = vmatprep.subr.bf16.mxu0 %v4437_v2  ;;  %v4389_v10 = vld [vmem:[%s5802_s7 + $0xa4] ss:$16 sps:$4 sm:$0xff]  }
 0x206   : > { %v1441_v20 = vadd.f32 %v4251_v19, %v4904_v17  ;;  %v1432_v21 = vpop.f32.mrb[33].mxu1 }
 0x207   : > { %1866 = vmatmul.mubr.bf16.gmra.mrb[92].mxu0 %v4963_v0  ;;  %v1433_v13 = vadd.f32 %v4904_v17, %v1432_v21  ;;  %v4252_v16 = vpop.f32.mrb[34].mxu1  ;;  %v4357_v0 = vld [vmem:[%s5802_s7] ss:$16 sps:$4 sm:$0xff]  }
 0x208   : > { %1875 = vmatprep.mubr.bf16.mxu0 %v4471_v18  ;;  %v1593_v26 = vmax.f32 %v1441_v20, 0.0  ;;  %v1444_v28 = vadd.f32 %v4252_v16, %v4904_v17  ;;  %v1435_v29 = vpop.f32.mrb[35].mxu1  ;;  %3096 = vmatpush1.bf16.msra.mxu0 %v4435_v12 }
 0x209   : > { %v1591_v15 = vmax.f32 %v1433_v13, 0.0  ;;  %v1436_v31 = vadd.f32 %v4904_v17, %v1435_v29  ;;  %v4395_v29 = vld [vmem:[%s5802_s7 + $0xc4] ss:$16 sps:$4 sm:$0xff]  }
 0x20a   : > { %v1594_v32 = vmax.f32 %v1444_v28, 0.0 }
 0x20b   : > { %v1592_v23 = vmax.f32 %v1436_v31, 0.0 }
 0x20c   : > { %v1640_v33 = vpack.c.bf16 %v1594_v32, %v1593_v26 }
 0x20d   : > { %v5065_v34 = vpack.c.bf16 %v1592_v23, %v1591_v15  ;;  %v4255_v35 = vpop.f32.mrb[36].mxu1 }
 0x20e   : > { %v1457_v22 = vadd.f32 %v4255_v35, %v4904_v17  ;;  %v1448_v37 = vpop.f32.mrb[37].mxu1  ;;  %1966 = vmatmul.mubr.bf16.vlgmr.msra.gmra.mrb[64].mxu1 %v1640_v33  ;;  %v4393_v33 = vld [vmem:[%s5802_s7 + $0xc0] ss:$16 sps:$4 sm:$0xff]  }
 0x20f   : > { %1876 = vmatmul.mubr.bf16.gmra.mrb[96].mxu0 %v4989_v25  ;;  %v1449_v27 = vadd.f32 %v4904_v17, %v1448_v37  ;;  %v4256_v38 = vpop.f32.mrb[38].mxu1  ;;  %1975 = vmatprep.mubr.bf16.mxu1 %v4471_v18  ;;  %v4371_v25 = vld [vmem:[%s5802_s7 + $0x44] ss:$16 sps:$4 sm:$0xff]  }
 0x210   : > { %1885 = vmatprep.mubr.bf16.mxu0 %v4471_v18  ;;  %v1597_v40 = vmax.f32 %v1457_v22, 0.0  ;;  %v1460_v42 = vadd.f32 %v4256_v38, %v4904_v17  ;;  %v1451_v43 = vpop.f32.mrb[39].mxu1  ;;  %2715 = vmatpush1.bf16.msra.mxu1 %v4357_v0 }
 0x211   : > { %v1595_v44 = vmax.f32 %v1449_v27, 0.0  ;;  %v1452_v45 = vadd.f32 %v4904_v17, %v1451_v43  ;;  %2716 = vmatprep.subr.bf16.mxu1 %v4365_v36  ;;  %v4401_v36 = vld [vmem:[%s5802_s7 + $0xe4] ss:$16 sps:$4 sm:$0xff]   ;;  %v4443_v27 = vld [vmem:[%s5802_s7 + $0x1ec] ss:$16 sps:$4 sm:$0xff]  }
 0x212   : > { %v1598_v47 = vmax.f32 %v1460_v42, 0.0  ;;  %3097 = vmatprep.subr.bf16.mxu0 %v4443_v27 }
 0x213   : > { %v1596_v48 = vmax.f32 %v1452_v45, 0.0 }
 0x214   : > { %v1642_v49 = vpack.c.bf16 %v1598_v47, %v1597_v40  ;;  %2717 = vmatpush1.bf16.msra.mxu1 %v4363_v30 }
 0x215   : > { %v1641_v50 = vpack.c.bf16 %v1596_v48, %v1595_v44  ;;  %v4259_v51 = vpop.f32.mrb[40].mxu1  ;;  %2718 = vmatprep.subr.bf16.mxu1 %v4371_v25  ;;  %v4399_v44 = vld [vmem:[%s5802_s7 + $0xe0] ss:$16 sps:$4 sm:$0xff]   ;;  %v4404_v25 = vld [vmem:[%s5802_s7 + $0x104] ss:$16 sps:$4 sm:$0xff]  }
 0x216   : > { %v1473_v53 = vadd.f32 %v4259_v51, %v4904_v17  ;;  %v1464_v46 = vpop.f32.mrb[41].mxu1  ;;  %v4402_v51 = vld [vmem:[%s5802_s7 + $0x100] ss:$16 sps:$4 sm:$0xff]  }
 0x217   : > { %1886 = vmatmul.mubr.bf16.gmra.mrb[100].mxu0 %v4984_v24  ;;  %1976 = vmatmul.mubr.bf16.gmra.mrb[68].mxu1 %v1641_v50  ;;  %v1465_v55 = vadd.f32 %v4904_v17, %v1464_v46  ;;  %v4260_v57 = vpop.f32.mrb[42].mxu1  ;;  %v4375_v24 = vld [vmem:[%s5802_s7 + $0x60] ss:$16 sps:$4 sm:$0xff]   ;;  %v4410_v46 = vld [vmem:[%s5802_s7 + $0x124] ss:$16 sps:$4 sm:$0xff]  }
 0x218   : > { %1895 = vmatprep.mubr.bf16.mxu0 %v4471_v18  ;;  %v1601_v59 = vmax.f32 %v1473_v53, 0.0  ;;  %1985 = vmatprep.mubr.bf16.mxu1 %v4471_v18  ;;  %v1476_v60 = vadd.f32 %v4260_v57, %v4904_v17  ;;  %v1467_v61 = vpop.f32.mrb[43].mxu1 }
 0x219   : > { %v1599_v62 = vmax.f32 %v1465_v55, 0.0  ;;  %v1468_v63 = vadd.f32 %v4904_v17, %v1467_v61  ;;  %2719 = vmatpush1.bf16.msra.mxu1 %v4369_v52 }
 0x21a   : > { %v1602_v1 = vmax.f32 %v1476_v60, 0.0  ;;  %2720 = vmatprep.subr.bf16.mxu1 %v4377_v54 }
 0x21b   : > { %v1600_v4 = vmax.f32 %v1468_v63, 0.0 }
 0x21c   : > { %v5102_v5 = vpack.c.bf16 %v1602_v1, %v1601_v59 }
 0x21d   : > { %v1643_v6 = vpack.c.bf16 %v1600_v4, %v1599_v62  ;;  %v4263_v7 = vpop.f32.mrb[44].mxu1  ;;  %2721 = vmatpush1.bf16.msra.mxu1 %v4375_v24  ;;  %v4416_v24 = vld [vmem:[%s5802_s7 + $0x144] ss:$16 sps:$4 sm:$0xff]  }
 0x21e   : > { %v1489_v2 = vadd.f32 %v4263_v7, %v4904_v17  ;;  %v1480_v9 = vpop.f32.mrb[45].mxu1  ;;  %2722 = vmatprep.subr.bf16.mxu1 %v4383_v3 }
 0x21f   : > { %1896 = vmatmul.mubr.bf16.gmra.mrb[104].mxu0 %v5010_v41  ;;  %1986 = vmatmul.mubr.bf16.gmra.mrb[72].mxu1 %v1642_v49  ;;  %v1481_v12 = vadd.f32 %v4904_v17, %v1480_v9  ;;  %v4264_v19 = vpop.f32.mrb[46].mxu1  ;;  %v4387_v41 = vld [vmem:[%s5802_s7 + $0xa0] ss:$16 sps:$4 sm:$0xff]  }
 0x220   : > { %1905 = vmatprep.mubr.bf16.mxu0 %v4471_v18  ;;  %1995 = vmatprep.mubr.bf16.mxu1 %v4471_v18  ;;  %v1605_v20 = vmax.f32 %v1489_v2, 0.0  ;;  %v1492_v21 = vadd.f32 %v4264_v19, %v4904_v17  ;;  %v1483_v13 = vpop.f32.mrb[47].mxu1  ;;  %v4422_v2 = vld [vmem:[%s5802_s7 + $0x164] ss:$16 sps:$4 sm:$0xff]  }
 0x221   : > { %v1603_v16 = vmax.f32 %v1481_v12, 0.0  ;;  %v1484_v26 = vadd.f32 %v4904_v17, %v1483_v13  ;;  %2723 = vmatpush1.bf16.msra.mxu1 %v4381_v8 }
 0x222   : > { %v1606_v28 = vmax.f32 %v1492_v21, 0.0  ;;  %2724 = vmatprep.subr.bf16.mxu1 %v4389_v10 }
 0x223   : > { %v1604_v15 = vmax.f32 %v1484_v26, 0.0  ;;  %v4428_v26 = vld [vmem:[%s5802_s7 + $0x184] ss:$16 sps:$4 sm:$0xff]  }
 0x224   : > { %v5123_v31 = vpack.c.bf16 %v1606_v28, %v1605_v20 }
 0x225   : > { %v5125_v32 = vpack.c.bf16 %v1604_v15, %v1603_v16  ;;  %v4267_v23 = vpop.f32.mrb[48].mxu1  ;;  %2725 = vmatpush1.bf16.msra.mxu1 %v4387_v41 }
 0x226   : > { %v1505_v0 = vadd.f32 %v4267_v23, %v4904_v17  ;;  %v1496_v35 = vpop.f32.mrb[49].mxu1  ;;  %2726 = vmatprep.subr.bf16.mxu1 %v4395_v29 }
 0x227   : > { %1906 = vmatmul.mubr.bf16.gmra.mrb[108].mxu0 %v5005_v39  ;;  %1996 = vmatmul.mubr.bf16.gmra.mrb[76].mxu1 %v1643_v6  ;;  %v1497_v22 = vadd.f32 %v4904_v17, %v1496_v35  ;;  %v4268_v37 = vpop.f32.mrb[50].mxu1  ;;  %v4441_v39 = vld [vmem:[%s5802_s7 + $0x1e8] ss:$16 sps:$4 sm:$0xff]   ;;  %v4414_v6 = vld [vmem:[%s5802_s7 + $0x140] ss:$16 sps:$4 sm:$0xff]  }
 0x228   : > { %1915 = vmatprep.mubr.bf16.mxu0 %v4471_v18  ;;  %2005 = vmatprep.mubr.bf16.mxu1 %v4471_v18  ;;  %v1609_v38 = vmax.f32 %v1505_v0, 0.0  ;;  %v1508_v40 = vadd.f32 %v4268_v37, %v4904_v17  ;;  %v1499_v42 = vpop.f32.mrb[51].mxu1  ;;  %v4434_v0 = vld [vmem:[%s5802_s7 + $0x1a4] ss:$16 sps:$4 sm:$0xff]  }
 0x229   : > { %v1607_v43 = vmax.f32 %v1497_v22, 0.0  ;;  %v1500_v30 = vadd.f32 %v4904_v17, %v1499_v42  ;;  %2727 = vmatpush1.bf16.msra.mxu1 %v4393_v33  ;;  %3098 = vmatpush1.bf16.msra.mxu0 %v4441_v39  ;;  %v4440_v42 = vld [vmem:[%s5802_s7 + $0x1c4] ss:$16 sps:$4 sm:$0xff]  }
 0x22a   : > { %v1610_v45 = vmax.f32 %v1508_v40, 0.0  ;;  %2728 = vmatprep.subr.bf16.mxu1 %v4401_v36 }
 0x22b   : > { %v1608_v47 = vmax.f32 %v1500_v30, 0.0 }
 0x22c   : > { %v5152_v48 = vpack.c.bf16 %v1610_v45, %v1609_v38  ;;  %v4444_v45 = vld [vmem:[%s5802_s7 + $0x1e0] ss:$16 sps:$4 sm:$0xff]  }
 0x22d   : > { %v5154_v49 = vpack.c.bf16 %v1608_v47, %v1607_v43  ;;  %v4271_v50 = vpop.f32.mrb[52].mxu1  ;;  %2729 = vmatpush1.bf16.msra.mxu1 %v4399_v44  ;;  %v4438_v44 = vld [vmem:[%s5802_s7 + $0x1c0] ss:$16 sps:$4 sm:$0xff]  }
 0x22e   : > { %v1521_v52 = vadd.f32 %v4271_v50, %v4904_v17  ;;  %v1512_v53 = vpop.f32.mrb[53].mxu1  ;;  %2730 = vmatprep.subr.bf16.mxu1 %v4404_v25  ;;  %v1671_v47 = vld [vmem:[%s5801_s6] sm:$0x3] }
 0x22f   : > { %1916 = vmatmul.mubr.bf16.gmra.mrb[112].mxu0 %v5032_v58  ;;  %2006 = vmatmul.mubr.bf16.gmra.mrb[80].mxu1 %v5102_v5  ;;  %v1513_v54 = vadd.f32 %v4904_v17, %v1512_v53  ;;  %v4272_v55 = vpop.f32.mrb[54].mxu1  ;;  %v4408_v58 = vld [vmem:[%s5802_s7 + $0x120] ss:$16 sps:$4 sm:$0xff]  }
 0x230   : > { %1925 = vmatprep.mubr.bf16.mxu0 %v4471_v18  ;;  %2015 = vmatprep.mubr.bf16.mxu1 %v4471_v18  ;;  %v1613_v57 = vmax.f32 %v1521_v52, 0.0  ;;  %v1524_v59 = vadd.f32 %v4272_v55, %v4904_v17  ;;  %v1515_v60 = vpop.f32.mrb[55].mxu1 }
 0x231   : > { %v1611_v61 = vmax.f32 %v1513_v54, 0.0  ;;  %v1516_v62 = vadd.f32 %v4904_v17, %v1515_v60  ;;  %2731 = vmatpush1.bf16.msra.mxu1 %v4402_v51 }
 0x232   : > { %v1614_v63 = vmax.f32 %v1524_v59, 0.0  ;;  %2732 = vmatprep.subr.bf16.mxu1 %v4410_v46 }
 0x233   : > { %v1612_v1 = vmax.f32 %v1516_v62, 0.0 }
 0x234   : > { %v5176_v3 = vpack.c.bf16 %v1614_v63, %v1613_v57 }
 0x235   : > { %v5178_v4 = vpack.c.bf16 %v1612_v1, %v1611_v61  ;;  %v4275_v5 = vpop.f32.mrb[56].mxu1  ;;  %2733 = vmatpush1.bf16.msra.mxu1 %v4408_v58 }
 0x236   : > { %v1537_v7 = vadd.f32 %v4275_v5, %v4904_v17  ;;  %v1528_v8 = vpop.f32.mrb[57].mxu1  ;;  %2734 = vmatprep.subr.bf16.mxu1 %v4416_v24 }
 0x237   : > { %1926 = vmatmul.mubr.bf16.gmra.mrb[116].mxu0 %v5027_v56  ;;  %2016 = vmatmul.mubr.bf16.gmra.mrb[84].mxu1 %v5125_v32  ;;  %v1529_v9 = vadd.f32 %v4904_v17, %v1528_v8  ;;  %v4276_v10 = vpop.f32.mrb[58].mxu1  ;;  %v4420_v56 = vld [vmem:[%s5802_s7 + $0x160] ss:$16 sps:$4 sm:$0xff]  }
 0x238   : > { %1935 = vmatprep.mubr.bf16.mxu0 %v4471_v18  ;;  %2025 = vmatprep.mubr.bf16.mxu1 %v4471_v18  ;;  %v1617_v12 = vmax.f32 %v1537_v7, 0.0  ;;  %v1540_v19 = vadd.f32 %v4276_v10, %v4904_v17  ;;  %v1531_v20 = vpop.f32.mrb[59].mxu1  ;;  %v4426_v32 = vld [vmem:[%s5802_s7 + $0x180] ss:$16 sps:$4 sm:$0xff]  }
 0x239   : > { %v1615_v21 = vmax.f32 %v1529_v9, 0.0  ;;  %v1532_v13 = vadd.f32 %v4904_v17, %v1531_v20  ;;  %2735 = vmatpush1.bf16.msra.mxu1 %v4414_v6 }
 0x23a   : > { %v1618_v16 = vmax.f32 %v1540_v19, 0.0  ;;  %2736 = vmatprep.subr.bf16.mxu1 %v4422_v2 }
 0x23b   : > { %v1616_v41 = vmax.f32 %v1532_v13, 0.0 }
 0x23c   : > { %v1652_v28 = vpack.c.bf16 %v1618_v16, %v1617_v12 }
 0x23d   : > { %v1651_v29 = vpack.c.bf16 %v1616_v41, %v1615_v21  ;;  %v4279_v15 = vpop.f32.mrb[60].mxu1  ;;  %2737 = vmatpush1.bf16.msra.mxu1 %v4420_v56 }
 0x23e   : > { %v1553_v23 = vadd.f32 %v4279_v15, %v4904_v17  ;;  %v1544_v33 = vpop.f32.mrb[61].mxu1  ;;  %2738 = vmatprep.subr.bf16.mxu1 %v4428_v26 }
 0x23f   : > { %1936 = vmatmul.mubr.bf16.gmra.mrb[120].mxu0 %v5054_v14  ;;  %2026 = vmatmul.mubr.bf16.gmra.mrb[88].mxu1 %v5123_v31  ;;  %v1545_v35 = vadd.f32 %v4904_v17, %v1544_v33  ;;  %v4280_v36 = vpop.f32.mrb[62].mxu1  ;;  %v4432_v14 = vld [vmem:[%s5802_s7 + $0x1a0] ss:$16 sps:$4 sm:$0xff]  }
 0x240   : > { %1945 = vmatprep.mubr.bf16.mxu0 %v4471_v18  ;;  %2035 = vmatprep.mubr.bf16.mxu1 %v4471_v18  ;;  %v1621_v22 = vmax.f32 %v1553_v23, 0.0  ;;  %v1556_v37 = vadd.f32 %v4280_v36, %v4904_v17  ;;  %v1547_v27 = vpop.f32.mrb[63].mxu1 }
 0x241   : > { %v1619_v38 = vmax.f32 %v1545_v35, 0.0  ;;  %v1548_v40 = vadd.f32 %v4904_v17, %v1547_v27  ;;  %2739 = vmatpush1.bf16.msra.mxu1 %v4426_v32  ;;  %v4446_v17 = vld [vmem:[%s5802_s7 + $0x1e4] ss:$16 sps:$4 sm:$0xff]  }
 0x242   : > { %v1622_v31 = vmax.f32 %v1556_v37, 0.0  ;;  %2740 = vmatprep.subr.bf16.mxu1 %v4434_v0 }
 0x243   : > { %v1620_v39 = vmax.f32 %v1548_v40, 0.0 }
 0x244   : > { %v1654_v43 = vpack.c.bf16 %v1622_v31, %v1621_v22 }
 0x245   : > { %v1653_v30 = vpack.c.bf16 %v1620_v39, %v1619_v38  ;;  %2741 = vmatpush1.bf16.msra.mxu1 %v4432_v14 }
 0x246   : > { %2742 = vmatprep.subr.bf16.mxu1 %v4440_v42 }
 0x247   : > { %1946 = vmatmul.mubr.bf16.gmra.mrb[124].mxu0 %v5049_v11  ;;  %2036 = vmatmul.mubr.bf16.gmra.mrb[92].mxu1 %v5154_v49  ;;  %v1673_v11 = vlaneseq }
 0x248   : > { %1955 = vmatprep.mubr.bf16.mxu0 %v4471_v18  ;;  %2045 = vmatprep.mubr.bf16.mxu1 %v4471_v18 }
 0x249   : > { %2743 = vmatpush1.bf16.msra.mxu1 %v4438_v44  ;;  %vm3727_vm3 = vcmp.lt.s32.totalorder %v1673_v11, 512 }
 0x24a   : > { %2744 = vmatprep.subr.bf16.mxu1 %v4446_v17 }
 0x24d   : > { %2745 = vmatpush1.bf16.msra.mxu1 %v4444_v45 }
 0x24f   : > { %1956 = vmatmul.mubr.bf16.gmra.mrb[128].mxu0 %v5065_v34  ;;  %2046 = vmatmul.mubr.bf16.gmra.mrb[96].mxu1 %v5152_v48  ;;  %v5244_v34 = vshrl.u32 %v1673_v11, 7 }
 0x250   : > { %2055 = vmatprep.mubr.bf16.mxu1 %v4471_v18 }
 0x251   : > { %v1675_v25 = vsub.s32 0, %v5244_v34  ;;  %v1679_v48 = vsub.s32 1, %v5244_v34 }
 0x253   : > { %v5253_v49 = vrot.slane %v1671_v47, %v1675_v25 }
 0x257   : > { %2056 = vmatmul.mubr.bf16.gmra.mrb[100].mxu1 %v5178_v4 }
 0x258   : > { %2065 = vmatprep.mubr.bf16.mxu1 %v4471_v18 }
 0x25f   : > { %2066 = vmatmul.mubr.bf16.gmra.mrb[104].mxu1 %v5176_v3 }
 0x260   : > { %2075 = vmatprep.mubr.bf16.mxu1 %v4471_v18 }
 0x267   : > { %2076 = vmatmul.mubr.bf16.gmra.mrb[108].mxu1 %v1651_v29 }
 0x268   : > { %2085 = vmatprep.mubr.bf16.mxu1 %v4471_v18 }
 0x26f   : > { %2086 = vmatmul.mubr.bf16.gmra.mrb[112].mxu1 %v1652_v28 }
 0x270   : > { %2095 = vmatprep.mubr.bf16.mxu1 %v4471_v18 }
 0x277   : > { %2096 = vmatmul.mubr.bf16.gmra.mrb[116].mxu1 %v1653_v30 }
 0x278   : > { %2105 = vmatprep.mubr.bf16.mxu1 %v4471_v18  ;;  %v5257_v18 = vrot.slane %v1671_v47, %v1679_v48 }
 0x27f   : > { %2106 = vmatmul.mubr.bf16.gmra.mrb[120].mxu1 %v1654_v43 }
 0x2a2   : > { %v1797_v50 = vpop.f32.mrb[64].mxu0 }
 0x2a3   : > { %v1798_v51 = vadd.f32 %v1797_v50, %v5253_v49  ;;  %v1799_v52 = vpop.f32.mrb[65].mxu0 }
 0x2a4   : > { %v1800_v53 = vadd.f32 %v1799_v52, %v5257_v18  ;;  %v1801_v46 = vpop.f32.mrb[66].mxu0 }
 0x2a5   : > { %v1802_v54 = vadd.f32 %v1801_v46, %v5253_v49  ;;  %v1803_v55 = vpop.f32.mrb[67].mxu0  ;;  %v2116_v59 = vmax.f32 %v1798_v51, 0.0 }
 0x2a6   : > { %v1804_v57 = vadd.f32 %v1803_v55, %v5257_v18  ;;  %v2117_v61 = vmax.f32 %v1800_v53, 0.0 }
 0x2a7   : > { %v2118_v60 = vmax.f32 %v1802_v54, 0.0 }
 0x2a8   : > { %v2119_v62 = vmax.f32 %v1804_v57, 0.0 }
 0x2a9   : > { %v2244_v58 = vpack.c.bf16 %v2118_v60, %v2116_v59 }
 0x2aa   : > { %v2245_v63 = vpack.c.bf16 %v2119_v62, %v2117_v61  ;;  %v1807_v24 = vpop.f32.mrb[68].mxu0 }
 0x2ab   : > { %v1808_v1 = vadd.f32 %v1807_v24, %v5253_v49  ;;  %v1809_v3 = vpop.f32.mrb[69].mxu0 }
 0x2ac   : > { %v1810_v4 = vadd.f32 %v1809_v3, %v5257_v18  ;;  %v1811_v5 = vpop.f32.mrb[70].mxu0  ;;  %2746 = vmatprep.mubr.bf16.mxu1 %v2245_v63  ;;  %3099 = vmatprep.mubr.bf16.mxu0 %v2245_v63 }
 0x2ad   : > { %v1812_v6 = vadd.f32 %v1811_v5, %v5253_v49  ;;  %v1813_v7 = vpop.f32.mrb[71].mxu0  ;;  %2747 = vmatmul.mubr.bf16.vlgmr.msra.gmra.mrb[124].mxu1 %v2244_v58  ;;  %3100 = vmatmul.mubr.bf16.vlgmr.msra.gmra.mrb[132].mxu0 %v2244_v58  ;;  %v2120_v2 = vmax.f32 %v1808_v1, 0.0 }
 0x2ae   : > { %v1814_v8 = vadd.f32 %v1813_v7, %v5257_v18  ;;  %v2121_v10 = vmax.f32 %v1810_v4, 0.0 }
 0x2af   : > { %v2122_v9 = vmax.f32 %v1812_v6, 0.0 }
 0x2b0   : > { %v2123_v12 = vmax.f32 %v1814_v8, 0.0 }
 0x2b1   : > { %v2246_v19 = vpack.c.bf16 %v2122_v9, %v2120_v2 }
 0x2b2   : > { %v2247_v20 = vpack.c.bf16 %v2123_v12, %v2121_v10  ;;  %v1817_v21 = vpop.f32.mrb[72].mxu0 }
 0x2b3   : > { %v1818_v13 = vadd.f32 %v1817_v21, %v5253_v49  ;;  %v1819_v56 = vpop.f32.mrb[73].mxu0 }
 0x2b4   : > { %v1820_v16 = vadd.f32 %v1819_v56, %v5257_v18  ;;  %v1821_v26 = vpop.f32.mrb[74].mxu0  ;;  %2756 = vmatprep.mubr.bf16.mxu1 %v2247_v20  ;;  %3109 = vmatprep.mubr.bf16.mxu0 %v2247_v20 }
 0x2b5   : > { %v1822_v41 = vadd.f32 %v1821_v26, %v5253_v49  ;;  %v1823_v28 = vpop.f32.mrb[75].mxu0  ;;  %2757 = vmatmul.mubr.bf16.gmra.mrb[128].mxu1 %v2246_v19  ;;  %3110 = vmatmul.mubr.bf16.gmra.mrb[136].mxu0 %v2246_v19  ;;  %v2124_v15 = vmax.f32 %v1818_v13, 0.0 }
 0x2b6   : > { %v1824_v29 = vadd.f32 %v1823_v28, %v5257_v18  ;;  %v2125_v23 = vmax.f32 %v1820_v16, 0.0 }
 0x2b7   : > { %v2126_v32 = vmax.f32 %v1822_v41, 0.0 }
 0x2b8   : > { %v2127_v33 = vmax.f32 %v1824_v29, 0.0 }
 0x2b9   : > { %v2248_v0 = vpack.c.bf16 %v2126_v32, %v2124_v15 }
 0x2ba   : > { %v2249_v35 = vpack.c.bf16 %v2127_v33, %v2125_v23  ;;  %v1827_v36 = vpop.f32.mrb[76].mxu0 }
 0x2bb   : > { %v1828_v22 = vadd.f32 %v1827_v36, %v5253_v49  ;;  %v1829_v37 = vpop.f32.mrb[77].mxu0 }
 0x2bc   : > { %v1830_v27 = vadd.f32 %v1829_v37, %v5257_v18  ;;  %v1831_v38 = vpop.f32.mrb[78].mxu0  ;;  %2766 = vmatprep.mubr.bf16.mxu1 %v2249_v35  ;;  %3119 = vmatprep.mubr.bf16.mxu0 %v2249_v35 }
 0x2bd   : > { %v1832_v40 = vadd.f32 %v1831_v38, %v5253_v49  ;;  %v1833_v14 = vpop.f32.mrb[79].mxu0  ;;  %2767 = vmatmul.mubr.bf16.gmra.mrb[132].mxu1 %v2248_v0  ;;  %3120 = vmatmul.mubr.bf16.gmra.mrb[140].mxu0 %v2248_v0  ;;  %v2128_v42 = vmax.f32 %v1828_v22, 0.0 }
 0x2be   : > { %v1834_v31 = vadd.f32 %v1833_v14, %v5257_v18  ;;  %v2129_v43 = vmax.f32 %v1830_v27, 0.0 }
 0x2bf   : > { %v2130_v39 = vmax.f32 %v1832_v40, 0.0 }
 0x2c0   : > { %v2131_v30 = vmax.f32 %v1834_v31, 0.0 }
 0x2c1   : > { %v2250_v44 = vpack.c.bf16 %v2130_v39, %v2128_v42 }
 0x2c2   : > { %v2251_v17 = vpack.c.bf16 %v2131_v30, %v2129_v43  ;;  %v1837_v45 = vpop.f32.mrb[80].mxu0 }
 0x2c3   : > { %v1838_v47 = vadd.f32 %v1837_v45, %v5253_v49  ;;  %v1839_v50 = vpop.f32.mrb[81].mxu0 }
 0x2c4   : > { %v1840_v51 = vadd.f32 %v1839_v50, %v5257_v18  ;;  %v1841_v52 = vpop.f32.mrb[82].mxu0  ;;  %2776 = vmatprep.mubr.bf16.mxu1 %v2251_v17  ;;  %3129 = vmatprep.mubr.bf16.mxu0 %v2251_v17 }
 0x2c5   : > { %v1842_v53 = vadd.f32 %v1841_v52, %v5253_v49  ;;  %v1843_v46 = vpop.f32.mrb[83].mxu0  ;;  %2777 = vmatmul.mubr.bf16.gmra.mrb[136].mxu1 %v2250_v44  ;;  %3130 = vmatmul.mubr.bf16.gmra.mrb[144].mxu0 %v2250_v44  ;;  %v2132_v55 = vmax.f32 %v1838_v47, 0.0 }
 0x2c6   : > { %v1844_v54 = vadd.f32 %v1843_v46, %v5257_v18  ;;  %v2133_v59 = vmax.f32 %v1840_v51, 0.0 }
 0x2c7   : > { %v2134_v57 = vmax.f32 %v1842_v53, 0.0 }
 0x2c8   : > { %v2135_v60 = vmax.f32 %v1844_v54, 0.0 }
 0x2c9   : > { %v2252_v61 = vpack.c.bf16 %v2134_v57, %v2132_v55 }
 0x2ca   : > { %v2253_v62 = vpack.c.bf16 %v2135_v60, %v2133_v59  ;;  %v1847_v58 = vpop.f32.mrb[84].mxu0 }
 0x2cb   : > { %v1848_v63 = vadd.f32 %v1847_v58, %v5253_v49  ;;  %v1849_v24 = vpop.f32.mrb[85].mxu0 }
 0x2cc   : > { %v1850_v1 = vadd.f32 %v1849_v24, %v5257_v18  ;;  %v1851_v3 = vpop.f32.mrb[86].mxu0  ;;  %2786 = vmatprep.mubr.bf16.mxu1 %v2253_v62  ;;  %3139 = vmatprep.mubr.bf16.mxu0 %v2253_v62 }
 0x2cd   : > { %v1852_v4 = vadd.f32 %v1851_v3, %v5253_v49  ;;  %v1853_v5 = vpop.f32.mrb[87].mxu0  ;;  %2787 = vmatmul.mubr.bf16.gmra.mrb[140].mxu1 %v2252_v61  ;;  %3140 = vmatmul.mubr.bf16.gmra.mrb[148].mxu0 %v2252_v61  ;;  %v2136_v7 = vmax.f32 %v1848_v63, 0.0 }
 0x2ce   : > { %v1854_v6 = vadd.f32 %v1853_v5, %v5257_v18  ;;  %v2137_v2 = vmax.f32 %v1850_v1, 0.0 }
 0x2cf   : > { %v2138_v8 = vmax.f32 %v1852_v4, 0.0 }
 0x2d0   : > { %v2139_v9 = vmax.f32 %v1854_v6, 0.0 }
 0x2d1   : > { %v2254_v10 = vpack.c.bf16 %v2138_v8, %v2136_v7 }
 0x2d2   : > { %v2255_v12 = vpack.c.bf16 %v2139_v9, %v2137_v2  ;;  %v1857_v19 = vpop.f32.mrb[88].mxu0 }
 0x2d3   : > { %v1858_v20 = vadd.f32 %v1857_v19, %v5253_v49  ;;  %v1859_v21 = vpop.f32.mrb[89].mxu0 }
 0x2d4   : > { %v1860_v13 = vadd.f32 %v1859_v21, %v5257_v18  ;;  %v1861_v56 = vpop.f32.mrb[90].mxu0  ;;  %2796 = vmatprep.mubr.bf16.mxu1 %v2255_v12  ;;  %3149 = vmatprep.mubr.bf16.mxu0 %v2255_v12 }
 0x2d5   : > { %v1862_v16 = vadd.f32 %v1861_v56, %v5253_v49  ;;  %v1863_v26 = vpop.f32.mrb[91].mxu0  ;;  %2797 = vmatmul.mubr.bf16.gmra.mrb[144].mxu1 %v2254_v10  ;;  %3150 = vmatmul.mubr.bf16.gmra.mrb[152].mxu0 %v2254_v10  ;;  %v2140_v28 = vmax.f32 %v1858_v20, 0.0 }
 0x2d6   : > { %v1864_v41 = vadd.f32 %v1863_v26, %v5257_v18  ;;  %v2141_v15 = vmax.f32 %v1860_v13, 0.0 }
 0x2d7   : > { %v2142_v29 = vmax.f32 %v1862_v16, 0.0 }
 0x2d8   : > { %v2143_v32 = vmax.f32 %v1864_v41, 0.0 }
 0x2d9   : > { %v2256_v23 = vpack.c.bf16 %v2142_v29, %v2140_v28 }
 0x2da   : > { %v2257_v33 = vpack.c.bf16 %v2143_v32, %v2141_v15  ;;  %v1867_v0 = vpop.f32.mrb[92].mxu0 }
 0x2db   : > { %v1868_v35 = vadd.f32 %v1867_v0, %v5253_v49  ;;  %v1869_v36 = vpop.f32.mrb[93].mxu0 }
 0x2dc   : > { %v1870_v22 = vadd.f32 %v1869_v36, %v5257_v18  ;;  %v1871_v37 = vpop.f32.mrb[94].mxu0  ;;  %2806 = vmatprep.mubr.bf16.mxu1 %v2257_v33  ;;  %3159 = vmatprep.mubr.bf16.mxu0 %v2257_v33 }
 0x2dd   : > { %v1872_v27 = vadd.f32 %v1871_v37, %v5253_v49  ;;  %v1873_v38 = vpop.f32.mrb[95].mxu0  ;;  %2807 = vmatmul.mubr.bf16.gmra.mrb[148].mxu1 %v2256_v23  ;;  %3160 = vmatmul.mubr.bf16.gmra.mrb[156].mxu0 %v2256_v23  ;;  %v2144_v14 = vmax.f32 %v1868_v35, 0.0 }
 0x2de   : > { %v1874_v40 = vadd.f32 %v1873_v38, %v5257_v18  ;;  %v2145_v42 = vmax.f32 %v1870_v22, 0.0 }
 0x2df   : > { %v2146_v31 = vmax.f32 %v1872_v27, 0.0 }
 0x2e0   : > { %v2147_v39 = vmax.f32 %v1874_v40, 0.0 }
 0x2e1   : > { %v2258_v43 = vpack.c.bf16 %v2146_v31, %v2144_v14  ;;  %v1967_v30 = vpop.f32.mrb[64].mxu1 }
 0x2e2   : > { %v2259_v44 = vpack.c.bf16 %v2147_v39, %v2145_v42  ;;  %v1877_v17 = vpop.f32.mrb[96].mxu0  ;;  %v1968_v45 = vadd.f32 %v1967_v30, %v5253_v49  ;;  %v1969_v47 = vpop.f32.mrb[65].mxu1 }
 0x2e3   : > { %v1878_v50 = vadd.f32 %v1877_v17, %v5253_v49  ;;  %v1879_v51 = vpop.f32.mrb[97].mxu0  ;;  %v1970_v52 = vadd.f32 %v1969_v47, %v5257_v18  ;;  %v1971_v53 = vpop.f32.mrb[66].mxu1 }
 0x2e4   : > { %v1880_v46 = vadd.f32 %v1879_v51, %v5257_v18  ;;  %v1881_v54 = vpop.f32.mrb[98].mxu0  ;;  %2816 = vmatprep.mubr.bf16.mxu1 %v2259_v44  ;;  %3169 = vmatprep.mubr.bf16.mxu0 %v2259_v44  ;;  %v2184_v55 = vmax.f32 %v1968_v45, 0.0  ;;  %v1972_v57 = vadd.f32 %v1971_v53, %v5253_v49  ;;  %v1973_v59 = vpop.f32.mrb[67].mxu1 }
 0x2e5   : > { %v1882_v60 = vadd.f32 %v1881_v54, %v5253_v49  ;;  %v1883_v61 = vpop.f32.mrb[99].mxu0  ;;  %2817 = vmatmul.mubr.bf16.gmra.mrb[152].mxu1 %v2258_v43  ;;  %3170 = vmatmul.mubr.bf16.gmra.mrb[160].mxu0 %v2258_v43  ;;  %v2185_v62 = vmax.f32 %v1970_v52, 0.0  ;;  %v1974_v58 = vadd.f32 %v1973_v59, %v5257_v18  ;;  %v2148_v1 = vmax.f32 %v1878_v50, 0.0 }
 0x2e6   : > { %v1884_v63 = vadd.f32 %v1883_v61, %v5257_v18  ;;  %v2186_v24 = vmax.f32 %v1972_v57, 0.0  ;;  %v2149_v5 = vmax.f32 %v1880_v46, 0.0 }
 0x2e7   : > { %v2150_v3 = vmax.f32 %v1882_v60, 0.0  ;;  %v2187_v4 = vmax.f32 %v1974_v58, 0.0 }
 0x2e8   : > { %v2151_v6 = vmax.f32 %v1884_v63, 0.0  ;;  %v5299_v7 = vpack.c.bf16 %v2186_v24, %v2184_v55 }
 0x2e9   : > { %v2260_v8 = vpack.c.bf16 %v2150_v3, %v2148_v1  ;;  %v5301_v2 = vpack.c.bf16 %v2187_v4, %v2185_v62 }
 0x2ea   : > { %v2261_v9 = vpack.c.bf16 %v2151_v6, %v2149_v5  ;;  %v1887_v10 = vpop.f32.mrb[100].mxu0  ;;  %v1977_v12 = vpop.f32.mrb[68].mxu1 }
 0x2eb   : > { %v1888_v19 = vadd.f32 %v1887_v10, %v5253_v49  ;;  %v1889_v20 = vpop.f32.mrb[101].mxu0  ;;  %v1978_v21 = vadd.f32 %v1977_v12, %v5253_v49  ;;  %v1979_v13 = vpop.f32.mrb[69].mxu1 }
 0x2ec   : > { %v1890_v56 = vadd.f32 %v1889_v20, %v5257_v18  ;;  %v1891_v16 = vpop.f32.mrb[102].mxu0  ;;  %2826 = vmatprep.mubr.bf16.mxu1 %v2261_v9  ;;  %3179 = vmatprep.mubr.bf16.mxu0 %v2261_v9  ;;  %v1980_v26 = vadd.f32 %v1979_v13, %v5257_v18  ;;  %v1981_v41 = vpop.f32.mrb[70].mxu1 }
 0x2ed   : > { %v1892_v28 = vadd.f32 %v1891_v16, %v5253_v49  ;;  %v1893_v29 = vpop.f32.mrb[103].mxu0  ;;  %2827 = vmatmul.mubr.bf16.gmra.mrb[156].mxu1 %v2260_v8  ;;  %3180 = vmatmul.mubr.bf16.gmra.mrb[164].mxu0 %v2260_v8  ;;  %v2188_v15 = vmax.f32 %v1978_v21, 0.0  ;;  %v1982_v32 = vadd.f32 %v1981_v41, %v5253_v49  ;;  %v1983_v23 = vpop.f32.mrb[71].mxu1  ;;  %v2152_v36 = vmax.f32 %v1888_v19, 0.0 }
 0x2ee   : > { %v1894_v33 = vadd.f32 %v1893_v29, %v5257_v18  ;;  %v2189_v0 = vmax.f32 %v1980_v26, 0.0  ;;  %v1984_v35 = vadd.f32 %v1983_v23, %v5257_v18  ;;  %v2153_v27 = vmax.f32 %v1890_v56, 0.0 }
 0x2ef   : > { %v2154_v22 = vmax.f32 %v1892_v28, 0.0  ;;  %v2190_v37 = vmax.f32 %v1982_v32, 0.0 }
 0x2f0   : > { %v2155_v38 = vmax.f32 %v1894_v33, 0.0  ;;  %v2191_v40 = vmax.f32 %v1984_v35, 0.0 }
 0x2f1   : > { %v2262_v14 = vpack.c.bf16 %v2154_v22, %v2152_v36  ;;  %v5311_v31 = vpack.c.bf16 %v2190_v37, %v2188_v15 }
 0x2f2   : > { %v2263_v42 = vpack.c.bf16 %v2155_v38, %v2153_v27  ;;  %v1897_v39 = vpop.f32.mrb[104].mxu0  ;;  %v5313_v43 = vpack.c.bf16 %v2191_v40, %v2189_v0  ;;  %v1987_v30 = vpop.f32.mrb[72].mxu1 }
 0x2f3   : > { %v1898_v44 = vadd.f32 %v1897_v39, %v5253_v49  ;;  %v1899_v17 = vpop.f32.mrb[105].mxu0  ;;  %v1988_v45 = vadd.f32 %v1987_v30, %v5253_v49  ;;  %v1989_v47 = vpop.f32.mrb[73].mxu1 }
 0x2f4   : > { %v1900_v50 = vadd.f32 %v1899_v17, %v5257_v18  ;;  %v1901_v51 = vpop.f32.mrb[106].mxu0  ;;  %2836 = vmatprep.mubr.bf16.mxu1 %v2263_v42  ;;  %3189 = vmatprep.mubr.bf16.mxu0 %v2263_v42  ;;  %v1990_v52 = vadd.f32 %v1989_v47, %v5257_v18  ;;  %v1991_v53 = vpop.f32.mrb[74].mxu1 }
 0x2f5   : > { %v1902_v46 = vadd.f32 %v1901_v51, %v5253_v49  ;;  %v1903_v54 = vpop.f32.mrb[107].mxu0  ;;  %2837 = vmatmul.mubr.bf16.gmra.mrb[160].mxu1 %v2262_v14  ;;  %3190 = vmatmul.mubr.bf16.gmra.mrb[168].mxu0 %v2262_v14  ;;  %v2192_v55 = vmax.f32 %v1988_v45, 0.0  ;;  %v1992_v57 = vadd.f32 %v1991_v53, %v5253_v49  ;;  %v1993_v59 = vpop.f32.mrb[75].mxu1  ;;  %v2156_v58 = vmax.f32 %v1898_v44, 0.0 }
 0x2f6   : > { %v1904_v60 = vadd.f32 %v1903_v54, %v5257_v18  ;;  %v2193_v61 = vmax.f32 %v1990_v52, 0.0  ;;  %v1994_v62 = vadd.f32 %v1993_v59, %v5257_v18  ;;  %v2157_v1 = vmax.f32 %v1900_v50, 0.0 }
 0x2f7   : > { %v2158_v63 = vmax.f32 %v1902_v46, 0.0  ;;  %v2194_v24 = vmax.f32 %v1992_v57, 0.0 }
 0x2f8   : > { %v2159_v3 = vmax.f32 %v1904_v60, 0.0  ;;  %v2195_v4 = vmax.f32 %v1994_v62, 0.0 }
 0x2f9   : > { %v2264_v5 = vpack.c.bf16 %v2158_v63, %v2156_v58  ;;  %v5323_v6 = vpack.c.bf16 %v2194_v24, %v2192_v55 }
 0x2fa   : > { %v2265_v8 = vpack.c.bf16 %v2159_v3, %v2157_v1  ;;  %v1907_v9 = vpop.f32.mrb[108].mxu0  ;;  %v5325_v10 = vpack.c.bf16 %v2195_v4, %v2193_v61  ;;  %v1997_v12 = vpop.f32.mrb[76].mxu1 }
 0x2fb   : > { %v1908_v19 = vadd.f32 %v1907_v9, %v5253_v49  ;;  %v1909_v20 = vpop.f32.mrb[109].mxu0  ;;  %v1998_v21 = vadd.f32 %v1997_v12, %v5253_v49  ;;  %v1999_v13 = vpop.f32.mrb[77].mxu1 }
 0x2fc   : > { %v1910_v56 = vadd.f32 %v1909_v20, %v5257_v18  ;;  %v1911_v16 = vpop.f32.mrb[110].mxu0  ;;  %2846 = vmatprep.mubr.bf16.mxu1 %v2265_v8  ;;  %3199 = vmatprep.mubr.bf16.mxu0 %v2265_v8  ;;  %v2000_v26 = vadd.f32 %v1999_v13, %v5257_v18  ;;  %v2001_v41 = vpop.f32.mrb[78].mxu1 }
 0x2fd   : > { %v1912_v28 = vadd.f32 %v1911_v16, %v5253_v49  ;;  %v1913_v29 = vpop.f32.mrb[111].mxu0  ;;  %2847 = vmatmul.mubr.bf16.gmra.mrb[164].mxu1 %v2264_v5  ;;  %3200 = vmatmul.mubr.bf16.gmra.mrb[172].mxu0 %v2264_v5  ;;  %v2196_v15 = vmax.f32 %v1998_v21, 0.0  ;;  %v2002_v32 = vadd.f32 %v2001_v41, %v5253_v49  ;;  %v2003_v23 = vpop.f32.mrb[79].mxu1  ;;  %v2160_v36 = vmax.f32 %v1908_v19, 0.0 }
 0x2fe   : > { %v1914_v33 = vadd.f32 %v1913_v29, %v5257_v18  ;;  %v2197_v0 = vmax.f32 %v2000_v26, 0.0  ;;  %v2004_v35 = vadd.f32 %v2003_v23, %v5257_v18  ;;  %v2161_v27 = vmax.f32 %v1910_v56, 0.0 }
 0x2ff   : > { %v2162_v22 = vmax.f32 %v1912_v28, 0.0  ;;  %v2198_v37 = vmax.f32 %v2002_v32, 0.0 }
 0x300   : > { %v2163_v38 = vmax.f32 %v1914_v33, 0.0  ;;  %v2199_v40 = vmax.f32 %v2004_v35, 0.0 }
 0x301   : > { %v2266_v14 = vpack.c.bf16 %v2162_v22, %v2160_v36  ;;  %v5335_v42 = vpack.c.bf16 %v2198_v37, %v2196_v15 }
 0x302   : > { %v2267_v39 = vpack.c.bf16 %v2163_v38, %v2161_v27  ;;  %v1917_v30 = vpop.f32.mrb[112].mxu0  ;;  %v5337_v44 = vpack.c.bf16 %v2199_v40, %v2197_v0  ;;  %v2007_v17 = vpop.f32.mrb[80].mxu1 }
 0x303   : > { %v1918_v45 = vadd.f32 %v1917_v30, %v5253_v49  ;;  %v1919_v47 = vpop.f32.mrb[113].mxu0  ;;  %v2008_v50 = vadd.f32 %v2007_v17, %v5253_v49  ;;  %v2009_v51 = vpop.f32.mrb[81].mxu1 }
 0x304   : > { %v1920_v52 = vadd.f32 %v1919_v47, %v5257_v18  ;;  %v1921_v53 = vpop.f32.mrb[114].mxu0  ;;  %2856 = vmatprep.mubr.bf16.mxu1 %v2267_v39  ;;  %3209 = vmatprep.mubr.bf16.mxu0 %v2267_v39  ;;  %v2010_v46 = vadd.f32 %v2009_v51, %v5257_v18  ;;  %v2011_v54 = vpop.f32.mrb[82].mxu1 }
 0x305   : > { %v1922_v55 = vadd.f32 %v1921_v53, %v5253_v49  ;;  %v1923_v57 = vpop.f32.mrb[115].mxu0  ;;  %2857 = vmatmul.mubr.bf16.gmra.mrb[168].mxu1 %v2266_v14  ;;  %3210 = vmatmul.mubr.bf16.gmra.mrb[176].mxu0 %v2266_v14  ;;  %v2200_v59 = vmax.f32 %v2008_v50, 0.0  ;;  %v2012_v60 = vadd.f32 %v2011_v54, %v5253_v49  ;;  %v2013_v61 = vpop.f32.mrb[83].mxu1  ;;  %v2164_v24 = vmax.f32 %v1918_v45, 0.0 }
 0x306   : > { %v1924_v62 = vadd.f32 %v1923_v57, %v5257_v18  ;;  %v2201_v58 = vmax.f32 %v2010_v46, 0.0  ;;  %v2014_v63 = vadd.f32 %v2013_v61, %v5257_v18  ;;  %v2165_v4 = vmax.f32 %v1920_v52, 0.0 }
 0x307   : > { %v2166_v1 = vmax.f32 %v1922_v55, 0.0  ;;  %v2202_v3 = vmax.f32 %v2012_v60, 0.0 }
 0x308   : > { %v2167_v5 = vmax.f32 %v1924_v62, 0.0  ;;  %v2203_v8 = vmax.f32 %v2014_v63, 0.0 }
 0x309   : > { %v2268_v9 = vpack.c.bf16 %v2166_v1, %v2164_v24  ;;  %v5347_v12 = vpack.c.bf16 %v2202_v3, %v2200_v59 }
 0x30a   : > { %v2269_v19 = vpack.c.bf16 %v2167_v5, %v2165_v4  ;;  %v1927_v20 = vpop.f32.mrb[116].mxu0  ;;  %v5349_v21 = vpack.c.bf16 %v2203_v8, %v2201_v58  ;;  %v2017_v13 = vpop.f32.mrb[84].mxu1 }
 0x30b   : > { %v1928_v56 = vadd.f32 %v1927_v20, %v5253_v49  ;;  %v1929_v16 = vpop.f32.mrb[117].mxu0  ;;  %v2018_v26 = vadd.f32 %v2017_v13, %v5253_v49  ;;  %v2019_v41 = vpop.f32.mrb[85].mxu1 }
 0x30c   : > { %v1930_v28 = vadd.f32 %v1929_v16, %v5257_v18  ;;  %v1931_v29 = vpop.f32.mrb[118].mxu0  ;;  %2866 = vmatprep.mubr.bf16.mxu1 %v2269_v19  ;;  %3219 = vmatprep.mubr.bf16.mxu0 %v2269_v19  ;;  %v2020_v15 = vadd.f32 %v2019_v41, %v5257_v18  ;;  %v2021_v32 = vpop.f32.mrb[86].mxu1 }
 0x30d   : > { %v1932_v23 = vadd.f32 %v1931_v29, %v5253_v49  ;;  %v1933_v33 = vpop.f32.mrb[119].mxu0  ;;  %2867 = vmatmul.mubr.bf16.gmra.mrb[172].mxu1 %v2268_v9  ;;  %3220 = vmatmul.mubr.bf16.gmra.mrb[180].mxu0 %v2268_v9  ;;  %v2204_v0 = vmax.f32 %v2018_v26, 0.0  ;;  %v2022_v35 = vadd.f32 %v2021_v32, %v5253_v49  ;;  %v2023_v36 = vpop.f32.mrb[87].mxu1  ;;  %v2168_v38 = vmax.f32 %v1928_v56, 0.0 }
 0x30e   : > { %v1934_v22 = vadd.f32 %v1933_v33, %v5257_v18  ;;  %v2205_v37 = vmax.f32 %v2020_v15, 0.0  ;;  %v2024_v27 = vadd.f32 %v2023_v36, %v5257_v18  ;;  %v2169_v39 = vmax.f32 %v1930_v28, 0.0 }
 0x30f   : > { %v2170_v40 = vmax.f32 %v1932_v23, 0.0  ;;  %v2206_v14 = vmax.f32 %v2022_v35, 0.0 }
 0x310   : > { %v2171_v30 = vmax.f32 %v1934_v22, 0.0  ;;  %v2207_v17 = vmax.f32 %v2024_v27, 0.0 }
 0x311   : > { %v2270_v45 = vpack.c.bf16 %v2170_v40, %v2168_v38  ;;  %v5359_v47 = vpack.c.bf16 %v2206_v14, %v2204_v0 }
 0x312   : > { %v2271_v50 = vpack.c.bf16 %v2171_v30, %v2169_v39  ;;  %v1937_v51 = vpop.f32.mrb[120].mxu0  ;;  %v5361_v52 = vpack.c.bf16 %v2207_v17, %v2205_v37  ;;  %v2027_v53 = vpop.f32.mrb[88].mxu1 }
 0x313   : > { %v1938_v46 = vadd.f32 %v1937_v51, %v5253_v49  ;;  %v1939_v54 = vpop.f32.mrb[121].mxu0  ;;  %v2028_v55 = vadd.f32 %v2027_v53, %v5253_v49  ;;  %v2029_v57 = vpop.f32.mrb[89].mxu1 }
 0x314   : > { %v1940_v59 = vadd.f32 %v1939_v54, %v5257_v18  ;;  %v1941_v60 = vpop.f32.mrb[122].mxu0  ;;  %2876 = vmatprep.mubr.bf16.mxu1 %v2271_v50  ;;  %3229 = vmatprep.mubr.bf16.mxu0 %v2271_v50  ;;  %v2030_v61 = vadd.f32 %v2029_v57, %v5257_v18  ;;  %v2031_v62 = vpop.f32.mrb[90].mxu1 }
 0x315   : > { %v1942_v58 = vadd.f32 %v1941_v60, %v5253_v49  ;;  %v1943_v63 = vpop.f32.mrb[123].mxu0  ;;  %2877 = vmatmul.mubr.bf16.gmra.mrb[176].mxu1 %v2270_v45  ;;  %3230 = vmatmul.mubr.bf16.gmra.mrb[184].mxu0 %v2270_v45  ;;  %v2208_v24 = vmax.f32 %v2028_v55, 0.0  ;;  %v2032_v1 = vadd.f32 %v2031_v62, %v5253_v49  ;;  %v2033_v3 = vpop.f32.mrb[91].mxu1  ;;  %v2172_v9 = vmax.f32 %v1938_v46, 0.0 }
 0x316   : > { %v1944_v4 = vadd.f32 %v1943_v63, %v5257_v18  ;;  %v2209_v5 = vmax.f32 %v2030_v61, 0.0  ;;  %v2034_v8 = vadd.f32 %v2033_v3, %v5257_v18  ;;  %v2173_v13 = vmax.f32 %v1940_v59, 0.0 }
 0x317   : > { %v2174_v19 = vmax.f32 %v1942_v58, 0.0  ;;  %v2210_v20 = vmax.f32 %v2032_v1, 0.0 }
 0x318   : > { %v2175_v56 = vmax.f32 %v1944_v4, 0.0  ;;  %v2211_v16 = vmax.f32 %v2034_v8, 0.0 }
 0x319   : > { %v2272_v26 = vpack.c.bf16 %v2174_v19, %v2172_v9  ;;  %v5371_v41 = vpack.c.bf16 %v2210_v20, %v2208_v24 }
 0x31a   : > { %v2273_v28 = vpack.c.bf16 %v2175_v56, %v2173_v13  ;;  %v1947_v29 = vpop.f32.mrb[124].mxu0  ;;  %v5373_v15 = vpack.c.bf16 %v2211_v16, %v2209_v5  ;;  %v2037_v32 = vpop.f32.mrb[92].mxu1 }
 0x31b   : > { %v1948_v23 = vadd.f32 %v1947_v29, %v5253_v49  ;;  %v1949_v33 = vpop.f32.mrb[125].mxu0  ;;  %v2038_v0 = vadd.f32 %v2037_v32, %v5253_v49  ;;  %v2039_v35 = vpop.f32.mrb[93].mxu1 }
 0x31c   : > { %v1950_v36 = vadd.f32 %v1949_v33, %v5257_v18  ;;  %v1951_v22 = vpop.f32.mrb[126].mxu0  ;;  %2886 = vmatprep.mubr.bf16.mxu1 %v2273_v28  ;;  %3239 = vmatprep.mubr.bf16.mxu0 %v2273_v28  ;;  %v2040_v37 = vadd.f32 %v2039_v35, %v5257_v18  ;;  %v2041_v27 = vpop.f32.mrb[94].mxu1 }
 0x31d   : > { %v1952_v38 = vadd.f32 %v1951_v22, %v5253_v49  ;;  %v1953_v40 = vpop.f32.mrb[127].mxu0  ;;  %2887 = vmatmul.mubr.bf16.gmra.mrb[180].mxu1 %v2272_v26  ;;  %3240 = vmatmul.mubr.bf16.gmra.mrb[188].mxu0 %v2272_v26  ;;  %v2212_v14 = vmax.f32 %v2038_v0, 0.0  ;;  %v2042_v39 = vadd.f32 %v2041_v27, %v5253_v49  ;;  %v2043_v30 = vpop.f32.mrb[95].mxu1  ;;  %v2176_v51 = vmax.f32 %v1948_v23, 0.0 }
 0x31e   : > { %v1954_v17 = vadd.f32 %v1953_v40, %v5257_v18  ;;  %v2213_v45 = vmax.f32 %v2040_v37, 0.0  ;;  %v2044_v50 = vadd.f32 %v2043_v30, %v5257_v18  ;;  %v2177_v54 = vmax.f32 %v1950_v36, 0.0 }
 0x31f   : > { %v2178_v53 = vmax.f32 %v1952_v38, 0.0  ;;  %v2214_v46 = vmax.f32 %v2042_v39, 0.0 }
 0x320   : > { %v2179_v55 = vmax.f32 %v1954_v17, 0.0  ;;  %v2215_v57 = vmax.f32 %v2044_v50, 0.0 }
 0x321   : > { %v2274_v59 = vpack.c.bf16 %v2178_v53, %v2176_v51  ;;  %v5383_v60 = vpack.c.bf16 %v2214_v46, %v2212_v14 }
 0x322   : > { %v2275_v61 = vpack.c.bf16 %v2179_v55, %v2177_v54  ;;  %v1957_v62 = vpop.f32.mrb[128].mxu0  ;;  %v5385_v58 = vpack.c.bf16 %v2215_v57, %v2213_v45  ;;  %v2047_v63 = vpop.f32.mrb[96].mxu1 }
 0x323   : > { %v1958_v24 = vadd.f32 %v1957_v62, %v5253_v49  ;;  %v1959_v1 = vpop.f32.mrb[129].mxu0  ;;  %v2048_v3 = vadd.f32 %v2047_v63, %v5253_v49  ;;  %v2049_v4 = vpop.f32.mrb[97].mxu1 }
 0x324   : > { %v1960_v5 = vadd.f32 %v1959_v1, %v5257_v18  ;;  %v1961_v8 = vpop.f32.mrb[130].mxu0  ;;  %2896 = vmatprep.mubr.bf16.mxu1 %v2275_v61  ;;  %3249 = vmatprep.mubr.bf16.mxu0 %v2275_v61  ;;  %v2050_v9 = vadd.f32 %v2049_v4, %v5257_v18  ;;  %v2051_v19 = vpop.f32.mrb[98].mxu1 }
 0x325   : > { %v1962_v20 = vadd.f32 %v1961_v8, %v5253_v49  ;;  %v1963_v13 = vpop.f32.mrb[131].mxu0  ;;  %2897 = vmatmul.mubr.bf16.gmra.mrb[184].mxu1 %v2274_v59  ;;  %3250 = vmatmul.mubr.bf16.gmra.mrb[192].mxu0 %v2274_v59  ;;  %v2216_v56 = vmax.f32 %v2048_v3, 0.0  ;;  %v2052_v16 = vadd.f32 %v2051_v19, %v5253_v49  ;;  %v2053_v26 = vpop.f32.mrb[99].mxu1  ;;  %v2180_v23 = vmax.f32 %v1958_v24, 0.0 }
 0x326   : > { %v1964_v28 = vadd.f32 %v1963_v13, %v5257_v18  ;;  %v2217_v29 = vmax.f32 %v2050_v9, 0.0  ;;  %v2054_v32 = vadd.f32 %v2053_v26, %v5257_v18  ;;  %v2181_v35 = vmax.f32 %v1960_v5, 0.0 }
 0x327   : > { %v2182_v33 = vmax.f32 %v1962_v20, 0.0  ;;  %v2218_v0 = vmax.f32 %v2052_v16, 0.0 }
 0x328   : > { %v2183_v36 = vmax.f32 %v1964_v28, 0.0  ;;  %v2219_v22 = vmax.f32 %v2054_v32, 0.0 }
 0x329   : > { %v2276_v37 = vpack.c.bf16 %v2182_v33, %v2180_v23  ;;  %v5395_v27 = vpack.c.bf16 %v2218_v0, %v2216_v56 }
 0x32a   : > { %v2277_v38 = vpack.c.bf16 %v2183_v36, %v2181_v35  ;;  %v5397_v40 = vpack.c.bf16 %v2219_v22, %v2217_v29  ;;  %v2057_v14 = vpop.f32.mrb[100].mxu1 }
 0x32b   : > { %v2058_v39 = vadd.f32 %v2057_v14, %v5253_v49  ;;  %v2059_v30 = vpop.f32.mrb[101].mxu1 }
 0x32c   : > { %2906 = vmatprep.mubr.bf16.mxu1 %v2277_v38  ;;  %3259 = vmatprep.mubr.bf16.mxu0 %v2277_v38  ;;  %v2060_v17 = vadd.f32 %v2059_v30, %v5257_v18  ;;  %v2061_v45 = vpop.f32.mrb[102].mxu1 }
 0x32d   : > { %2907 = vmatmul.mubr.bf16.gmra.mrb[188].mxu1 %v2276_v37  ;;  %3260 = vmatmul.mubr.bf16.gmra.mrb[196].mxu0 %v2276_v37  ;;  %v2220_v50 = vmax.f32 %v2058_v39, 0.0  ;;  %v2062_v51 = vadd.f32 %v2061_v45, %v5253_v49  ;;  %v2063_v53 = vpop.f32.mrb[103].mxu1 }
 0x32e   : > { %2916 = vmatprep.mubr.bf16.mxu1 %v5301_v2  ;;  %3269 = vmatprep.mubr.bf16.mxu0 %v5301_v2  ;;  %v2221_v46 = vmax.f32 %v2060_v17, 0.0  ;;  %v2064_v54 = vadd.f32 %v2063_v53, %v5257_v18 }
 0x32f   : > { %v2222_v55 = vmax.f32 %v2062_v51, 0.0 }
 0x330   : > { %v2223_v57 = vmax.f32 %v2064_v54, 0.0 }
 0x331   : > { %v5405_v59 = vpack.c.bf16 %v2222_v55, %v2220_v50 }
 0x332   : > { %v5407_v61 = vpack.c.bf16 %v2223_v57, %v2221_v46  ;;  %v2067_v62 = vpop.f32.mrb[104].mxu1 }
 0x333   : > { %v2068_v63 = vadd.f32 %v2067_v62, %v5253_v49  ;;  %v2069_v24 = vpop.f32.mrb[105].mxu1 }
 0x334   : > { %v2070_v1 = vadd.f32 %v2069_v24, %v5257_v18  ;;  %v2071_v3 = vpop.f32.mrb[106].mxu1 }
 0x335   : > { %2917 = vmatmul.mubr.bf16.gmra.mrb[192].mxu1 %v5299_v7  ;;  %3270 = vmatmul.mubr.bf16.gmra.mrb[200].mxu0 %v5299_v7  ;;  %v2224_v2 = vmax.f32 %v2068_v63, 0.0  ;;  %v2072_v4 = vadd.f32 %v2071_v3, %v5253_v49  ;;  %v2073_v5 = vpop.f32.mrb[107].mxu1 }
 0x336   : > { %2926 = vmatprep.mubr.bf16.mxu1 %v5313_v43  ;;  %3279 = vmatprep.mubr.bf16.mxu0 %v5313_v43  ;;  %v2225_v8 = vmax.f32 %v2070_v1, 0.0  ;;  %v2074_v9 = vadd.f32 %v2073_v5, %v5257_v18 }
 0x337   : > { %v2226_v19 = vmax.f32 %v2072_v4, 0.0 }
 0x338   : > { %v2227_v20 = vmax.f32 %v2074_v9, 0.0 }
 0x339   : > { %v5417_v13 = vpack.c.bf16 %v2226_v19, %v2224_v2 }
 0x33a   : > { %v5419_v56 = vpack.c.bf16 %v2227_v20, %v2225_v8  ;;  %v2077_v16 = vpop.f32.mrb[108].mxu1 }
 0x33b   : > { %v2078_v7 = vadd.f32 %v2077_v16, %v5253_v49  ;;  %v2079_v26 = vpop.f32.mrb[109].mxu1 }
 0x33c   : > { %v2080_v28 = vadd.f32 %v2079_v26, %v5257_v18  ;;  %v2081_v29 = vpop.f32.mrb[110].mxu1 }
 0x33d   : > { %2927 = vmatmul.mubr.bf16.gmra.mrb[196].mxu1 %v5311_v31  ;;  %3280 = vmatmul.mubr.bf16.gmra.mrb[204].mxu0 %v5311_v31  ;;  %v2228_v43 = vmax.f32 %v2078_v7, 0.0  ;;  %v2082_v32 = vadd.f32 %v2081_v29, %v5253_v49  ;;  %v2083_v23 = vpop.f32.mrb[111].mxu1 }
 0x33e   : > { %2936 = vmatprep.mubr.bf16.mxu1 %v5325_v10  ;;  %3289 = vmatprep.mubr.bf16.mxu0 %v5325_v10  ;;  %v2229_v33 = vmax.f32 %v2080_v28, 0.0  ;;  %v2084_v0 = vadd.f32 %v2083_v23, %v5257_v18 }
 0x33f   : > { %v2230_v35 = vmax.f32 %v2082_v32, 0.0 }
 0x340   : > { %v2231_v36 = vmax.f32 %v2084_v0, 0.0 }
 0x341   : > { %v5429_v22 = vpack.c.bf16 %v2230_v35, %v2228_v43 }
 0x342   : > { %v5431_v37 = vpack.c.bf16 %v2231_v36, %v2229_v33  ;;  %v2087_v38 = vpop.f32.mrb[112].mxu1 }
 0x343   : > { %v2088_v31 = vadd.f32 %v2087_v38, %v5253_v49  ;;  %v2089_v14 = vpop.f32.mrb[113].mxu1 }
 0x344   : > { %v2090_v39 = vadd.f32 %v2089_v14, %v5257_v18  ;;  %v2091_v30 = vpop.f32.mrb[114].mxu1 }
 0x345   : > { %2937 = vmatmul.mubr.bf16.gmra.mrb[200].mxu1 %v5323_v6  ;;  %3290 = vmatmul.mubr.bf16.gmra.mrb[208].mxu0 %v5323_v6  ;;  %v2232_v10 = vmax.f32 %v2088_v31, 0.0  ;;  %v2092_v17 = vadd.f32 %v2091_v30, %v5253_v49  ;;  %v2093_v45 = vpop.f32.mrb[115].mxu1 }
 0x346   : > { %2946 = vmatprep.mubr.bf16.mxu1 %v5337_v44  ;;  %3299 = vmatprep.mubr.bf16.mxu0 %v5337_v44  ;;  %v2233_v50 = vmax.f32 %v2090_v39, 0.0  ;;  %v2094_v51 = vadd.f32 %v2093_v45, %v5257_v18 }
 0x347   : > { %v2234_v53 = vmax.f32 %v2092_v17, 0.0 }
 0x348   : > { %v2235_v46 = vmax.f32 %v2094_v51, 0.0 }
 0x349   : > { %v5441_v54 = vpack.c.bf16 %v2234_v53, %v2232_v10 }
 0x34a   : > { %v5443_v55 = vpack.c.bf16 %v2235_v46, %v2233_v50  ;;  %v2097_v57 = vpop.f32.mrb[116].mxu1 }
 0x34b   : > { %v2098_v6 = vadd.f32 %v2097_v57, %v5253_v49  ;;  %v2099_v62 = vpop.f32.mrb[117].mxu1 }
 0x34c   : > { %v2100_v63 = vadd.f32 %v2099_v62, %v5257_v18  ;;  %v2101_v24 = vpop.f32.mrb[118].mxu1 }
 0x34d   : > { %2947 = vmatmul.mubr.bf16.gmra.mrb[204].mxu1 %v5335_v42  ;;  %3300 = vmatmul.mubr.bf16.gmra.mrb[212].mxu0 %v5335_v42  ;;  %v2236_v44 = vmax.f32 %v2098_v6, 0.0  ;;  %v2102_v1 = vadd.f32 %v2101_v24, %v5253_v49  ;;  %v2103_v3 = vpop.f32.mrb[119].mxu1 }
 0x34e   : > { %2956 = vmatprep.mubr.bf16.mxu1 %v5349_v21  ;;  %3309 = vmatprep.mubr.bf16.mxu0 %v5349_v21  ;;  %v2237_v2 = vmax.f32 %v2100_v63, 0.0  ;;  %v2104_v4 = vadd.f32 %v2103_v3, %v5257_v18 }
 0x34f   : > { %v2238_v5 = vmax.f32 %v2102_v1, 0.0 }
 0x350   : > { %v2239_v8 = vmax.f32 %v2104_v4, 0.0 }
 0x351   : > { %v5453_v9 = vpack.c.bf16 %v2238_v5, %v2236_v44 }
 0x352   : > { %v5455_v19 = vpack.c.bf16 %v2239_v8, %v2237_v2  ;;  %v2107_v20 = vpop.f32.mrb[120].mxu1 }
 0x353   : > { %v2108_v42 = vadd.f32 %v2107_v20, %v5253_v49  ;;  %v2109_v16 = vpop.f32.mrb[121].mxu1 }
 0x354   : > { %v2110_v7 = vadd.f32 %v2109_v16, %v5257_v18  ;;  %v2111_v26 = vpop.f32.mrb[122].mxu1 }
 0x355   : > { %2957 = vmatmul.mubr.bf16.gmra.mrb[208].mxu1 %v5347_v12  ;;  %3310 = vmatmul.mubr.bf16.gmra.mrb[216].mxu0 %v5347_v12  ;;  %v2240_v21 = vmax.f32 %v2108_v42, 0.0  ;;  %v2112_v28 = vadd.f32 %v2111_v26, %v5253_v49  ;;  %v2113_v29 = vpop.f32.mrb[123].mxu1  ;;  %v2384_v49 = vsub.s32 2, %v5244_v34  ;;  %v2388_v12 = vsub.s32 3, %v5244_v34 }
 0x356   : > { %2966 = vmatprep.mubr.bf16.mxu1 %v5361_v52  ;;  %3319 = vmatprep.mubr.bf16.mxu0 %v5361_v52  ;;  %v2241_v43 = vmax.f32 %v2110_v7, 0.0  ;;  %v2114_v32 = vadd.f32 %v2113_v29, %v5257_v18  ;;  %v2372_v18 = vld [vmem:[%s5803_s8] sm:$0xf] }
 0x357   : > { %v2242_v23 = vmax.f32 %v2112_v28, 0.0  ;;  %v5498_v52 = vrot.slane %v2372_v18, %v2384_v49 }
 0x358   : > { %v2243_v33 = vmax.f32 %v2114_v32, 0.0 }
 0x359   : > { %v5465_v0 = vpack.c.bf16 %v2242_v23, %v2240_v21 }
 0x35a   : > { %v5467_v35 = vpack.c.bf16 %v2243_v33, %v2241_v43 }
 0x35d   : > { %2967 = vmatmul.mubr.bf16.gmra.mrb[212].mxu1 %v5359_v47  ;;  %3320 = vmatmul.mubr.bf16.gmra.mrb[220].mxu0 %v5359_v47  ;;  %v5496_v47 = vrot.slane %v2372_v18, %v1675_v25 }
 0x35e   : > { %2976 = vmatprep.mubr.bf16.mxu1 %v5373_v15  ;;  %3329 = vmatprep.mubr.bf16.mxu0 %v5373_v15 }
 0x365   : > { %2977 = vmatmul.mubr.bf16.gmra.mrb[216].mxu1 %v5371_v41  ;;  %3330 = vmatmul.mubr.bf16.gmra.mrb[224].mxu0 %v5371_v41 }
 0x366   : > { %2986 = vmatprep.mubr.bf16.mxu1 %v5385_v58  ;;  %3339 = vmatprep.mubr.bf16.mxu0 %v5385_v58  ;;  %v5504_v58 = vrot.slane %v2372_v18, %v2388_v12 }
 0x36d   : > { %2987 = vmatmul.mubr.bf16.gmra.mrb[220].mxu1 %v5383_v60  ;;  %3340 = vmatmul.mubr.bf16.gmra.mrb[228].mxu0 %v5383_v60  ;;  %v5502_v60 = vrot.slane %v2372_v18, %v1679_v48 }
 0x36e   : > { %2996 = vmatprep.mubr.bf16.mxu1 %v5397_v40  ;;  %3349 = vmatprep.mubr.bf16.mxu0 %v5397_v40 }
 0x375   : > { %2997 = vmatmul.mubr.bf16.gmra.mrb[224].mxu1 %v5395_v27  ;;  %3350 = vmatmul.mubr.bf16.gmra.mrb[232].mxu0 %v5395_v27 }
 0x376   : > { %3006 = vmatprep.mubr.bf16.mxu1 %v5407_v61  ;;  %3359 = vmatprep.mubr.bf16.mxu0 %v5407_v61 }
 0x37d   : > { %3007 = vmatmul.mubr.bf16.gmra.mrb[228].mxu1 %v5405_v59  ;;  %3360 = vmatmul.mubr.bf16.gmra.mrb[236].mxu0 %v5405_v59 }
 0x37e   : > { %3016 = vmatprep.mubr.bf16.mxu1 %v5419_v56  ;;  %3369 = vmatprep.mubr.bf16.mxu0 %v5419_v56 }
 0x380   : > { %v2748_v41 = vpop.f32.mrb[124].mxu1  ;;  %v3101_v15 = vpop.f32.mrb[132].mxu0 }
 0x381   : > { %v2750_v27 = vpop.f32.mrb[125].mxu1  ;;  %v3103_v40 = vpop.f32.mrb[133].mxu0  ;;  %v2749_v56 = vadd.f32 %v2748_v41, %v5496_v47  ;;  %v3102_v36 = vadd.f32 %v3101_v15, %v5498_v52 }
 0x382   : > { %v2752_v59 = vpop.f32.mrb[126].mxu1  ;;  %v3105_v61 = vpop.f32.mrb[134].mxu0  ;;  %v2751_v39 = vadd.f32 %v2750_v27, %v5502_v60  ;;  %v3104_v48 = vadd.f32 %v3103_v40, %v5504_v58 }
 0x383   : > { %v2753_v25 = vadd.f32 %v2752_v59, %v5496_v47  ;;  %v3106_v38 = vadd.f32 %v3105_v61, %v5498_v52  ;;  %v2754_v31 = vpop.f32.mrb[127].mxu1  ;;  %v3107_v14 = vpop.f32.mrb[135].mxu0 }
 0x384   : > { %v2755_v30 = vadd.f32 %v2754_v31, %v5502_v60  ;;  %v3108_v10 = vadd.f32 %v3107_v14, %v5504_v58 }
 0x385   : > { %v3420_v17 = vmax.f32 %v2749_v56, %v2753_v25  ;;  %v3546_v45 = vmax.f32 %v3102_v36, %v3106_v38  ;;  %3017 = vmatmul.mubr.bf16.gmra.mrb[232].mxu1 %v5417_v13  ;;  %3370 = vmatmul.mubr.bf16.gmra.mrb[240].mxu0 %v5417_v13 }
 0x386   : > { %v3483_v50 = vmax.f32 %v2751_v39, %v2755_v30  ;;  %v3609_v51 = vmax.f32 %v3104_v48, %v3108_v10  ;;  %3026 = vmatprep.mubr.bf16.mxu1 %v5431_v37  ;;  %3379 = vmatprep.mubr.bf16.mxu0 %v5431_v37 }
 0x388   : > { %v2758_v53 = vpop.f32.mrb[128].mxu1  ;;  %v3111_v46 = vpop.f32.mrb[136].mxu0 }
 0x389   : > { %v2759_v57 = vadd.f32 %v2758_v53, %v5496_v47  ;;  %v3112_v6 = vadd.f32 %v3111_v46, %v5498_v52  ;;  %v2760_v62 = vpop.f32.mrb[129].mxu1  ;;  %v3113_v63 = vpop.f32.mrb[137].mxu0 }
 0x38a   : > { %v2761_v24 = vadd.f32 %v2760_v62, %v5502_v60  ;;  %v3114_v44 = vadd.f32 %v3113_v63, %v5504_v58  ;;  %v2762_v1 = vpop.f32.mrb[130].mxu1  ;;  %v3115_v13 = vpop.f32.mrb[138].mxu0 }
 0x38b   : > { %v3421_v3 = vmax.f32 %v3420_v17, %v2759_v57  ;;  %v3547_v2 = vmax.f32 %v3546_v45, %v3112_v6  ;;  %v2763_v4 = vadd.f32 %v2762_v1, %v5496_v47  ;;  %v3116_v37 = vadd.f32 %v3115_v13, %v5498_v52  ;;  %v2764_v5 = vpop.f32.mrb[131].mxu1  ;;  %v3117_v8 = vpop.f32.mrb[139].mxu0 }
 0x38c   : > { %v3484_v20 = vmax.f32 %v3483_v50, %v2761_v24  ;;  %v3610_v42 = vmax.f32 %v3609_v51, %v3114_v44  ;;  %v2765_v16 = vadd.f32 %v2764_v5, %v5502_v60  ;;  %v3118_v7 = vadd.f32 %v3117_v8, %v5504_v58 }
 0x38d   : > { %v3422_v26 = vmax.f32 %v3421_v3, %v2763_v4  ;;  %v3548_v21 = vmax.f32 %v3547_v2, %v3116_v37  ;;  %3027 = vmatmul.mubr.bf16.gmra.mrb[236].mxu1 %v5429_v22  ;;  %3380 = vmatmul.mubr.bf16.gmra.mrb[244].mxu0 %v5429_v22 }
 0x38e   : > { %v3485_v28 = vmax.f32 %v3484_v20, %v2765_v16  ;;  %v3611_v29 = vmax.f32 %v3610_v42, %v3118_v7  ;;  %3036 = vmatprep.mubr.bf16.mxu1 %v5443_v55  ;;  %3389 = vmatprep.mubr.bf16.mxu0 %v5443_v55 }
 0x390   : > { %v2768_v43 = vpop.f32.mrb[132].mxu1  ;;  %v3121_v32 = vpop.f32.mrb[140].mxu0 }
 0x391   : > { %v2769_v23 = vadd.f32 %v2768_v43, %v5496_v47  ;;  %v3122_v33 = vadd.f32 %v3121_v32, %v5498_v52  ;;  %v2770_v49 = vpop.f32.mrb[133].mxu1  ;;  %v3123_v18 = vpop.f32.mrb[141].mxu0 }
 0x392   : > { %v2771_v12 = vadd.f32 %v2770_v49, %v5502_v60  ;;  %v3124_v41 = vadd.f32 %v3123_v18, %v5504_v58  ;;  %v2772_v15 = vpop.f32.mrb[134].mxu1  ;;  %v3125_v22 = vpop.f32.mrb[142].mxu0 }
 0x393   : > { %v3423_v27 = vmax.f32 %v3422_v26, %v2769_v23  ;;  %v3549_v40 = vmax.f32 %v3548_v21, %v3122_v33  ;;  %v2773_v59 = vadd.f32 %v2772_v15, %v5496_v47  ;;  %v3126_v55 = vadd.f32 %v3125_v22, %v5498_v52  ;;  %v2774_v61 = vpop.f32.mrb[135].mxu1  ;;  %v3127_v56 = vpop.f32.mrb[143].mxu0 }
 0x394   : > { %v3486_v36 = vmax.f32 %v3485_v28, %v2771_v12  ;;  %v3612_v25 = vmax.f32 %v3611_v29, %v3124_v41  ;;  %v2775_v38 = vadd.f32 %v2774_v61, %v5502_v60  ;;  %v3128_v31 = vadd.f32 %v3127_v56, %v5504_v58 }
 0x395   : > { %v3424_v14 = vmax.f32 %v3423_v27, %v2773_v59  ;;  %v3550_v39 = vmax.f32 %v3549_v40, %v3126_v55  ;;  %3037 = vmatmul.mubr.bf16.gmra.mrb[240].mxu1 %v5441_v54  ;;  %3390 = vmatmul.mubr.bf16.gmra.mrb[248].mxu0 %v5441_v54 }
 0x396   : > { %v3487_v48 = vmax.f32 %v3486_v36, %v2775_v38  ;;  %v3613_v30 = vmax.f32 %v3612_v25, %v3128_v31  ;;  %3046 = vmatprep.mubr.bf16.mxu1 %v5455_v19  ;;  %3399 = vmatprep.mubr.bf16.mxu0 %v5455_v19 }
 0x398   : > { %v2778_v10 = vpop.f32.mrb[136].mxu1  ;;  %v3131_v17 = vpop.f32.mrb[144].mxu0 }
 0x399   : > { %v2779_v45 = vadd.f32 %v2778_v10, %v5496_v47  ;;  %v3132_v50 = vadd.f32 %v3131_v17, %v5498_v52  ;;  %v2780_v51 = vpop.f32.mrb[137].mxu1  ;;  %v3133_v53 = vpop.f32.mrb[145].mxu0 }
 0x39a   : > { %v2781_v46 = vadd.f32 %v2780_v51, %v5502_v60  ;;  %v3134_v57 = vadd.f32 %v3133_v53, %v5504_v58  ;;  %v2782_v6 = vpop.f32.mrb[138].mxu1  ;;  %v3135_v54 = vpop.f32.mrb[146].mxu0 }
 0x39b   : > { %v3425_v62 = vmax.f32 %v3424_v14, %v2779_v45  ;;  %v3551_v63 = vmax.f32 %v3550_v39, %v3132_v50  ;;  %v2783_v24 = vadd.f32 %v2782_v6, %v5496_v47  ;;  %v3136_v19 = vadd.f32 %v3135_v54, %v5498_v52  ;;  %v2784_v44 = vpop.f32.mrb[139].mxu1  ;;  %v3137_v1 = vpop.f32.mrb[147].mxu0 }
 0x39c   : > { %v3488_v13 = vmax.f32 %v3487_v48, %v2781_v46  ;;  %v3614_v3 = vmax.f32 %v3613_v30, %v3134_v57  ;;  %v2785_v2 = vadd.f32 %v2784_v44, %v5502_v60  ;;  %v3138_v4 = vadd.f32 %v3137_v1, %v5504_v58 }
 0x39d   : > { %v3426_v37 = vmax.f32 %v3425_v62, %v2783_v24  ;;  %v3552_v5 = vmax.f32 %v3551_v63, %v3136_v19  ;;  %3047 = vmatmul.mubr.bf16.gmra.mrb[244].mxu1 %v5453_v9  ;;  %3400 = vmatmul.mubr.bf16.gmra.mrb[252].mxu0 %v5453_v9 }
 0x39e   : > { %v3489_v8 = vmax.f32 %v3488_v13, %v2785_v2  ;;  %v3615_v20 = vmax.f32 %v3614_v3, %v3138_v4  ;;  %3056 = vmatprep.mubr.bf16.mxu1 %v5467_v35  ;;  %3409 = vmatprep.mubr.bf16.mxu0 %v5467_v35 }
 0x3a0   : > { %v2788_v42 = vpop.f32.mrb[140].mxu1  ;;  %v3141_v16 = vpop.f32.mrb[148].mxu0 }
 0x3a1   : > { %v2789_v7 = vadd.f32 %v2788_v42, %v5496_v47  ;;  %v3142_v26 = vadd.f32 %v3141_v16, %v5498_v52  ;;  %v2790_v21 = vpop.f32.mrb[141].mxu1  ;;  %v3143_v28 = vpop.f32.mrb[149].mxu0 }
 0x3a2   : > { %v2791_v29 = vadd.f32 %v2790_v21, %v5502_v60  ;;  %v3144_v43 = vadd.f32 %v3143_v28, %v5504_v58  ;;  %v2792_v32 = vpop.f32.mrb[142].mxu1  ;;  %v3145_v9 = vpop.f32.mrb[150].mxu0 }
 0x3a3   : > { %v3427_v23 = vmax.f32 %v3426_v37, %v2789_v7  ;;  %v3553_v33 = vmax.f32 %v3552_v5, %v3142_v26  ;;  %v2793_v49 = vadd.f32 %v2792_v32, %v5496_v47  ;;  %v3146_v35 = vadd.f32 %v3145_v9, %v5498_v52  ;;  %v2794_v18 = vpop.f32.mrb[143].mxu1  ;;  %v3147_v12 = vpop.f32.mrb[151].mxu0 }
 0x3a4   : > { %v3490_v41 = vmax.f32 %v3489_v8, %v2791_v29  ;;  %v3616_v15 = vmax.f32 %v3615_v20, %v3144_v43  ;;  %v2795_v22 = vadd.f32 %v2794_v18, %v5502_v60  ;;  %v3148_v27 = vadd.f32 %v3147_v12, %v5504_v58 }
 0x3a5   : > { %v3428_v40 = vmax.f32 %v3427_v23, %v2793_v49  ;;  %v3554_v59 = vmax.f32 %v3553_v33, %v3146_v35  ;;  %3057 = vmatmul.mubr.bf16.gmra.mrb[248].mxu1 %v5465_v0  ;;  %3410 = vmatmul.mubr.bf16.gmra.mrb[0].mxu0 %v5465_v0 }
 0x3a6   : > { %v3491_v55 = vmax.f32 %v3490_v41, %v2795_v22  ;;  %v3617_v61 = vmax.f32 %v3616_v15, %v3148_v27 }
 0x3a8   : > { %v2798_v56 = vpop.f32.mrb[144].mxu1  ;;  %v3151_v36 = vpop.f32.mrb[152].mxu0 }
 0x3a9   : > { %v2799_v25 = vadd.f32 %v2798_v56, %v5496_v47  ;;  %v3152_v38 = vadd.f32 %v3151_v36, %v5498_v52  ;;  %v2800_v31 = vpop.f32.mrb[145].mxu1  ;;  %v3153_v14 = vpop.f32.mrb[153].mxu0 }
 0x3aa   : > { %v2801_v39 = vadd.f32 %v2800_v31, %v5502_v60  ;;  %v3154_v48 = vadd.f32 %v3153_v14, %v5504_v58  ;;  %v2802_v30 = vpop.f32.mrb[146].mxu1  ;;  %v3155_v10 = vpop.f32.mrb[154].mxu0 }
 0x3ab   : > { %v3429_v17 = vmax.f32 %v3428_v40, %v2799_v25  ;;  %v3555_v45 = vmax.f32 %v3554_v59, %v3152_v38  ;;  %v2803_v0 = vadd.f32 %v2802_v30, %v5496_v47  ;;  %v3156_v50 = vadd.f32 %v3155_v10, %v5498_v52  ;;  %v2804_v51 = vpop.f32.mrb[147].mxu1  ;;  %v3157_v53 = vpop.f32.mrb[155].mxu0 }
 0x3ac   : > { %v3492_v46 = vmax.f32 %v3491_v55, %v2801_v39  ;;  %v3618_v57 = vmax.f32 %v3617_v61, %v3154_v48  ;;  %v2805_v6 = vadd.f32 %v2804_v51, %v5502_v60  ;;  %v3158_v54 = vadd.f32 %v3157_v53, %v5504_v58 }
 0x3ad   : > { %v3430_v62 = vmax.f32 %v3429_v17, %v2803_v0  ;;  %v3556_v63 = vmax.f32 %v3555_v45, %v3156_v50 }
 0x3ae   : > { %v3493_v24 = vmax.f32 %v3492_v46, %v2805_v6  ;;  %v3619_v19 = vmax.f32 %v3618_v57, %v3158_v54 }
 0x3b0   : > { %v2808_v44 = vpop.f32.mrb[148].mxu1  ;;  %v3161_v1 = vpop.f32.mrb[156].mxu0 }
 0x3b1   : > { %v2809_v13 = vadd.f32 %v2808_v44, %v5496_v47  ;;  %v3162_v3 = vadd.f32 %v3161_v1, %v5498_v52  ;;  %v2810_v2 = vpop.f32.mrb[149].mxu1  ;;  %v3163_v4 = vpop.f32.mrb[157].mxu0 }
 0x3b2   : > { %v2811_v37 = vadd.f32 %v2810_v2, %v5502_v60  ;;  %v3164_v5 = vadd.f32 %v3163_v4, %v5504_v58  ;;  %v2812_v8 = vpop.f32.mrb[150].mxu1  ;;  %v3165_v20 = vpop.f32.mrb[158].mxu0 }
 0x3b3   : > { %v3431_v42 = vmax.f32 %v3430_v62, %v2809_v13  ;;  %v3557_v16 = vmax.f32 %v3556_v63, %v3162_v3  ;;  %v2813_v7 = vadd.f32 %v2812_v8, %v5496_v47  ;;  %v3166_v26 = vadd.f32 %v3165_v20, %v5498_v52  ;;  %v2814_v21 = vpop.f32.mrb[151].mxu1  ;;  %v3167_v28 = vpop.f32.mrb[159].mxu0 }
 0x3b4   : > { %v3494_v29 = vmax.f32 %v3493_v24, %v2811_v37  ;;  %v3620_v43 = vmax.f32 %v3619_v19, %v3164_v5  ;;  %v2815_v32 = vadd.f32 %v2814_v21, %v5502_v60  ;;  %v3168_v9 = vadd.f32 %v3167_v28, %v5504_v58 }
 0x3b5   : > { %v3432_v23 = vmax.f32 %v3431_v42, %v2813_v7  ;;  %v3558_v33 = vmax.f32 %v3557_v16, %v3166_v26 }
 0x3b6   : > { %v3495_v49 = vmax.f32 %v3494_v29, %v2815_v32  ;;  %v3621_v35 = vmax.f32 %v3620_v43, %v3168_v9 }
 0x3b8   : > { %v2818_v18 = vpop.f32.mrb[152].mxu1  ;;  %v3171_v12 = vpop.f32.mrb[160].mxu0 }
 0x3b9   : > { %v2819_v41 = vadd.f32 %v2818_v18, %v5496_v47  ;;  %v3172_v15 = vadd.f32 %v3171_v12, %v5498_v52  ;;  %v2820_v22 = vpop.f32.mrb[153].mxu1  ;;  %v3173_v27 = vpop.f32.mrb[161].mxu0 }
 0x3ba   : > { %v2821_v40 = vadd.f32 %v2820_v22, %v5502_v60  ;;  %v3174_v59 = vadd.f32 %v3173_v27, %v5504_v58  ;;  %v2822_v55 = vpop.f32.mrb[154].mxu1  ;;  %v3175_v61 = vpop.f32.mrb[162].mxu0 }
 0x3bb   : > { %v3433_v56 = vmax.f32 %v3432_v23, %v2819_v41  ;;  %v3559_v36 = vmax.f32 %v3558_v33, %v3172_v15  ;;  %v2823_v25 = vadd.f32 %v2822_v55, %v5496_v47  ;;  %v3176_v38 = vadd.f32 %v3175_v61, %v5498_v52  ;;  %v2824_v31 = vpop.f32.mrb[155].mxu1  ;;  %v3177_v14 = vpop.f32.mrb[163].mxu0 }
 0x3bc   : > { %v3496_v39 = vmax.f32 %v3495_v49, %v2821_v40  ;;  %v3622_v48 = vmax.f32 %v3621_v35, %v3174_v59  ;;  %v2825_v30 = vadd.f32 %v2824_v31, %v5502_v60  ;;  %v3178_v10 = vadd.f32 %v3177_v14, %v5504_v58 }
 0x3bd   : > { %v3434_v17 = vmax.f32 %v3433_v56, %v2823_v25  ;;  %v3560_v45 = vmax.f32 %v3559_v36, %v3176_v38 }
 0x3be   : > { %v3497_v0 = vmax.f32 %v3496_v39, %v2825_v30  ;;  %v3623_v50 = vmax.f32 %v3622_v48, %v3178_v10 }
 0x3c0   : > { %v2828_v51 = vpop.f32.mrb[156].mxu1  ;;  %v3181_v53 = vpop.f32.mrb[164].mxu0 }
 0x3c1   : > { %v2829_v46 = vadd.f32 %v2828_v51, %v5496_v47  ;;  %v3182_v57 = vadd.f32 %v3181_v53, %v5498_v52  ;;  %v2830_v6 = vpop.f32.mrb[157].mxu1  ;;  %v3183_v54 = vpop.f32.mrb[165].mxu0 }
 0x3c2   : > { %v2831_v62 = vadd.f32 %v2830_v6, %v5502_v60  ;;  %v3184_v63 = vadd.f32 %v3183_v54, %v5504_v58  ;;  %v2832_v24 = vpop.f32.mrb[158].mxu1  ;;  %v3185_v19 = vpop.f32.mrb[166].mxu0 }
 0x3c3   : > { %v3435_v44 = vmax.f32 %v3434_v17, %v2829_v46  ;;  %v3561_v1 = vmax.f32 %v3560_v45, %v3182_v57  ;;  %v2833_v13 = vadd.f32 %v2832_v24, %v5496_v47  ;;  %v3186_v3 = vadd.f32 %v3185_v19, %v5498_v52  ;;  %v2834_v2 = vpop.f32.mrb[159].mxu1  ;;  %v3187_v4 = vpop.f32.mrb[167].mxu0 }
 0x3c4   : > { %v3498_v37 = vmax.f32 %v3497_v0, %v2831_v62  ;;  %v3624_v5 = vmax.f32 %v3623_v50, %v3184_v63  ;;  %v2835_v8 = vadd.f32 %v2834_v2, %v5502_v60  ;;  %v3188_v20 = vadd.f32 %v3187_v4, %v5504_v58 }
 0x3c5   : > { %v3436_v42 = vmax.f32 %v3435_v44, %v2833_v13  ;;  %v3562_v16 = vmax.f32 %v3561_v1, %v3186_v3 }
 0x3c6   : > { %v3499_v7 = vmax.f32 %v3498_v37, %v2835_v8  ;;  %v3625_v26 = vmax.f32 %v3624_v5, %v3188_v20 }
 0x3c8   : > { %v2838_v21 = vpop.f32.mrb[160].mxu1  ;;  %v3191_v28 = vpop.f32.mrb[168].mxu0 }
 0x3c9   : > { %v2839_v29 = vadd.f32 %v2838_v21, %v5496_v47  ;;  %v3192_v43 = vadd.f32 %v3191_v28, %v5498_v52  ;;  %v2840_v32 = vpop.f32.mrb[161].mxu1  ;;  %v3193_v9 = vpop.f32.mrb[169].mxu0 }
 0x3ca   : > { %v2841_v23 = vadd.f32 %v2840_v32, %v5502_v60  ;;  %v3194_v33 = vadd.f32 %v3193_v9, %v5504_v58  ;;  %v2842_v49 = vpop.f32.mrb[162].mxu1  ;;  %v3195_v35 = vpop.f32.mrb[170].mxu0 }
 0x3cb   : > { %v3437_v18 = vmax.f32 %v3436_v42, %v2839_v29  ;;  %v3563_v12 = vmax.f32 %v3562_v16, %v3192_v43  ;;  %v2843_v41 = vadd.f32 %v2842_v49, %v5496_v47  ;;  %v3196_v15 = vadd.f32 %v3195_v35, %v5498_v52  ;;  %v2844_v22 = vpop.f32.mrb[163].mxu1  ;;  %v3197_v27 = vpop.f32.mrb[171].mxu0 }
 0x3cc   : > { %v3500_v40 = vmax.f32 %v3499_v7, %v2841_v23  ;;  %v3626_v59 = vmax.f32 %v3625_v26, %v3194_v33  ;;  %v2845_v55 = vadd.f32 %v2844_v22, %v5502_v60  ;;  %v3198_v61 = vadd.f32 %v3197_v27, %v5504_v58 }
 0x3cd   : > { %v3438_v56 = vmax.f32 %v3437_v18, %v2843_v41  ;;  %v3564_v36 = vmax.f32 %v3563_v12, %v3196_v15 }
 0x3ce   : > { %v3501_v25 = vmax.f32 %v3500_v40, %v2845_v55  ;;  %v3627_v38 = vmax.f32 %v3626_v59, %v3198_v61 }
 0x3d0   : > { %v2848_v31 = vpop.f32.mrb[164].mxu1  ;;  %v3201_v14 = vpop.f32.mrb[172].mxu0 }
 0x3d1   : > { %v2849_v39 = vadd.f32 %v2848_v31, %v5496_v47  ;;  %v3202_v48 = vadd.f32 %v3201_v14, %v5498_v52  ;;  %v2850_v30 = vpop.f32.mrb[165].mxu1  ;;  %v3203_v10 = vpop.f32.mrb[173].mxu0 }
 0x3d2   : > { %v2851_v17 = vadd.f32 %v2850_v30, %v5502_v60  ;;  %v3204_v45 = vadd.f32 %v3203_v10, %v5504_v58  ;;  %v2852_v0 = vpop.f32.mrb[166].mxu1  ;;  %v3205_v50 = vpop.f32.mrb[174].mxu0 }
 0x3d3   : > { %v3439_v51 = vmax.f32 %v3438_v56, %v2849_v39  ;;  %v3565_v53 = vmax.f32 %v3564_v36, %v3202_v48  ;;  %v2853_v46 = vadd.f32 %v2852_v0, %v5496_v47  ;;  %v3206_v57 = vadd.f32 %v3205_v50, %v5498_v52  ;;  %v2854_v6 = vpop.f32.mrb[167].mxu1  ;;  %v3207_v54 = vpop.f32.mrb[175].mxu0 }
 0x3d4   : > { %v3502_v62 = vmax.f32 %v3501_v25, %v2851_v17  ;;  %v3628_v63 = vmax.f32 %v3627_v38, %v3204_v45  ;;  %v2855_v24 = vadd.f32 %v2854_v6, %v5502_v60  ;;  %v3208_v19 = vadd.f32 %v3207_v54, %v5504_v58 }
 0x3d5   : > { %v3440_v44 = vmax.f32 %v3439_v51, %v2853_v46  ;;  %v3566_v1 = vmax.f32 %v3565_v53, %v3206_v57 }
 0x3d6   : > { %v3503_v13 = vmax.f32 %v3502_v62, %v2855_v24  ;;  %v3629_v3 = vmax.f32 %v3628_v63, %v3208_v19 }
 0x3d8   : > { %v2858_v2 = vpop.f32.mrb[168].mxu1  ;;  %v3211_v4 = vpop.f32.mrb[176].mxu0 }
 0x3d9   : > { %v2859_v37 = vadd.f32 %v2858_v2, %v5496_v47  ;;  %v3212_v5 = vadd.f32 %v3211_v4, %v5498_v52  ;;  %v2860_v8 = vpop.f32.mrb[169].mxu1  ;;  %v3213_v20 = vpop.f32.mrb[177].mxu0 }
 0x3da   : > { %v2861_v42 = vadd.f32 %v2860_v8, %v5502_v60  ;;  %v3214_v16 = vadd.f32 %v3213_v20, %v5504_v58  ;;  %v2862_v7 = vpop.f32.mrb[170].mxu1  ;;  %v3215_v26 = vpop.f32.mrb[178].mxu0 }
 0x3db   : > { %v3441_v21 = vmax.f32 %v3440_v44, %v2859_v37  ;;  %v3567_v28 = vmax.f32 %v3566_v1, %v3212_v5  ;;  %v2863_v29 = vadd.f32 %v2862_v7, %v5496_v47  ;;  %v3216_v43 = vadd.f32 %v3215_v26, %v5498_v52  ;;  %v2864_v32 = vpop.f32.mrb[171].mxu1  ;;  %v3217_v9 = vpop.f32.mrb[179].mxu0 }
 0x3dc   : > { %v3504_v23 = vmax.f32 %v3503_v13, %v2861_v42  ;;  %v3630_v33 = vmax.f32 %v3629_v3, %v3214_v16  ;;  %v2865_v49 = vadd.f32 %v2864_v32, %v5502_v60  ;;  %v3218_v35 = vadd.f32 %v3217_v9, %v5504_v58 }
 0x3dd   : > { %v3442_v18 = vmax.f32 %v3441_v21, %v2863_v29  ;;  %v3568_v12 = vmax.f32 %v3567_v28, %v3216_v43 }
 0x3de   : > { %v3505_v41 = vmax.f32 %v3504_v23, %v2865_v49  ;;  %v3631_v15 = vmax.f32 %v3630_v33, %v3218_v35 }
 0x3e0   : > { %v2868_v22 = vpop.f32.mrb[172].mxu1  ;;  %v3221_v27 = vpop.f32.mrb[180].mxu0 }
 0x3e1   : > { %v2869_v40 = vadd.f32 %v2868_v22, %v5496_v47  ;;  %v3222_v59 = vadd.f32 %v3221_v27, %v5498_v52  ;;  %v2870_v55 = vpop.f32.mrb[173].mxu1  ;;  %v3223_v61 = vpop.f32.mrb[181].mxu0 }
 0x3e2   : > { %v2871_v56 = vadd.f32 %v2870_v55, %v5502_v60  ;;  %v3224_v36 = vadd.f32 %v3223_v61, %v5504_v58  ;;  %v2872_v25 = vpop.f32.mrb[174].mxu1  ;;  %v3225_v38 = vpop.f32.mrb[182].mxu0 }
 0x3e3   : > { %v3443_v31 = vmax.f32 %v3442_v18, %v2869_v40  ;;  %v3569_v14 = vmax.f32 %v3568_v12, %v3222_v59  ;;  %v2873_v39 = vadd.f32 %v2872_v25, %v5496_v47  ;;  %v3226_v48 = vadd.f32 %v3225_v38, %v5498_v52  ;;  %v2874_v30 = vpop.f32.mrb[175].mxu1  ;;  %v3227_v10 = vpop.f32.mrb[183].mxu0 }
 0x3e4   : > { %v3506_v17 = vmax.f32 %v3505_v41, %v2871_v56  ;;  %v3632_v45 = vmax.f32 %v3631_v15, %v3224_v36  ;;  %v2875_v0 = vadd.f32 %v2874_v30, %v5502_v60  ;;  %v3228_v50 = vadd.f32 %v3227_v10, %v5504_v58 }
 0x3e5   : > { %v3444_v51 = vmax.f32 %v3443_v31, %v2873_v39  ;;  %v3570_v53 = vmax.f32 %v3569_v14, %v3226_v48 }
 0x3e6   : > { %v3507_v46 = vmax.f32 %v3506_v17, %v2875_v0  ;;  %v3633_v57 = vmax.f32 %v3632_v45, %v3228_v50 }
 0x3e8   : > { %v2878_v6 = vpop.f32.mrb[176].mxu1  ;;  %v3231_v54 = vpop.f32.mrb[184].mxu0 }
 0x3e9   : > { %v2879_v62 = vadd.f32 %v2878_v6, %v5496_v47  ;;  %v3232_v63 = vadd.f32 %v3231_v54, %v5498_v52  ;;  %v2880_v24 = vpop.f32.mrb[177].mxu1  ;;  %v3233_v19 = vpop.f32.mrb[185].mxu0 }
 0x3ea   : > { %v2881_v44 = vadd.f32 %v2880_v24, %v5502_v60  ;;  %v3234_v1 = vadd.f32 %v3233_v19, %v5504_v58  ;;  %v2882_v13 = vpop.f32.mrb[178].mxu1  ;;  %v3235_v3 = vpop.f32.mrb[186].mxu0 }
 0x3eb   : > { %v3445_v2 = vmax.f32 %v3444_v51, %v2879_v62  ;;  %v3571_v4 = vmax.f32 %v3570_v53, %v3232_v63  ;;  %v2883_v37 = vadd.f32 %v2882_v13, %v5496_v47  ;;  %v3236_v5 = vadd.f32 %v3235_v3, %v5498_v52  ;;  %v2884_v8 = vpop.f32.mrb[179].mxu1  ;;  %v3237_v20 = vpop.f32.mrb[187].mxu0 }
 0x3ec   : > { %v3508_v42 = vmax.f32 %v3507_v46, %v2881_v44  ;;  %v3634_v16 = vmax.f32 %v3633_v57, %v3234_v1  ;;  %v2885_v7 = vadd.f32 %v2884_v8, %v5502_v60  ;;  %v3238_v26 = vadd.f32 %v3237_v20, %v5504_v58 }
 0x3ed   : > { %v3446_v21 = vmax.f32 %v3445_v2, %v2883_v37  ;;  %v3572_v28 = vmax.f32 %v3571_v4, %v3236_v5 }
 0x3ee   : > { %v3509_v29 = vmax.f32 %v3508_v42, %v2885_v7  ;;  %v3635_v43 = vmax.f32 %v3634_v16, %v3238_v26 }
 0x3f0   : > { %v2888_v32 = vpop.f32.mrb[180].mxu1  ;;  %v3241_v9 = vpop.f32.mrb[188].mxu0 }
 0x3f1   : > { %v2889_v23 = vadd.f32 %v2888_v32, %v5496_v47  ;;  %v3242_v33 = vadd.f32 %v3241_v9, %v5498_v52  ;;  %v2890_v49 = vpop.f32.mrb[181].mxu1  ;;  %v3243_v35 = vpop.f32.mrb[189].mxu0 }
 0x3f2   : > { %v2891_v18 = vadd.f32 %v2890_v49, %v5502_v60  ;;  %v3244_v12 = vadd.f32 %v3243_v35, %v5504_v58  ;;  %v2892_v41 = vpop.f32.mrb[182].mxu1  ;;  %v3245_v15 = vpop.f32.mrb[190].mxu0 }
 0x3f3   : > { %v3447_v22 = vmax.f32 %v3446_v21, %v2889_v23  ;;  %v3573_v27 = vmax.f32 %v3572_v28, %v3242_v33  ;;  %v2893_v40 = vadd.f32 %v2892_v41, %v5496_v47  ;;  %v3246_v59 = vadd.f32 %v3245_v15, %v5498_v52  ;;  %v2894_v55 = vpop.f32.mrb[183].mxu1  ;;  %v3247_v61 = vpop.f32.mrb[191].mxu0 }
 0x3f4   : > { %v3510_v56 = vmax.f32 %v3509_v29, %v2891_v18  ;;  %v3636_v36 = vmax.f32 %v3635_v43, %v3244_v12  ;;  %v2895_v25 = vadd.f32 %v2894_v55, %v5502_v60  ;;  %v3248_v38 = vadd.f32 %v3247_v61, %v5504_v58 }
 0x3f5   : > { %v3448_v31 = vmax.f32 %v3447_v22, %v2893_v40  ;;  %v3574_v14 = vmax.f32 %v3573_v27, %v3246_v59 }
 0x3f6   : > { %v3511_v39 = vmax.f32 %v3510_v56, %v2895_v25  ;;  %v3637_v48 = vmax.f32 %v3636_v36, %v3248_v38 }
 0x3f8   : > { %v2898_v30 = vpop.f32.mrb[184].mxu1  ;;  %v3251_v10 = vpop.f32.mrb[192].mxu0 }
 0x3f9   : > { %v2899_v17 = vadd.f32 %v2898_v30, %v5496_v47  ;;  %v3252_v45 = vadd.f32 %v3251_v10, %v5498_v52  ;;  %v2900_v0 = vpop.f32.mrb[185].mxu1  ;;  %v3253_v50 = vpop.f32.mrb[193].mxu0 }
 0x3fa   : > { %v2901_v51 = vadd.f32 %v2900_v0, %v5502_v60  ;;  %v3254_v53 = vadd.f32 %v3253_v50, %v5504_v58  ;;  %v2902_v46 = vpop.f32.mrb[186].mxu1  ;;  %v3255_v57 = vpop.f32.mrb[194].mxu0 }
 0x3fb   : > { %v3449_v6 = vmax.f32 %v3448_v31, %v2899_v17  ;;  %v3575_v54 = vmax.f32 %v3574_v14, %v3252_v45  ;;  %v2903_v62 = vadd.f32 %v2902_v46, %v5496_v47  ;;  %v3256_v63 = vadd.f32 %v3255_v57, %v5498_v52  ;;  %v2904_v24 = vpop.f32.mrb[187].mxu1  ;;  %v3257_v19 = vpop.f32.mrb[195].mxu0 }
 0x3fc   : > { %v3512_v44 = vmax.f32 %v3511_v39, %v2901_v51  ;;  %v3638_v1 = vmax.f32 %v3637_v48, %v3254_v53  ;;  %v2905_v13 = vadd.f32 %v2904_v24, %v5502_v60  ;;  %v3258_v3 = vadd.f32 %v3257_v19, %v5504_v58 }
 0x3fd   : > { %v3450_v2 = vmax.f32 %v3449_v6, %v2903_v62  ;;  %v3576_v4 = vmax.f32 %v3575_v54, %v3256_v63 }
 0x3fe   : > { %v3513_v37 = vmax.f32 %v3512_v44, %v2905_v13  ;;  %v3639_v5 = vmax.f32 %v3638_v1, %v3258_v3 }
 0x400   : > { %v2908_v8 = vpop.f32.mrb[188].mxu1  ;;  %v3261_v20 = vpop.f32.mrb[196].mxu0 }
 0x401   : > { %v2909_v42 = vadd.f32 %v2908_v8, %v5496_v47  ;;  %v3262_v16 = vadd.f32 %v3261_v20, %v5498_v52  ;;  %v2910_v7 = vpop.f32.mrb[189].mxu1  ;;  %v3263_v26 = vpop.f32.mrb[197].mxu0 }
 0x402   : > { %v2911_v21 = vadd.f32 %v2910_v7, %v5502_v60  ;;  %v3264_v28 = vadd.f32 %v3263_v26, %v5504_v58  ;;  %v2912_v29 = vpop.f32.mrb[190].mxu1  ;;  %v3265_v43 = vpop.f32.mrb[198].mxu0 }
 0x403   : > { %v3451_v32 = vmax.f32 %v3450_v2, %v2909_v42  ;;  %v3577_v9 = vmax.f32 %v3576_v4, %v3262_v16  ;;  %v2913_v23 = vadd.f32 %v2912_v29, %v5496_v47  ;;  %v3266_v33 = vadd.f32 %v3265_v43, %v5498_v52  ;;  %v2914_v49 = vpop.f32.mrb[191].mxu1  ;;  %v3267_v35 = vpop.f32.mrb[199].mxu0 }
 0x404   : > { %v3514_v18 = vmax.f32 %v3513_v37, %v2911_v21  ;;  %v3640_v12 = vmax.f32 %v3639_v5, %v3264_v28  ;;  %v2915_v41 = vadd.f32 %v2914_v49, %v5502_v60  ;;  %v3268_v15 = vadd.f32 %v3267_v35, %v5504_v58 }
 0x405   : > { %v3452_v22 = vmax.f32 %v3451_v32, %v2913_v23  ;;  %v3578_v27 = vmax.f32 %v3577_v9, %v3266_v33 }
 0x406   : > { %v3515_v40 = vmax.f32 %v3514_v18, %v2915_v41  ;;  %v3641_v59 = vmax.f32 %v3640_v12, %v3268_v15 }
 0x408   : > { %v2918_v55 = vpop.f32.mrb[192].mxu1  ;;  %v3271_v61 = vpop.f32.mrb[200].mxu0 }
 0x409   : > { %v2919_v56 = vadd.f32 %v2918_v55, %v5496_v47  ;;  %v3272_v36 = vadd.f32 %v3271_v61, %v5498_v52  ;;  %v2920_v25 = vpop.f32.mrb[193].mxu1  ;;  %v3273_v38 = vpop.f32.mrb[201].mxu0 }
 0x40a   : > { %v2921_v31 = vadd.f32 %v2920_v25, %v5502_v60  ;;  %v3274_v14 = vadd.f32 %v3273_v38, %v5504_v58  ;;  %v2922_v39 = vpop.f32.mrb[194].mxu1  ;;  %v3275_v48 = vpop.f32.mrb[202].mxu0 }
 0x40b   : > { %v3453_v30 = vmax.f32 %v3452_v22, %v2919_v56  ;;  %v3579_v10 = vmax.f32 %v3578_v27, %v3272_v36  ;;  %v2923_v17 = vadd.f32 %v2922_v39, %v5496_v47  ;;  %v3276_v45 = vadd.f32 %v3275_v48, %v5498_v52  ;;  %v2924_v0 = vpop.f32.mrb[195].mxu1  ;;  %v3277_v50 = vpop.f32.mrb[203].mxu0 }
 0x40c   : > { %v3516_v51 = vmax.f32 %v3515_v40, %v2921_v31  ;;  %v3642_v53 = vmax.f32 %v3641_v59, %v3274_v14  ;;  %v2925_v46 = vadd.f32 %v2924_v0, %v5502_v60  ;;  %v3278_v57 = vadd.f32 %v3277_v50, %v5504_v58 }
 0x40d   : > { %v3454_v6 = vmax.f32 %v3453_v30, %v2923_v17  ;;  %v3580_v54 = vmax.f32 %v3579_v10, %v3276_v45 }
 0x40e   : > { %v3517_v62 = vmax.f32 %v3516_v51, %v2925_v46  ;;  %v3643_v63 = vmax.f32 %v3642_v53, %v3278_v57 }
 0x410   : > { %v2928_v24 = vpop.f32.mrb[196].mxu1  ;;  %v3281_v19 = vpop.f32.mrb[204].mxu0 }
 0x411   : > { %v2929_v44 = vadd.f32 %v2928_v24, %v5496_v47  ;;  %v3282_v1 = vadd.f32 %v3281_v19, %v5498_v52  ;;  %v2930_v13 = vpop.f32.mrb[197].mxu1  ;;  %v3283_v3 = vpop.f32.mrb[205].mxu0 }
 0x412   : > { %v2931_v2 = vadd.f32 %v2930_v13, %v5502_v60  ;;  %v3284_v4 = vadd.f32 %v3283_v3, %v5504_v58  ;;  %v2932_v37 = vpop.f32.mrb[198].mxu1  ;;  %v3285_v5 = vpop.f32.mrb[206].mxu0 }
 0x413   : > { %v3455_v8 = vmax.f32 %v3454_v6, %v2929_v44  ;;  %v3581_v20 = vmax.f32 %v3580_v54, %v3282_v1  ;;  %v2933_v42 = vadd.f32 %v2932_v37, %v5496_v47  ;;  %v3286_v16 = vadd.f32 %v3285_v5, %v5498_v52  ;;  %v2934_v7 = vpop.f32.mrb[199].mxu1  ;;  %v3287_v26 = vpop.f32.mrb[207].mxu0 }
 0x414   : > { %v3518_v21 = vmax.f32 %v3517_v62, %v2931_v2  ;;  %v3644_v28 = vmax.f32 %v3643_v63, %v3284_v4  ;;  %v2935_v29 = vadd.f32 %v2934_v7, %v5502_v60  ;;  %v3288_v43 = vadd.f32 %v3287_v26, %v5504_v58 }
 0x415   : > { %v3456_v32 = vmax.f32 %v3455_v8, %v2933_v42  ;;  %v3582_v9 = vmax.f32 %v3581_v20, %v3286_v16 }
 0x416   : > { %v3519_v23 = vmax.f32 %v3518_v21, %v2935_v29  ;;  %v3645_v33 = vmax.f32 %v3644_v28, %v3288_v43 }
 0x418   : > { %v2938_v49 = vpop.f32.mrb[200].mxu1  ;;  %v3291_v35 = vpop.f32.mrb[208].mxu0 }
 0x419   : > { %v2939_v18 = vadd.f32 %v2938_v49, %v5496_v47  ;;  %v3292_v12 = vadd.f32 %v3291_v35, %v5498_v52  ;;  %v2940_v41 = vpop.f32.mrb[201].mxu1  ;;  %v3293_v15 = vpop.f32.mrb[209].mxu0 }
 0x41a   : > { %v2941_v22 = vadd.f32 %v2940_v41, %v5502_v60  ;;  %v3294_v27 = vadd.f32 %v3293_v15, %v5504_v58  ;;  %v2942_v40 = vpop.f32.mrb[202].mxu1  ;;  %v3295_v59 = vpop.f32.mrb[210].mxu0 }
 0x41b   : > { %v3457_v55 = vmax.f32 %v3456_v32, %v2939_v18  ;;  %v3583_v61 = vmax.f32 %v3582_v9, %v3292_v12  ;;  %v2943_v56 = vadd.f32 %v2942_v40, %v5496_v47  ;;  %v3296_v36 = vadd.f32 %v3295_v59, %v5498_v52  ;;  %v2944_v25 = vpop.f32.mrb[203].mxu1  ;;  %v3297_v38 = vpop.f32.mrb[211].mxu0 }
 0x41c   : > { %v3520_v31 = vmax.f32 %v3519_v23, %v2941_v22  ;;  %v3646_v14 = vmax.f32 %v3645_v33, %v3294_v27  ;;  %v2945_v39 = vadd.f32 %v2944_v25, %v5502_v60  ;;  %v3298_v48 = vadd.f32 %v3297_v38, %v5504_v58 }
 0x41d   : > { %v3458_v30 = vmax.f32 %v3457_v55, %v2943_v56  ;;  %v3584_v10 = vmax.f32 %v3583_v61, %v3296_v36 }
 0x41e   : > { %v3521_v17 = vmax.f32 %v3520_v31, %v2945_v39  ;;  %v3647_v45 = vmax.f32 %v3646_v14, %v3298_v48 }
 0x420   : > { %v2948_v0 = vpop.f32.mrb[204].mxu1  ;;  %v3301_v50 = vpop.f32.mrb[212].mxu0 }
 0x421   : > { %v2949_v51 = vadd.f32 %v2948_v0, %v5496_v47  ;;  %v3302_v53 = vadd.f32 %v3301_v50, %v5498_v52  ;;  %v2950_v46 = vpop.f32.mrb[205].mxu1  ;;  %v3303_v57 = vpop.f32.mrb[213].mxu0 }
 0x422   : > { %v2951_v6 = vadd.f32 %v2950_v46, %v5502_v60  ;;  %v3304_v54 = vadd.f32 %v3303_v57, %v5504_v58  ;;  %v2952_v62 = vpop.f32.mrb[206].mxu1  ;;  %v3305_v63 = vpop.f32.mrb[214].mxu0 }
 0x423   : > { %v3459_v24 = vmax.f32 %v3458_v30, %v2949_v51  ;;  %v3585_v19 = vmax.f32 %v3584_v10, %v3302_v53  ;;  %v2953_v44 = vadd.f32 %v2952_v62, %v5496_v47  ;;  %v3306_v1 = vadd.f32 %v3305_v63, %v5498_v52  ;;  %v2954_v13 = vpop.f32.mrb[207].mxu1  ;;  %v3307_v3 = vpop.f32.mrb[215].mxu0 }
 0x424   : > { %v3522_v2 = vmax.f32 %v3521_v17, %v2951_v6  ;;  %v3648_v4 = vmax.f32 %v3647_v45, %v3304_v54  ;;  %v2955_v37 = vadd.f32 %v2954_v13, %v5502_v60  ;;  %v3308_v5 = vadd.f32 %v3307_v3, %v5504_v58 }
 0x425   : > { %v3460_v8 = vmax.f32 %v3459_v24, %v2953_v44  ;;  %v3586_v20 = vmax.f32 %v3585_v19, %v3306_v1 }
 0x426   : > { %v3523_v42 = vmax.f32 %v3522_v2, %v2955_v37  ;;  %v3649_v16 = vmax.f32 %v3648_v4, %v3308_v5 }
 0x428   : > { %v2958_v7 = vpop.f32.mrb[208].mxu1  ;;  %v3311_v26 = vpop.f32.mrb[216].mxu0 }
 0x429   : > { %v2959_v21 = vadd.f32 %v2958_v7, %v5496_v47  ;;  %v3312_v28 = vadd.f32 %v3311_v26, %v5498_v52  ;;  %v2960_v29 = vpop.f32.mrb[209].mxu1  ;;  %v3313_v43 = vpop.f32.mrb[217].mxu0 }
 0x42a   : > { %v2961_v32 = vadd.f32 %v2960_v29, %v5502_v60  ;;  %v3314_v9 = vadd.f32 %v3313_v43, %v5504_v58  ;;  %v2962_v23 = vpop.f32.mrb[210].mxu1  ;;  %v3315_v33 = vpop.f32.mrb[218].mxu0 }
 0x42b   : > { %v3461_v49 = vmax.f32 %v3460_v8, %v2959_v21  ;;  %v3587_v35 = vmax.f32 %v3586_v20, %v3312_v28  ;;  %v2963_v18 = vadd.f32 %v2962_v23, %v5496_v47  ;;  %v3316_v12 = vadd.f32 %v3315_v33, %v5498_v52  ;;  %v2964_v41 = vpop.f32.mrb[211].mxu1  ;;  %v3317_v15 = vpop.f32.mrb[219].mxu0 }
 0x42c   : > { %v3524_v22 = vmax.f32 %v3523_v42, %v2961_v32  ;;  %v3650_v27 = vmax.f32 %v3649_v16, %v3314_v9  ;;  %v2965_v40 = vadd.f32 %v2964_v41, %v5502_v60  ;;  %v3318_v59 = vadd.f32 %v3317_v15, %v5504_v58 }
 0x42d   : > { %v3462_v55 = vmax.f32 %v3461_v49, %v2963_v18  ;;  %v3588_v61 = vmax.f32 %v3587_v35, %v3316_v12 }
 0x42e   : > { %v3525_v56 = vmax.f32 %v3524_v22, %v2965_v40  ;;  %v3651_v36 = vmax.f32 %v3650_v27, %v3318_v59 }
 0x430   : > { %v2968_v25 = vpop.f32.mrb[212].mxu1  ;;  %v3321_v38 = vpop.f32.mrb[220].mxu0 }
 0x431   : > { %v2969_v31 = vadd.f32 %v2968_v25, %v5496_v47  ;;  %v3322_v14 = vadd.f32 %v3321_v38, %v5498_v52  ;;  %v2970_v39 = vpop.f32.mrb[213].mxu1  ;;  %v3323_v48 = vpop.f32.mrb[221].mxu0 }
 0x432   : > { %v2971_v30 = vadd.f32 %v2970_v39, %v5502_v60  ;;  %v3324_v10 = vadd.f32 %v3323_v48, %v5504_v58  ;;  %v2972_v17 = vpop.f32.mrb[214].mxu1  ;;  %v3325_v45 = vpop.f32.mrb[222].mxu0 }
 0x433   : > { %v3463_v0 = vmax.f32 %v3462_v55, %v2969_v31  ;;  %v3589_v50 = vmax.f32 %v3588_v61, %v3322_v14  ;;  %v2973_v51 = vadd.f32 %v2972_v17, %v5496_v47  ;;  %v3326_v53 = vadd.f32 %v3325_v45, %v5498_v52  ;;  %v2974_v46 = vpop.f32.mrb[215].mxu1  ;;  %v3327_v57 = vpop.f32.mrb[223].mxu0 }
 0x434   : > { %v3526_v6 = vmax.f32 %v3525_v56, %v2971_v30  ;;  %v3652_v54 = vmax.f32 %v3651_v36, %v3324_v10  ;;  %v2975_v62 = vadd.f32 %v2974_v46, %v5502_v60  ;;  %v3328_v63 = vadd.f32 %v3327_v57, %v5504_v58 }
 0x435   : > { %v3464_v24 = vmax.f32 %v3463_v0, %v2973_v51  ;;  %v3590_v19 = vmax.f32 %v3589_v50, %v3326_v53 }
 0x436   : > { %v3527_v44 = vmax.f32 %v3526_v6, %v2975_v62  ;;  %v3653_v1 = vmax.f32 %v3652_v54, %v3328_v63 }
 0x438   : > { %v2978_v13 = vpop.f32.mrb[216].mxu1  ;;  %v3331_v3 = vpop.f32.mrb[224].mxu0 }
 0x439   : > { %v2979_v2 = vadd.f32 %v2978_v13, %v5496_v47  ;;  %v3332_v4 = vadd.f32 %v3331_v3, %v5498_v52  ;;  %v2980_v37 = vpop.f32.mrb[217].mxu1  ;;  %v3333_v5 = vpop.f32.mrb[225].mxu0 }
 0x43a   : > { %v2981_v8 = vadd.f32 %v2980_v37, %v5502_v60  ;;  %v3334_v20 = vadd.f32 %v3333_v5, %v5504_v58  ;;  %v2982_v42 = vpop.f32.mrb[218].mxu1  ;;  %v3335_v16 = vpop.f32.mrb[226].mxu0 }
 0x43b   : > { %v3465_v7 = vmax.f32 %v3464_v24, %v2979_v2  ;;  %v3591_v26 = vmax.f32 %v3590_v19, %v3332_v4  ;;  %v2983_v21 = vadd.f32 %v2982_v42, %v5496_v47  ;;  %v3336_v28 = vadd.f32 %v3335_v16, %v5498_v52  ;;  %v2984_v29 = vpop.f32.mrb[219].mxu1  ;;  %v3337_v43 = vpop.f32.mrb[227].mxu0 }
 0x43c   : > { %v3528_v32 = vmax.f32 %v3527_v44, %v2981_v8  ;;  %v3654_v9 = vmax.f32 %v3653_v1, %v3334_v20  ;;  %v2985_v23 = vadd.f32 %v2984_v29, %v5502_v60  ;;  %v3338_v33 = vadd.f32 %v3337_v43, %v5504_v58 }
 0x43d   : > { %v3466_v49 = vmax.f32 %v3465_v7, %v2983_v21  ;;  %v3592_v35 = vmax.f32 %v3591_v26, %v3336_v28 }
 0x43e   : > { %v3529_v18 = vmax.f32 %v3528_v32, %v2985_v23  ;;  %v3655_v12 = vmax.f32 %v3654_v9, %v3338_v33 }
 0x440   : > { %v2988_v41 = vpop.f32.mrb[220].mxu1  ;;  %v3341_v15 = vpop.f32.mrb[228].mxu0 }
 0x441   : > { %v2989_v22 = vadd.f32 %v2988_v41, %v5496_v47  ;;  %v3342_v27 = vadd.f32 %v3341_v15, %v5498_v52  ;;  %v2990_v40 = vpop.f32.mrb[221].mxu1  ;;  %v3343_v59 = vpop.f32.mrb[229].mxu0 }
 0x442   : > { %v2991_v55 = vadd.f32 %v2990_v40, %v5502_v60  ;;  %v3344_v61 = vadd.f32 %v3343_v59, %v5504_v58  ;;  %v2992_v56 = vpop.f32.mrb[222].mxu1  ;;  %v3345_v36 = vpop.f32.mrb[230].mxu0 }
 0x443   : > { %v3467_v25 = vmax.f32 %v3466_v49, %v2989_v22  ;;  %v3593_v38 = vmax.f32 %v3592_v35, %v3342_v27  ;;  %v2993_v31 = vadd.f32 %v2992_v56, %v5496_v47  ;;  %v3346_v14 = vadd.f32 %v3345_v36, %v5498_v52  ;;  %v2994_v39 = vpop.f32.mrb[223].mxu1  ;;  %v3347_v48 = vpop.f32.mrb[231].mxu0 }
 0x444   : > { %v3530_v30 = vmax.f32 %v3529_v18, %v2991_v55  ;;  %v3656_v10 = vmax.f32 %v3655_v12, %v3344_v61  ;;  %v2995_v17 = vadd.f32 %v2994_v39, %v5502_v60  ;;  %v3348_v45 = vadd.f32 %v3347_v48, %v5504_v58 }
 0x445   : > { %v3468_v0 = vmax.f32 %v3467_v25, %v2993_v31  ;;  %v3594_v50 = vmax.f32 %v3593_v38, %v3346_v14 }
 0x446   : > { %v3531_v51 = vmax.f32 %v3530_v30, %v2995_v17  ;;  %v3657_v53 = vmax.f32 %v3656_v10, %v3348_v45 }
 0x448   : > { %v2998_v46 = vpop.f32.mrb[224].mxu1  ;;  %v3351_v57 = vpop.f32.mrb[232].mxu0 }
 0x449   : > { %v2999_v6 = vadd.f32 %v2998_v46, %v5496_v47  ;;  %v3352_v54 = vadd.f32 %v3351_v57, %v5498_v52  ;;  %v3000_v62 = vpop.f32.mrb[225].mxu1  ;;  %v3353_v63 = vpop.f32.mrb[233].mxu0 }
 0x44a   : > { %v3001_v24 = vadd.f32 %v3000_v62, %v5502_v60  ;;  %v3354_v19 = vadd.f32 %v3353_v63, %v5504_v58  ;;  %v3002_v44 = vpop.f32.mrb[226].mxu1  ;;  %v3355_v1 = vpop.f32.mrb[234].mxu0 }
 0x44b   : > { %v3469_v13 = vmax.f32 %v3468_v0, %v2999_v6  ;;  %v3595_v3 = vmax.f32 %v3594_v50, %v3352_v54  ;;  %v3003_v2 = vadd.f32 %v3002_v44, %v5496_v47  ;;  %v3356_v4 = vadd.f32 %v3355_v1, %v5498_v52  ;;  %v3004_v37 = vpop.f32.mrb[227].mxu1  ;;  %v3357_v5 = vpop.f32.mrb[235].mxu0 }
 0x44c   : > { %v3532_v8 = vmax.f32 %v3531_v51, %v3001_v24  ;;  %v3658_v20 = vmax.f32 %v3657_v53, %v3354_v19  ;;  %v3005_v42 = vadd.f32 %v3004_v37, %v5502_v60  ;;  %v3358_v16 = vadd.f32 %v3357_v5, %v5504_v58 }
 0x44d   : > { %v3470_v7 = vmax.f32 %v3469_v13, %v3003_v2  ;;  %v3596_v26 = vmax.f32 %v3595_v3, %v3356_v4 }
 0x44e   : > { %v3533_v21 = vmax.f32 %v3532_v8, %v3005_v42  ;;  %v3659_v28 = vmax.f32 %v3658_v20, %v3358_v16 }
 0x450   : > { %v3008_v29 = vpop.f32.mrb[228].mxu1  ;;  %v3361_v43 = vpop.f32.mrb[236].mxu0 }
 0x451   : > { %v3009_v32 = vadd.f32 %v3008_v29, %v5496_v47  ;;  %v3362_v9 = vadd.f32 %v3361_v43, %v5498_v52  ;;  %v3010_v23 = vpop.f32.mrb[229].mxu1  ;;  %v3363_v33 = vpop.f32.mrb[237].mxu0 }
 0x452   : > { %v3011_v49 = vadd.f32 %v3010_v23, %v5502_v60  ;;  %v3364_v35 = vadd.f32 %v3363_v33, %v5504_v58  ;;  %v3012_v18 = vpop.f32.mrb[230].mxu1  ;;  %v3365_v12 = vpop.f32.mrb[238].mxu0 }
 0x453   : > { %v3471_v41 = vmax.f32 %v3470_v7, %v3009_v32  ;;  %v3597_v15 = vmax.f32 %v3596_v26, %v3362_v9  ;;  %v3013_v22 = vadd.f32 %v3012_v18, %v5496_v47  ;;  %v3366_v27 = vadd.f32 %v3365_v12, %v5498_v52  ;;  %v3014_v40 = vpop.f32.mrb[231].mxu1  ;;  %v3367_v59 = vpop.f32.mrb[239].mxu0 }
 0x454   : > { %v3534_v55 = vmax.f32 %v3533_v21, %v3011_v49  ;;  %v3660_v61 = vmax.f32 %v3659_v28, %v3364_v35  ;;  %v3015_v56 = vadd.f32 %v3014_v40, %v5502_v60  ;;  %v3368_v36 = vadd.f32 %v3367_v59, %v5504_v58 }
 0x455   : > { %v3472_v25 = vmax.f32 %v3471_v41, %v3013_v22  ;;  %v3598_v38 = vmax.f32 %v3597_v15, %v3366_v27 }
 0x456   : > { %v3535_v31 = vmax.f32 %v3534_v55, %v3015_v56  ;;  %v3661_v14 = vmax.f32 %v3660_v61, %v3368_v36 }
 0x458   : > { %v3018_v39 = vpop.f32.mrb[232].mxu1  ;;  %v3371_v48 = vpop.f32.mrb[240].mxu0 }
 0x459   : > { %v3019_v30 = vadd.f32 %v3018_v39, %v5496_v47  ;;  %v3372_v10 = vadd.f32 %v3371_v48, %v5498_v52  ;;  %v3020_v17 = vpop.f32.mrb[233].mxu1  ;;  %v3373_v45 = vpop.f32.mrb[241].mxu0 }
 0x45a   : > { %v3021_v0 = vadd.f32 %v3020_v17, %v5502_v60  ;;  %v3374_v50 = vadd.f32 %v3373_v45, %v5504_v58  ;;  %v3022_v51 = vpop.f32.mrb[234].mxu1  ;;  %v3375_v53 = vpop.f32.mrb[242].mxu0 }
 0x45b   : > { %v3473_v46 = vmax.f32 %v3472_v25, %v3019_v30  ;;  %v3599_v57 = vmax.f32 %v3598_v38, %v3372_v10  ;;  %v3023_v6 = vadd.f32 %v3022_v51, %v5496_v47  ;;  %v3376_v54 = vadd.f32 %v3375_v53, %v5498_v52  ;;  %v3024_v62 = vpop.f32.mrb[235].mxu1  ;;  %v3377_v63 = vpop.f32.mrb[243].mxu0 }
 0x45c   : > { %v3536_v24 = vmax.f32 %v3535_v31, %v3021_v0  ;;  %v3662_v19 = vmax.f32 %v3661_v14, %v3374_v50  ;;  %v3025_v44 = vadd.f32 %v3024_v62, %v5502_v60  ;;  %v3378_v1 = vadd.f32 %v3377_v63, %v5504_v58 }
 0x45d   : > { %v3474_v13 = vmax.f32 %v3473_v46, %v3023_v6  ;;  %v3600_v3 = vmax.f32 %v3599_v57, %v3376_v54 }
 0x45e   : > { %v3537_v2 = vmax.f32 %v3536_v24, %v3025_v44  ;;  %v3663_v4 = vmax.f32 %v3662_v19, %v3378_v1 }
 0x460   : > { %v3028_v37 = vpop.f32.mrb[236].mxu1  ;;  %v3381_v5 = vpop.f32.mrb[244].mxu0 }
 0x461   : > { %v3029_v8 = vadd.f32 %v3028_v37, %v5496_v47  ;;  %v3382_v20 = vadd.f32 %v3381_v5, %v5498_v52  ;;  %v3030_v42 = vpop.f32.mrb[237].mxu1  ;;  %v3383_v16 = vpop.f32.mrb[245].mxu0 }
 0x462   : > { %v3031_v7 = vadd.f32 %v3030_v42, %v5502_v60  ;;  %v3384_v26 = vadd.f32 %v3383_v16, %v5504_v58  ;;  %v3032_v21 = vpop.f32.mrb[238].mxu1  ;;  %v3385_v28 = vpop.f32.mrb[246].mxu0 }
 0x463   : > { %v3475_v29 = vmax.f32 %v3474_v13, %v3029_v8  ;;  %v3601_v43 = vmax.f32 %v3600_v3, %v3382_v20  ;;  %v3033_v32 = vadd.f32 %v3032_v21, %v5496_v47  ;;  %v3386_v9 = vadd.f32 %v3385_v28, %v5498_v52  ;;  %v3034_v23 = vpop.f32.mrb[239].mxu1  ;;  %v3387_v33 = vpop.f32.mrb[247].mxu0 }
 0x464   : > { %v3538_v49 = vmax.f32 %v3537_v2, %v3031_v7  ;;  %v3664_v35 = vmax.f32 %v3663_v4, %v3384_v26  ;;  %v3035_v18 = vadd.f32 %v3034_v23, %v5502_v60  ;;  %v3388_v12 = vadd.f32 %v3387_v33, %v5504_v58 }
 0x465   : > { %v3476_v41 = vmax.f32 %v3475_v29, %v3033_v32  ;;  %v3602_v15 = vmax.f32 %v3601_v43, %v3386_v9 }
 0x466   : > { %v3539_v22 = vmax.f32 %v3538_v49, %v3035_v18  ;;  %v3665_v27 = vmax.f32 %v3664_v35, %v3388_v12 }
 0x468   : > { %v3038_v40 = vpop.f32.mrb[240].mxu1  ;;  %v3391_v59 = vpop.f32.mrb[248].mxu0 }
 0x469   : > { %v3039_v55 = vadd.f32 %v3038_v40, %v5496_v47  ;;  %v3392_v61 = vadd.f32 %v3391_v59, %v5498_v52  ;;  %v3040_v56 = vpop.f32.mrb[241].mxu1  ;;  %v3393_v36 = vpop.f32.mrb[249].mxu0 }
 0x46a   : > { %v3041_v25 = vadd.f32 %v3040_v56, %v5502_v60  ;;  %v3394_v38 = vadd.f32 %v3393_v36, %v5504_v58  ;;  %v3042_v31 = vpop.f32.mrb[242].mxu1  ;;  %v3395_v14 = vpop.f32.mrb[250].mxu0 }
 0x46b   : > { %v3477_v39 = vmax.f32 %v3476_v41, %v3039_v55  ;;  %v3603_v48 = vmax.f32 %v3602_v15, %v3392_v61  ;;  %v3043_v30 = vadd.f32 %v3042_v31, %v5496_v47  ;;  %v3396_v10 = vadd.f32 %v3395_v14, %v5498_v52  ;;  %v3044_v17 = vpop.f32.mrb[243].mxu1  ;;  %v3397_v45 = vpop.f32.mrb[251].mxu0 }
 0x46c   : > { %v3540_v0 = vmax.f32 %v3539_v22, %v3041_v25  ;;  %v3666_v50 = vmax.f32 %v3665_v27, %v3394_v38  ;;  %v3045_v51 = vadd.f32 %v3044_v17, %v5502_v60  ;;  %v3398_v53 = vadd.f32 %v3397_v45, %v5504_v58 }
 0x46d   : > { %v3478_v46 = vmax.f32 %v3477_v39, %v3043_v30  ;;  %v3604_v57 = vmax.f32 %v3603_v48, %v3396_v10 }
 0x46e   : > { %v3541_v6 = vmax.f32 %v3540_v0, %v3045_v51  ;;  %v3667_v54 = vmax.f32 %v3666_v50, %v3398_v53 }
 0x470   : > { %v3048_v62 = vpop.f32.mrb[244].mxu1  ;;  %v3401_v63 = vpop.f32.mrb[252].mxu0 }
 0x471   : > { %v3049_v24 = vadd.f32 %v3048_v62, %v5496_v47  ;;  %v3402_v19 = vadd.f32 %v3401_v63, %v5498_v52  ;;  %v3050_v44 = vpop.f32.mrb[245].mxu1  ;;  %v3403_v1 = vpop.f32.mrb[253].mxu0 }
 0x472   : > { %v3051_v13 = vadd.f32 %v3050_v44, %v5502_v60  ;;  %v3404_v3 = vadd.f32 %v3403_v1, %v5504_v58  ;;  %v3052_v2 = vpop.f32.mrb[246].mxu1  ;;  %v3405_v4 = vpop.f32.mrb[254].mxu0 }
 0x473   : > { %v3479_v37 = vmax.f32 %v3478_v46, %v3049_v24  ;;  %v3605_v5 = vmax.f32 %v3604_v57, %v3402_v19  ;;  %v3053_v8 = vadd.f32 %v3052_v2, %v5496_v47  ;;  %v3406_v20 = vadd.f32 %v3405_v4, %v5498_v52  ;;  %v3054_v42 = vpop.f32.mrb[247].mxu1  ;;  %v3407_v16 = vpop.f32.mrb[255].mxu0 }
 0x474   : > { %v3542_v7 = vmax.f32 %v3541_v6, %v3051_v13  ;;  %v3668_v26 = vmax.f32 %v3667_v54, %v3404_v3  ;;  %v3055_v21 = vadd.f32 %v3054_v42, %v5502_v60  ;;  %v3408_v28 = vadd.f32 %v3407_v16, %v5504_v58 }
 0x475   : > { %v3480_v29 = vmax.f32 %v3479_v37, %v3053_v8  ;;  %v3606_v43 = vmax.f32 %v3605_v5, %v3406_v20 }
 0x476   : > { %v3543_v32 = vmax.f32 %v3542_v7, %v3055_v21  ;;  %v3669_v9 = vmax.f32 %v3668_v26, %v3408_v28 }
 0x478   : > { %v3058_v23 = vpop.f32.mrb[248].mxu1  ;;  %v3411_v33 = vpop.f32.mrb[0].mxu0 }
 0x479   : > { %v3059_v49 = vadd.f32 %v3058_v23, %v5496_v47  ;;  %v3412_v35 = vadd.f32 %v3411_v33, %v5498_v52  ;;  %v3060_v18 = vpop.f32.mrb[249].mxu1  ;;  %v3413_v12 = vpop.f32.mrb[1].mxu0 }
 0x47a   : > { %v3061_v41 = vadd.f32 %v3060_v18, %v5502_v60  ;;  %v3414_v15 = vadd.f32 %v3413_v12, %v5504_v58  ;;  %v3062_v22 = vpop.f32.mrb[250].mxu1  ;;  %v3415_v27 = vpop.f32.mrb[2].mxu0 }
 0x47b   : > { %v3481_v40 = vmax.f32 %v3480_v29, %v3059_v49  ;;  %v3607_v59 = vmax.f32 %v3606_v43, %v3412_v35  ;;  %v3063_v55 = vadd.f32 %v3062_v22, %v5496_v47  ;;  %v3416_v61 = vadd.f32 %v3415_v27, %v5498_v52  ;;  %v3064_v56 = vpop.f32.mrb[251].mxu1  ;;  %v3417_v36 = vpop.f32.mrb[3].mxu0 }
 0x47c   : > { %v3544_v25 = vmax.f32 %v3543_v32, %v3061_v41  ;;  %v3670_v38 = vmax.f32 %v3669_v9, %v3414_v15  ;;  %v3065_v31 = vadd.f32 %v3064_v56, %v5502_v60  ;;  %v3418_v14 = vadd.f32 %v3417_v36, %v5504_v58 }
 0x47d   : > { %v3482_v39 = vmax.f32 %v3481_v40, %v3063_v55  ;;  %v3608_v48 = vmax.f32 %v3607_v59, %v3416_v61  ;;  %v4472_v52 = vmov 1966171168  }
 0x47e   : > { %v3545_v30 = vmax.f32 %v3544_v25, %v3065_v31  ;;  %v3671_v10 = vmax.f32 %v3670_v38, %v3418_v14  ;;  %v3703_v46 = vunpack.c.l.s4 %v4472_v52 }
 0x47f   : > { %v3672_v17 = vrot.slane %v3482_v39, 4  ;;  %v3684_v45 = vrot.slane %v3608_v48, 4 }
 0x480   : > { %v3678_v0 = vrot.slane %v3545_v30, 4  ;;  %v3690_v50 = vrot.slane %v3671_v10, 4  ;;  %v3704_v19 = vunpack.c.0.s8 %v3703_v46 }
 0x481   : > { %v3673_v51 = vmax.f32 %v3482_v39, %v3672_v17  ;;  %v3685_v47 = vmax.f32 %v3608_v48, %v3684_v45 }
 0x482   : > { %v3679_v53 = vmax.f32 %v3545_v30, %v3678_v0  ;;  %v3691_v57 = vmax.f32 %v3671_v10, %v3690_v50  ;;  %v3707_v8 = vsub.s32 %v3704_v19, %v5244_v34 }
 0x483   : > { %v3674_v6 = vrot.slane %v3673_v51, 2  ;;  %v3686_v54 = vrot.slane %v3685_v47, 2 }
 0x484   : > { %v3680_v62 = vrot.slane %v3679_v53, 2  ;;  %v3692_v60 = vrot.slane %v3691_v57, 2 }
 0x485   : > { %v3675_v63 = vmax.f32 %v3673_v51, %v3674_v6  ;;  %v3687_v58 = vmax.f32 %v3685_v47, %v3686_v54 }
 0x486   : > { %v3681_v24 = vmax.f32 %v3679_v53, %v3680_v62  ;;  %v3693_v44 = vmax.f32 %v3691_v57, %v3692_v60 }
 0x487   : > { %v3676_v1 = vrot.slane %v3675_v63, 1  ;;  %v3688_v13 = vrot.slane %v3687_v58, 1 }
 0x488   : > { %v3682_v3 = vrot.slane %v3681_v24, 1  ;;  %v3694_v2 = vrot.slane %v3693_v44, 1 }
 0x489   : > { %v3677_v4 = vmax.f32 %v3675_v63, %v3676_v1  ;;  %v3689_v37 = vmax.f32 %v3687_v58, %v3688_v13 }
 0x48a   : > { %v3683_v5 = vmax.f32 %v3681_v24, %v3682_v3  ;;  %v3695_v20 = vmax.f32 %v3693_v44, %v3694_v2 }
 0x48c   : > { %v3700_v42 = vcombine.low %v3677_v4, %v3683_v5  ;;  %v3701_v16 = vcombine.low %v3689_v37, %v3695_v20 }
 0x48e   : > { %v3708_v7 = vrot.slane %v3700_v42, %v3707_v8  ;;  %v3715_v26 = vrot.slane %v3701_v16, %v3707_v8 }
 0x490   : > { %v3716_v21 = vcombine.low %v3708_v7, %v3715_v26 }
 0x492   : > { %v3723_v28 = vrot.slane %v3716_v21, %v3707_v8 }
 0x494   : > { %3729 = vst.msk [vmem:[%s382_s28] sm:$0xf] %vm3727_vm3, %v3723_v28 }
 0x495 PF: > { %s19_s11 = sadd.s32 1, %s4469_s11   ;;  %s5805_s30 = smov %s4465_s10 }
 0x496   : > { %p16_p5 = scmp.ge.s32.totalorder %s19_s11, 4   ;;  %s5806_s10 = smov %s5808_s12 }
 0x498   :  { %18 = sbr.rel (!%p16_p5) target bundleno = 2 (0x2), region = 86 }

</bundles_post_ra>
